<compile_context>
chip_gen: v5e
topology: v5e:2x2
jax: 0.10.0
libtpu: 0.0.40
codegen_flags: <defaults>
</compile_context>

<pallas_src>
import functools

import jax
import jax.numpy as jnp
from jax.experimental import pallas as pl
from jax.experimental.pallas import tpu as pltpu


def _interaction_kernel(dense_ref, sparse_ref, t_ref, s_ref, out_ref):
    """dense_ref: (BB, D); sparse_ref: (BB, N*D); t_ref: (D, N*D) broadcast
    matrix; s_ref: (N*D, N) segment-sum matrix; out_ref: (BB, P)."""
    D = dense_ref.shape[1]
    ND = sparse_ref.shape[1]
    N = ND // D
    F = N + 1

    cols = []
    for i in range(F - 1):
        c = N - i                                    # pairs whose left feature is i
        # Left feature i: combined feature 0 is dense, k>=1 is sparse feature k-1.
        x = dense_ref[...] if i == 0 else sparse_ref[:, (i - 1) * D:i * D]
        tail = sparse_ref[:, i * D:]                 # (BB, c*D) contiguous lanes
        # Lane-broadcast x across the c D-wide segments on the (otherwise idle)
        # MXU: T[:, :c*D] repeats the DxD identity c times, so xb[:, k*D+d] == x[:, d].
        xb = jnp.dot(
            x, t_ref[:, :c * D],
            preferred_element_type=jnp.float32,
            precision=jax.lax.Precision.HIGHEST,
        ).astype(x.dtype)                            # exact (0/1 weights); keeps bf16 on VPU
        prod = xb * tail                             # full-lane-width VPU multiply
        # Segment-sum the D-wide products into the c pair columns on the MXU.
        cols.append(jnp.dot(
            prod, s_ref[:c * D, :c],
            preferred_element_type=jnp.float32,
            precision=jax.lax.Precision.HIGHEST,
        ))
    out = cols[0] if len(cols) == 1 else jnp.concatenate(cols, axis=-1)
    out_ref[...] = out.astype(out_ref.dtype)         # single coalesced store per step


def _round_up(x, m):
    return ((x + m - 1) // m) * m


# Block + in-kernel-scratch budget sized against the smallest VMEM generation
# (v7x: 64 MiB per TensorCore), leaving headroom for compiler temporaries.
_VMEM_BLOCK_BUDGET = 24 * 1024 * 1024
_VMEM_LIMIT_BYTES = 48 * 1024 * 1024


def _block_bytes_per_row(D, N, P, itemsize):
    """Approximate per-batch-row VMEM bytes: double-buffered in/out blocks plus
    the f32 intermediates (broadcast slab, product slab, pair columns)."""
    lanes = lambda n: _round_up(max(n, 1), 128)
    io_row = (lanes(D) + lanes(N * D) + lanes(P)) * max(itemsize, 4)
    tmp_row = (2 * N * D + lanes(P)) * 4
    return 2 * io_row + tmp_row


def _pick_block_batch(B, D, N, P, itemsize, block_b=None):
    if B <= 8:
        return B
    row = _block_bytes_per_row(D, N, P, itemsize)
    max_rows = max(8, min(4096, (_VMEM_BLOCK_BUDGET // row) // 8 * 8))

    if block_b is not None:
        # Validate / clamp a user-supplied block against B and the VMEM budget.
        bb = max(8, (min(int(block_b), B, max_rows) // 8) * 8)
        return B if bb >= B else bb

    # Prefer >=2 grid steps so v7x can split the "parallel" axis across its two
    # TensorCores; prefer blocks that divide B so the last block is full.
    cap = min(max_rows, max(8, ((B // 2) // 8) * 8))
    for bb in (4096, 2048, 1024, 512, 256, 128, 64, 32, 16, 8):
        if bb <= cap and B % bb == 0:
            return bb
    return 8  # partial last block: inputs padded, output writes clipped by Pallas


@functools.partial(jax.jit, static_argnames=("block_b",))
def _interaction_forward(dense, sparse, *, block_b=None):
    B, D = dense.shape
    _, N, D2 = sparse.shape
    assert D == D2, (D, D2)
    F = N + 1
    P = (F * (F - 1)) // 2
    if P == 0:
        return jnp.zeros((B, 0), dtype=dense.dtype)

    # Free row-major reshape: sparse feature k occupies lanes [k*D, (k+1)*D).
    sparse2d = sparse.reshape(B, N * D)

    cdt = dense.dtype
    # T[d, k*D + d] = 1  (lane-broadcast matrix, prefix-sliceable over k)
    t_mat = jnp.tile(jnp.eye(D, dtype=cdt), (1, N))                       # (D, N*D)
    # S[k*D + d, k] = 1  (D-segment-sum matrix, prefix-sliceable in both dims)
    s_mat = (jnp.arange(N * D)[:, None] // D == jnp.arange(N)[None, :]).astype(cdt)

    itemsize = jnp.dtype(cdt).itemsize
    BB = _pick_block_batch(B, D, N, P, itemsize, block_b)
    grid = (pl.cdiv(B, BB),)

    sum_sq = N * (N + 1) * (2 * N + 1) // 6
    cost = pl.CostEstimate(
        flops=int(B * (2 * D * D * P + P * D + 2 * D * sum_sq)),
        transcendentals=0,
        bytes_accessed=int((B * (D + N * D + P) + D * N * D + N * D * N) * itemsize),
    )

    return pl.pallas_call(
        _interaction_kernel,
        out_shape=jax.ShapeDtypeStruct((B, P), cdt),
        grid_spec=pltpu.PrefetchScalarGridSpec(
            num_scalar_prefetch=0,
            grid=grid,
            in_specs=[
                pl.BlockSpec((BB, D), lambda b: (b, 0)),
                pl.BlockSpec((BB, N * D), lambda b: (b, 0)),
                pl.BlockSpec((D, N * D), lambda b: (0, 0)),   # constant, stays resident
                pl.BlockSpec((N * D, N), lambda b: (0, 0)),   # constant, stays resident
            ],
            out_specs=pl.BlockSpec((BB, P), lambda b: (b, 0)),
        ),
        compiler_params=pltpu.CompilerParams(
            dimension_semantics=("parallel",),
            vmem_limit_bytes=_VMEM_LIMIT_BYTES,
        ),
        cost_estimate=cost,
    )(dense, sparse2d, t_mat, s_mat)


class InteractionArch:
    """JAX/Pallas port of tzrec.modules.interaction.InteractionArch."""

    def __init__(self, feature_num: int) -> None:
        self.feature_num = feature_num

    def output_dim(self) -> int:
        return sum(range(1, self.feature_num))

    def __call__(self, dense_features, sparse_features, *, block_b=None):
        if self.feature_num <= 0:
            return dense_features
        assert sparse_features.shape[1] == self.feature_num - 1
        return _interaction_forward(dense_features, sparse_features, block_b=block_b)


def _reference(dense, sparse):
    combined = jnp.concatenate((dense[:, None, :], sparse), axis=1)
    full = jnp.einsum("bfd,bgd->bfg", combined, combined)
    i0, i1 = jnp.triu_indices(combined.shape[1], k=1)
    return full[:, i0, i1]


if __name__ == "__main__":
    root = jax.random.PRNGKey(0)
    k1, k2, k3, k4, k5, k6 = jax.random.split(root, 6)

    D = 32
    feature_num = 8                      # 1 dense slot + 7 sparse features
    N = feature_num - 1
    arch = InteractionArch(feature_num)

    # Tiny batch: single grid step with a full-B block.
    B = 2
    dense = jax.random.normal(k1, (B, D), dtype=jnp.float32)
    sparse = jax.random.normal(k2, (B, N, D), dtype=jnp.float32)
    out = jax.block_until_ready(arch(dense, sparse))
    ref = _reference(dense, sparse)
    assert out.shape == (B, arch.output_dim()), (out.shape, arch.output_dim())
    assert jnp.allclose(out, ref, atol=1e-3, rtol=1e-3)

    # Multi-step grid with an explicit (validated) batch block -> grid (4,).
    B2 = 64
    dense2 = jax.random.normal(k3, (B2, D), dtype=jnp.float32)
    sparse2 = jax.random.normal(k4, (B2, N, D), dtype=jnp.float32)
    out2 = jax.block_until_ready(arch(dense2, sparse2, block_b=16))
    assert jnp.allclose(out2, _reference(dense2, sparse2), atol=1e-3, rtol=1e-3)

    # Non-dividing batch -> partial last block; checks padded rows cannot leak
    # into / overwrite valid output rows.
    B3 = 20
    dense3 = jax.random.normal(k5, (B3, D), dtype=jnp.float32)
    sparse3 = jax.random.normal(k6, (B3, N, D), dtype=jnp.float32)
    out3 = jax.block_until_ready(arch(dense3, sparse3))
    assert out3.shape == (B3, arch.output_dim())
    assert jnp.allclose(out3, _reference(dense3, sparse3), atol=1e-3, rtol=1e-3)

    print("KERNEL_OK")
</pallas_src>

<mosaic_0001>
module attributes {stable_mosaic.version = 11 : i64} {
  func.func @_interaction_kernel(%arg0: i32, %arg1: memref<2x32xf32, #tpu.memory_space<vmem>>, %arg2: memref<2x224xf32, #tpu.memory_space<vmem>>, %arg3: memref<32x224xf32, #tpu.memory_space<vmem>>, %arg4: memref<224x7xf32, #tpu.memory_space<vmem>>, %arg5: memref<2x28xf32, #tpu.memory_space<vmem>>) attributes {dimension_semantics = [#tpu.dimension_semantics<parallel>], iteration_bounds = array<i64: 1>, scalar_prefetch = 0 : i64, scratch_operands = 0 : i64, tpu.core_type = #tpu.core_type<tc>, window_params = [{transform_indices = @transform_0, window_bounds = array<i64: 2, 32>}, {transform_indices = @transform_1, window_bounds = array<i64: 2, 224>}, {pipeline_mode = #tpu.pipeline_mode<synchronous>, transform_indices = @transform_2, window_bounds = array<i64: 32, 224>}, {pipeline_mode = #tpu.pipeline_mode<synchronous>, transform_indices = @transform_3, window_bounds = array<i64: 224, 7>}, {transform_indices = @transform_4, window_bounds = array<i64: 2, 28>}]} {
    %c0 = arith.constant 0 : index
    %c0_0 = arith.constant 0 : index
    %0 = vector.load %arg1[%c0, %c0_0] : memref<2x32xf32, #tpu.memory_space<vmem>>, vector<2x32xf32>
    %c0_1 = arith.constant 0 : index
    %c0_2 = arith.constant 0 : index
    %1 = vector.load %arg2[%c0_1, %c0_2] : memref<2x224xf32, #tpu.memory_space<vmem>>, vector<2x224xf32>
    %c0_3 = arith.constant 0 : index
    %c0_4 = arith.constant 0 : index
    %2 = vector.load %arg3[%c0_3, %c0_4] : memref<32x224xf32, #tpu.memory_space<vmem>>, vector<32x224xf32>
    %cst = arith.constant dense<0.000000e+00> : vector<2x224xf32>
    %3 = tpu.matmul %0, %2, %cst {dimension_numbers = #tpu.dot_dimension_numbers<[1], [0], [0], [1], [0, 0, 1, 1], [], []>, precision = #tpu.contract_precision<fp32>} : vector<2x32xf32>, vector<32x224xf32>, vector<2x224xf32> -> vector<2x224xf32>
    %4 = arith.mulf %3, %1 : vector<2x224xf32>
    %c0_5 = arith.constant 0 : index
    %c0_6 = arith.constant 0 : index
    %5 = vector.load %arg4[%c0_5, %c0_6] : memref<224x7xf32, #tpu.memory_space<vmem>>, vector<224x7xf32>
    %cst_7 = arith.constant dense<0.000000e+00> : vector<2x7xf32>
    %6 = tpu.matmul %4, %5, %cst_7 {dimension_numbers = #tpu.dot_dimension_numbers<[1], [0], [0], [1], [0, 0, 1, 1], [], []>, precision = #tpu.contract_precision<fp32>} : vector<2x224xf32>, vector<224x7xf32>, vector<2x7xf32> -> vector<2x7xf32>
    %c0_8 = arith.constant 0 : index
    %c0_9 = arith.constant 0 : index
    %7 = vector.load %arg2[%c0_8, %c0_9] : memref<2x224xf32, #tpu.memory_space<vmem>>, vector<2x32xf32>
    %c0_10 = arith.constant 0 : index
    %c32 = arith.constant 32 : index
    %8 = vector.load %arg2[%c0_10, %c32] : memref<2x224xf32, #tpu.memory_space<vmem>>, vector<2x192xf32>
    %c0_11 = arith.constant 0 : index
    %c0_12 = arith.constant 0 : index
    %9 = vector.load %arg3[%c0_11, %c0_12] : memref<32x224xf32, #tpu.memory_space<vmem>>, vector<32x192xf32>
    %cst_13 = arith.constant dense<0.000000e+00> : vector<2x192xf32>
    %10 = tpu.matmul %7, %9, %cst_13 {dimension_numbers = #tpu.dot_dimension_numbers<[1], [0], [0], [1], [0, 0, 1, 1], [], []>, precision = #tpu.contract_precision<fp32>} : vector<2x32xf32>, vector<32x192xf32>, vector<2x192xf32> -> vector<2x192xf32>
    %11 = arith.mulf %10, %8 : vector<2x192xf32>
    %c0_14 = arith.constant 0 : index
    %c0_15 = arith.constant 0 : index
    %12 = vector.load %arg4[%c0_14, %c0_15] : memref<224x7xf32, #tpu.memory_space<vmem>>, vector<192x6xf32>
    %cst_16 = arith.constant dense<0.000000e+00> : vector<2x6xf32>
    %13 = tpu.matmul %11, %12, %cst_16 {dimension_numbers = #tpu.dot_dimension_numbers<[1], [0], [0], [1], [0, 0, 1, 1], [], []>, precision = #tpu.contract_precision<fp32>} : vector<2x192xf32>, vector<192x6xf32>, vector<2x6xf32> -> vector<2x6xf32>
    %c0_17 = arith.constant 0 : index
    %c32_18 = arith.constant 32 : index
    %14 = vector.load %arg2[%c0_17, %c32_18] : memref<2x224xf32, #tpu.memory_space<vmem>>, vector<2x32xf32>
    %c0_19 = arith.constant 0 : index
    %c64 = arith.constant 64 : index
    %15 = vector.load %arg2[%c0_19, %c64] : memref<2x224xf32, #tpu.memory_space<vmem>>, vector<2x160xf32>
    %c0_20 = arith.constant 0 : index
    %c0_21 = arith.constant 0 : index
    %16 = vector.load %arg3[%c0_20, %c0_21] : memref<32x224xf32, #tpu.memory_space<vmem>>, vector<32x160xf32>
    %cst_22 = arith.constant dense<0.000000e+00> : vector<2x160xf32>
    %17 = tpu.matmul %14, %16, %cst_22 {dimension_numbers = #tpu.dot_dimension_numbers<[1], [0], [0], [1], [0, 0, 1, 1], [], []>, precision = #tpu.contract_precision<fp32>} : vector<2x32xf32>, vector<32x160xf32>, vector<2x160xf32> -> vector<2x160xf32>
    %18 = arith.mulf %17, %15 : vector<2x160xf32>
    %c0_23 = arith.constant 0 : index
    %c0_24 = arith.constant 0 : index
    %19 = vector.load %arg4[%c0_23, %c0_24] : memref<224x7xf32, #tpu.memory_space<vmem>>, vector<160x5xf32>
    %cst_25 = arith.constant dense<0.000000e+00> : vector<2x5xf32>
    %20 = tpu.matmul %18, %19, %cst_25 {dimension_numbers = #tpu.dot_dimension_numbers<[1], [0], [0], [1], [0, 0, 1, 1], [], []>, precision = #tpu.contract_precision<fp32>} : vector<2x160xf32>, vector<160x5xf32>, vector<2x5xf32> -> vector<2x5xf32>
    %c0_26 = arith.constant 0 : index
    %c64_27 = arith.constant 64 : index
    %21 = vector.load %arg2[%c0_26, %c64_27] : memref<2x224xf32, #tpu.memory_space<vmem>>, vector<2x32xf32>
    %c0_28 = arith.constant 0 : index
    %c96 = arith.constant 96 : index
    %22 = vector.load %arg2[%c0_28, %c96] : memref<2x224xf32, #tpu.memory_space<vmem>>, vector<2x128xf32>
    %c0_29 = arith.constant 0 : index
    %c0_30 = arith.constant 0 : index
    %23 = vector.load %arg3[%c0_29, %c0_30] : memref<32x224xf32, #tpu.memory_space<vmem>>, vector<32x128xf32>
    %cst_31 = arith.constant dense<0.000000e+00> : vector<2x128xf32>
    %24 = tpu.matmul %21, %23, %cst_31 {dimension_numbers = #tpu.dot_dimension_numbers<[1], [0], [0], [1], [0, 0, 1, 1], [], []>, precision = #tpu.contract_precision<fp32>} : vector<2x32xf32>, vector<32x128xf32>, vector<2x128xf32> -> vector<2x128xf32>
    %25 = arith.mulf %24, %22 : vector<2x128xf32>
    %c0_32 = arith.constant 0 : index
    %c0_33 = arith.constant 0 : index
    %26 = vector.load %arg4[%c0_32, %c0_33] : memref<224x7xf32, #tpu.memory_space<vmem>>, vector<128x4xf32>
    %cst_34 = arith.constant dense<0.000000e+00> : vector<2x4xf32>
    %27 = tpu.matmul %25, %26, %cst_34 {dimension_numbers = #tpu.dot_dimension_numbers<[1], [0], [0], [1], [0, 0, 1, 1], [], []>, precision = #tpu.contract_precision<fp32>} : vector<2x128xf32>, vector<128x4xf32>, vector<2x4xf32> -> vector<2x4xf32>
    %c0_35 = arith.constant 0 : index
    %c96_36 = arith.constant 96 : index
    %28 = vector.load %arg2[%c0_35, %c96_36] : memref<2x224xf32, #tpu.memory_space<vmem>>, vector<2x32xf32>
    %c0_37 = arith.constant 0 : index
    %c128 = arith.constant 128 : index
    %29 = vector.load %arg2[%c0_37, %c128] : memref<2x224xf32, #tpu.memory_space<vmem>>, vector<2x96xf32>
    %c0_38 = arith.constant 0 : index
    %c0_39 = arith.constant 0 : index
    %30 = vector.load %arg3[%c0_38, %c0_39] : memref<32x224xf32, #tpu.memory_space<vmem>>, vector<32x96xf32>
    %cst_40 = arith.constant dense<0.000000e+00> : vector<2x96xf32>
    %31 = tpu.matmul %28, %30, %cst_40 {dimension_numbers = #tpu.dot_dimension_numbers<[1], [0], [0], [1], [0, 0, 1, 1], [], []>, precision = #tpu.contract_precision<fp32>} : vector<2x32xf32>, vector<32x96xf32>, vector<2x96xf32> -> vector<2x96xf32>
    %32 = arith.mulf %31, %29 : vector<2x96xf32>
    %c0_41 = arith.constant 0 : index
    %c0_42 = arith.constant 0 : index
    %33 = vector.load %arg4[%c0_41, %c0_42] : memref<224x7xf32, #tpu.memory_space<vmem>>, vector<96x3xf32>
    %cst_43 = arith.constant dense<0.000000e+00> : vector<2x3xf32>
    %34 = tpu.matmul %32, %33, %cst_43 {dimension_numbers = #tpu.dot_dimension_numbers<[1], [0], [0], [1], [0, 0, 1, 1], [], []>, precision = #tpu.contract_precision<fp32>} : vector<2x96xf32>, vector<96x3xf32>, vector<2x3xf32> -> vector<2x3xf32>
    %c0_44 = arith.constant 0 : index
    %c128_45 = arith.constant 128 : index
    %35 = vector.load %arg2[%c0_44, %c128_45] : memref<2x224xf32, #tpu.memory_space<vmem>>, vector<2x32xf32>
    %c0_46 = arith.constant 0 : index
    %c160 = arith.constant 160 : index
    %36 = vector.load %arg2[%c0_46, %c160] : memref<2x224xf32, #tpu.memory_space<vmem>>, vector<2x64xf32>
    %c0_47 = arith.constant 0 : index
    %c0_48 = arith.constant 0 : index
    %37 = vector.load %arg3[%c0_47, %c0_48] : memref<32x224xf32, #tpu.memory_space<vmem>>, vector<32x64xf32>
    %cst_49 = arith.constant dense<0.000000e+00> : vector<2x64xf32>
    %38 = tpu.matmul %35, %37, %cst_49 {dimension_numbers = #tpu.dot_dimension_numbers<[1], [0], [0], [1], [0, 0, 1, 1], [], []>, precision = #tpu.contract_precision<fp32>} : vector<2x32xf32>, vector<32x64xf32>, vector<2x64xf32> -> vector<2x64xf32>
    %39 = arith.mulf %38, %36 : vector<2x64xf32>
    %c0_50 = arith.constant 0 : index
    %c0_51 = arith.constant 0 : index
    %40 = vector.load %arg4[%c0_50, %c0_51] : memref<224x7xf32, #tpu.memory_space<vmem>>, vector<64x2xf32>
    %cst_52 = arith.constant dense<0.000000e+00> : vector<2x2xf32>
    %41 = tpu.matmul %39, %40, %cst_52 {dimension_numbers = #tpu.dot_dimension_numbers<[1], [0], [0], [1], [0, 0, 1, 1], [], []>, precision = #tpu.contract_precision<fp32>} : vector<2x64xf32>, vector<64x2xf32>, vector<2x2xf32> -> vector<2x2xf32>
    %c0_53 = arith.constant 0 : index
    %c160_54 = arith.constant 160 : index
    %42 = vector.load %arg2[%c0_53, %c160_54] : memref<2x224xf32, #tpu.memory_space<vmem>>, vector<2x32xf32>
    %c0_55 = arith.constant 0 : index
    %c192 = arith.constant 192 : index
    %43 = vector.load %arg2[%c0_55, %c192] : memref<2x224xf32, #tpu.memory_space<vmem>>, vector<2x32xf32>
    %c0_56 = arith.constant 0 : index
    %c0_57 = arith.constant 0 : index
    %44 = vector.load %arg3[%c0_56, %c0_57] : memref<32x224xf32, #tpu.memory_space<vmem>>, vector<32x32xf32>
    %cst_58 = arith.constant dense<0.000000e+00> : vector<2x32xf32>
    %45 = tpu.matmul %42, %44, %cst_58 {dimension_numbers = #tpu.dot_dimension_numbers<[1], [0], [0], [1], [0, 0, 1, 1], [], []>, precision = #tpu.contract_precision<fp32>} : vector<2x32xf32>, vector<32x32xf32>, vector<2x32xf32> -> vector<2x32xf32>
    %46 = arith.mulf %45, %43 : vector<2x32xf32>
    %c0_59 = arith.constant 0 : index
    %c0_60 = arith.constant 0 : index
    %47 = vector.load %arg4[%c0_59, %c0_60] : memref<224x7xf32, #tpu.memory_space<vmem>>, vector<32x1xf32>
    %cst_61 = arith.constant dense<0.000000e+00> : vector<2x1xf32>
    %48 = tpu.matmul %46, %47, %cst_61 {dimension_numbers = #tpu.dot_dimension_numbers<[1], [0], [0], [1], [0, 0, 1, 1], [], []>, precision = #tpu.contract_precision<fp32>} : vector<2x32xf32>, vector<32x1xf32>, vector<2x1xf32> -> vector<2x1xf32>
    %49 = tpu.concatenate %6, %13, %20, %27, %34, %41, %48 in 1 : vector<2x7xf32>, vector<2x6xf32>, vector<2x5xf32>, vector<2x4xf32>, vector<2x3xf32>, vector<2x2xf32>, vector<2x1xf32> -> vector<2x28xf32>
    %c0_62 = arith.constant 0 : index
    %c0_63 = arith.constant 0 : index
    %50 = vector.load %arg5[%c0_62, %c0_63] : memref<2x28xf32, #tpu.memory_space<vmem>>, vector<2x28xf32>
    tpu.vector_store %arg5[%c0_62, %c0_63], %49 {strides = array<i32>} : memref<2x28xf32, #tpu.memory_space<vmem>>, vector<2x28xf32>,
    return
  }
  func.func @transform_0(%arg0: i32) -> (i32, i32) {
    %c0_i32 = arith.constant 0 : i32
    %c0_i32_0 = arith.constant 0 : i32
    return %arg0, %c0_i32 : i32, i32
  }
  func.func @transform_1(%arg0: i32) -> (i32, i32) {
    %c0_i32 = arith.constant 0 : i32
    %c0_i32_0 = arith.constant 0 : i32
    return %arg0, %c0_i32 : i32, i32
  }
  func.func @transform_2(%arg0: i32) -> (i32, i32) {
    %c0_i32 = arith.constant 0 : i32
    %c0_i32_0 = arith.constant 0 : i32
    %c0_i32_1 = arith.constant 0 : i32
    return %c0_i32, %c0_i32_0 : i32, i32
  }
  func.func @transform_3(%arg0: i32) -> (i32, i32) {
    %c0_i32 = arith.constant 0 : i32
    %c0_i32_0 = arith.constant 0 : i32
    %c0_i32_1 = arith.constant 0 : i32
    return %c0_i32, %c0_i32_0 : i32, i32
  }
  func.func @transform_4(%arg0: i32) -> (i32, i32) {
    %c0_i32 = arith.constant 0 : i32
    %c0_i32_0 = arith.constant 0 : i32
    return %arg0, %c0_i32 : i32, i32
  }
}

</mosaic_0001>

<bundles_post_ra>
// kernel: tile.9
= control target key start
LH: loop header
LB: loop body
LE: loop exit
PB: predicated region body
PF: predicated region fallthrough
CT: control target
= control target key end

     0   :  { %vm92_vm0 = vcmask 1047556   ;;  %s403_s14 = smov 96   ;;  %s404_s27 = smov 64   ;;  %vm3_vm1 = vcmask 261120   ;;  %vm96_vm2 = vcmask 1048320   ;;  %vm139_vm3 = vcmask 785920   ;;  %s796_s0 = inlined_call_operand.vmem [shape: f32[32,7,32], index: 0, kind: input, shape index: {}]   ;;  %s797_s1 = inlined_call_operand.vmem [shape: f32[32,224], index: 1, kind: output, shape index: {}]  }
   0x1   :  { %v348_v0 = vld [vmem:[%s796_s0 + $0x43] ss:$8 sm:$0xf]   ;;  %v354_v12 = vld [vmem:[%s796_s0 + $0x2] ss:$8 sm:$0xf]  }
   0x2   :  { %v349_v1 = vld [vmem:[%s796_s0 + $0x43] ss:$8 sm:$0xf0]   ;;  %v355_v13 = vld [vmem:[%s796_s0 + $0x2] ss:$8 sm:$0xf0]  }
   0x3   :  { %v114_v2 = vsel %vm92_vm0, %v349_v1, %v348_v0  ;;  %v343_v3 = vld [vmem:[%s796_s0 + $0x3] ss:$8 sm:$0xf]   ;;  %v136_v14 = vsel %vm92_vm0, %v355_v13, %v354_v12  ;;  %v362_v15 = vld [vmem:[%s796_s0 + $0x86] ss:$8 sm:$0xf]  }
   0x4   :  { %v344_v4 = vld [vmem:[%s796_s0 + $0x3] ss:$8 sm:$0xf0]   ;;  %115 = vrot.lane.b32.xlu1 %v114_v2, %s403_s14  ;;  %137 = vrot.lane.b32.xlu2 %v136_v14, %s404_s27  ;;  %v363_v16 = vld [vmem:[%s796_s0 + $0x86] ss:$8 sm:$0xf0]  }
   0x5   :  { %v93_v5 = vsel %vm92_vm0, %v344_v4, %v343_v3  ;;  %v351_v6 = vld [vmem:[%s796_s0 + $0xc3] ss:$8 sm:$0xf]   ;;  %v356_v17 = vld [vmem:[%s796_s0 + $0x82] ss:$8 sm:$0xf]   ;;  %v168_v21 = vsel %vm92_vm0, %v363_v16, %v362_v15 }
   0x6   :  { %94 = vrot.lane.b32.xlu0 %v93_v5, %s403_s14  ;;  %v352_v7 = vld [vmem:[%s796_s0 + $0xc3] ss:$8 sm:$0xf0]   ;;  %v357_v18 = vld [vmem:[%s796_s0 + $0x82] ss:$8 sm:$0xf0]  }
   0x7   :  { %v345_v8 = vld [vmem:[%s796_s0 + $0x83] ss:$8 sm:$0xf]   ;;  %v125_v10 = vsel %vm92_vm0, %v352_v7, %v351_v6  ;;  %v359_v19 = vld [vmem:[%s796_s0 + $0x6] ss:$8 sm:$0xf]   ;;  %v146_v22 = vsel %vm92_vm0, %v357_v18, %v356_v17 }
   0x8   :  { %v346_v9 = vld [vmem:[%s796_s0 + $0x83] ss:$8 sm:$0xf0]   ;;  %v360_v20 = vld [vmem:[%s796_s0 + $0x6] ss:$8 sm:$0xf0]  }
   0x9   :  { %v103_v11 = vsel %vm92_vm0, %v346_v9, %v345_v8  ;;  %v157_v23 = vsel %vm92_vm0, %v360_v20, %v359_v19  ;;  %v371_v24 = vld [vmem:[%s796_s0 + $0x46] ss:$8 sm:$0xf]   ;;  %v365_v26 = vld [vmem:[%s796_s0 + $0x42] ss:$8 sm:$0xf]  }
   0xa   :  { %v372_v25 = vld [vmem:[%s796_s0 + $0x46] ss:$8 sm:$0xf0]   ;;  %v366_v27 = vld [vmem:[%s796_s0 + $0x42] ss:$8 sm:$0xf0]  }
   0xb   :  { %v368_v28 = vld [vmem:[%s796_s0 + $0xc2] ss:$8 sm:$0xf]   ;;  %v201_v30 = vsel %vm92_vm0, %v372_v25, %v371_v24  ;;  %v179_v31 = vsel %vm92_vm0, %v366_v27, %v365_v26  ;;  %v379_v33 = vld [vmem:[%s796_s0 + $0x81] ss:$8 sm:$0xf]  }
   0xc   :  { %126 = vrot.lane.b32.xlu1 %v125_v10, %s403_s14  ;;  %147 = vrot.lane.b32.xlu2 %v146_v22, %s404_s27  ;;  %v369_v29 = vld [vmem:[%s796_s0 + $0xc2] ss:$8 sm:$0xf0]   ;;  %v380_v34 = vld [vmem:[%s796_s0 + $0x81] ss:$8 sm:$0xf0]  }
   0xd   :  { %v190_v32 = vsel %vm92_vm0, %v369_v29, %v368_v28  ;;  %v374_v35 = vld [vmem:[%s796_s0 + $0xc6] ss:$8 sm:$0xf]   ;;  %v377_v37 = vld [vmem:[%s796_s0 + $0x1] ss:$8 sm:$0xf]   ;;  %v233_v39 = vsel %vm92_vm0, %v380_v34, %v379_v33 }
   0xe   :  { %104 = vrot.lane.b32.xlu0 %v103_v11, %s403_s14  ;;  %v375_v36 = vld [vmem:[%s796_s0 + $0xc6] ss:$8 sm:$0xf0]   ;;  %v378_v38 = vld [vmem:[%s796_s0 + $0x1] ss:$8 sm:$0xf0]  }
   0xf   :  { %v212_v40 = vsel %vm92_vm0, %v375_v36, %v374_v35  ;;  %v223_v41 = vsel %vm92_vm0, %v378_v38, %v377_v37  ;;  %s405_s7 = smov 32   ;;  %v388_v42 = vld [vmem:[%s796_s0 + $0x41] ss:$8 sm:$0xf]   ;;  %v2_v60 = vld [vmem:[%s796_s0] ss:$4 sm:$0xff]  }
  0x10   :  { %v389_v43 = vld [vmem:[%s796_s0 + $0x41] ss:$8 sm:$0xf0]   ;;  %v382_v44 = vld [vmem:[%s796_s0 + $0x5] ss:$8 sm:$0xf]  }
  0x11   :  { %v383_v45 = vld [vmem:[%s796_s0 + $0x5] ss:$8 sm:$0xf0]   ;;  %v266_v48 = vsel %vm92_vm0, %v389_v43, %v388_v42  ;;  %v391_v53 = vld [vmem:[%s796_s0 + $0xc1] ss:$8 sm:$0xf]  }
  0x12   :  { %v385_v46 = vld [vmem:[%s796_s0 + $0x85] ss:$8 sm:$0xf]   ;;  %v244_v49 = vsel %vm92_vm0, %v383_v45, %v382_v44  ;;  %v392_v54 = vld [vmem:[%s796_s0 + $0xc1] ss:$8 sm:$0xf0]  }
  0x13   :  { %v386_v47 = vld [vmem:[%s796_s0 + $0x85] ss:$8 sm:$0xf0]   ;;  %v277_v58 = vsel %vm92_vm0, %v392_v54, %v391_v53  ;;  %4 = vst.msk [vmem:[%s797_s1] ss:$8 sm:$0x3] %vm3_vm1, %v2_v60  }
  0x14   :  { %169 = vrot.lane.b32.xlu1 %v168_v21, %s404_s27  ;;  %180 = vrot.lane.b32.xlu2 %v179_v31, %s404_s27  ;;  %v255_v50 = vsel %vm92_vm0, %v386_v47, %v385_v46  ;;  %v397_v51 = vld [vmem:[%s796_s0 + $0xc5] ss:$8 sm:$0xf]   ;;  %305 = vst.msk [vmem:[%s797_s1 - $0xf] ss:$8 sm:$0xc] %vm3_vm1, %v2_v60  }
  0x15   :  { %v398_v52 = vld [vmem:[%s796_s0 + $0xc5] ss:$8 sm:$0xf0]   ;;  %v308_v61 = vld [vmem:[%s796_s0 + $0x20] ss:$4 sm:$0xff]   ;;  %vm226_vm4 = vcmask 523520  }
  0x16   :  { %158 = vrot.lane.b32.xlu0 %v157_v23, %s404_s27  ;;  %v394_v55 = vld [vmem:[%s796_s0 + $0x45] ss:$8 sm:$0xf]   ;;  %v299_v57 = vsel %vm92_vm0, %v398_v52, %v397_v51  ;;  %306 = vst.msk [vmem:[%s797_s1 - $0x1e] ss:$8 sm:$0x30] %vm3_vm1, %v2_v60  }
  0x17   :  { %v395_v56 = vld [vmem:[%s796_s0 + $0x45] ss:$8 sm:$0xf0]   ;;  %307 = vst.msk [vmem:[%s797_s1 - $0x2d] ss:$8 sm:$0xc0] %vm3_vm1, %v2_v60  }
  0x18   :  { %v288_v59 = vsel %vm92_vm0, %v395_v56, %v394_v55  ;;  %309 = vst.msk [vmem:[%s797_s1 + $0x4] ss:$8 sm:$0x3] %vm3_vm1, %v308_v61   ;;  %v323_v62 = vld [vmem:[%s796_s0 + $0x80] ss:$4 sm:$0xff]  }
  0x19   :  { %310 = vst.msk [vmem:[%s797_s1 - $0xb] ss:$8 sm:$0xc] %vm3_vm1, %v308_v61   ;;  %v328_v63 = vld [vmem:[%s796_s0 + $0xa0] ss:$4 sm:$0xff]  }
  0x1a   :  { %311 = vst.msk [vmem:[%s797_s1 - $0x1a] ss:$8 sm:$0x30] %vm3_vm1, %v308_v61   ;;  %v313_v0 = vld [vmem:[%s796_s0 + $0x40] ss:$4 sm:$0xff]  }
  0x1b   :  { %312 = vst.msk [vmem:[%s797_s1 - $0x29] ss:$8 sm:$0xc0] %vm3_vm1, %v308_v61   ;;  %v318_v2 = vld [vmem:[%s796_s0 + $0x60] ss:$4 sm:$0xff]  }
  0x1c   :  { %202 = vrot.lane.b32.xlu1 %v201_v30, %s404_s27  ;;  %213 = vrot.lane.b32.xlu2 %v212_v40, %s404_s27  ;;  %324 = vst.msk [vmem:[%s797_s1 + $0x20] ss:$8 sm:$0x3] %vm3_vm1, %v323_v62   ;;  %v333_v3 = vld [vmem:[%s796_s0 + $0xc0] ss:$4 sm:$0xff]  }
  0x1d   :  { %325 = vst.msk [vmem:[%s797_s1 + $0x11] ss:$8 sm:$0xc] %vm3_vm1, %v323_v62   ;;  %v338_v5 = vld [vmem:[%s796_s0 + $0xe0] ss:$4 sm:$0xff]  }
  0x1e   :  { %191 = vrot.lane.b32.xlu0 %v190_v32, %s404_s27  ;;  %326 = vst.msk [vmem:[%s797_s1 + $0x2] ss:$8 sm:$0x30] %vm3_vm1, %v323_v62  }
  0x1f   :  { %327 = vst.msk [vmem:[%s797_s1 - $0xd] ss:$8 sm:$0xc0] %vm3_vm1, %v323_v62  }
  0x20   :  { %329 = vst.msk [vmem:[%s797_s1 + $0x24] ss:$8 sm:$0x3] %vm3_vm1, %v328_v63  }
  0x21   :  { %330 = vst.msk [vmem:[%s797_s1 + $0x15] ss:$8 sm:$0xc] %vm3_vm1, %v328_v63  }
  0x22   :  { %331 = vst.msk [vmem:[%s797_s1 + $0x6] ss:$8 sm:$0x30] %vm3_vm1, %v328_v63  }
  0x23   :  { %332 = vst.msk [vmem:[%s797_s1 - $0x9] ss:$8 sm:$0xc0] %vm3_vm1, %v328_v63  }
  0x24   :  { %234 = vrot.lane.b32.xlu1 %v233_v39, %s405_s7  ;;  %245 = vrot.lane.b32.xlu2 %v244_v49, %s405_s7  ;;  %314 = vst.msk [vmem:[%s797_s1 + $0x10] ss:$8 sm:$0x3] %vm3_vm1, %v313_v0  }
  0x25   :  { %315 = vst.msk [vmem:[%s797_s1 + $0x1] ss:$8 sm:$0xc] %vm3_vm1, %v313_v0  }
  0x26   :  { %224 = vrot.lane.b32.xlu0 %v223_v41, %s405_s7  ;;  %316 = vst.msk [vmem:[%s797_s1 - $0xe] ss:$8 sm:$0x30] %vm3_vm1, %v313_v0  }
  0x27   :  { %317 = vst.msk [vmem:[%s797_s1 - $0x1d] ss:$8 sm:$0xc0] %vm3_vm1, %v313_v0  }
  0x28   :  { %319 = vst.msk [vmem:[%s797_s1 + $0x14] ss:$8 sm:$0x3] %vm3_vm1, %v318_v2  }
  0x29   :  { %320 = vst.msk [vmem:[%s797_s1 + $0x5] ss:$8 sm:$0xc] %vm3_vm1, %v318_v2  }
  0x2a   :  { %321 = vst.msk [vmem:[%s797_s1 - $0xa] ss:$8 sm:$0x30] %vm3_vm1, %v318_v2  }
  0x2b   :  { %322 = vst.msk [vmem:[%s797_s1 - $0x19] ss:$8 sm:$0xc0] %vm3_vm1, %v318_v2  }
  0x2c   :  { %267 = vrot.lane.b32.xlu1 %v266_v48, %s405_s7  ;;  %278 = vrot.lane.b32.xlu2 %v277_v58, %s405_s7  ;;  %334 = vst.msk [vmem:[%s797_s1 + $0x30] ss:$8 sm:$0x3] %vm3_vm1, %v333_v3  }
  0x2d   :  { %335 = vst.msk [vmem:[%s797_s1 + $0x21] ss:$8 sm:$0xc] %vm3_vm1, %v333_v3  }
  0x2e   :  { %256 = vrot.lane.b32.xlu0 %v255_v50, %s405_s7  ;;  %336 = vst.msk [vmem:[%s797_s1 + $0x12] ss:$8 sm:$0x30] %vm3_vm1, %v333_v3  }
  0x2f   :  { %337 = vst.msk [vmem:[%s797_s1 + $0x3] ss:$8 sm:$0xc0] %vm3_vm1, %v333_v3  }
  0x30   :  { %339 = vst.msk [vmem:[%s797_s1 + $0x34] ss:$8 sm:$0x3] %vm3_vm1, %v338_v5  }
  0x31   :  { %340 = vst.msk [vmem:[%s797_s1 + $0x25] ss:$8 sm:$0xc] %vm3_vm1, %v338_v5  }
  0x32   :  { %341 = vst.msk [vmem:[%s797_s1 + $0x16] ss:$8 sm:$0x30] %vm3_vm1, %v338_v5  }
  0x33   :  { %342 = vst.msk [vmem:[%s797_s1 + $0x7] ss:$8 sm:$0xc0] %vm3_vm1, %v338_v5  }
  0x34   :  { %300 = vrot.lane.b32.xlu1 %v299_v57, %s405_s7 }
  0x36   :  { %289 = vrot.lane.b32.xlu0 %v288_v59, %s405_s7 }
  0x5e   :  { %v138_v1 = vpop.permute.xlu2 %137  }
  0x66   :  { %v148_v4 = vpop.permute.xlu2 %147  }
  0x6e   :  { %v181_v7 = vpop.permute.xlu2 %180  }
  0x76   :  { %v116_v6 = vpop.permute.xlu1 %115   ;;  %v214_v10 = vpop.permute.xlu2 %213  }
  0x77   :  { %350 = vst.msk [vmem:[%s797_s1 + $0x10] sm:$0xff] %vm96_vm2, %v116_v6  }
  0x78   :  { %v95_v8 = vpop.permute.xlu0 %94   ;;  %367 = vst.msk [vmem:[%s797_s1 + $0x10] sm:$0xff] %vm139_vm3, %v181_v7  }
  0x79   :  { %97 = vst.msk [vmem:[%s797_s1] sm:$0xff] %vm96_vm2, %v95_v8  }
  0x7a   :  { %140 = vst.msk [vmem:[%s797_s1] sm:$0xff] %vm139_vm3, %v138_v1  }
  0x7b   :  { %376 = vst.msk [vmem:[%s797_s1 + $0x38] sm:$0xff] %vm139_vm3, %v214_v10  }
  0x7e   :  { %v127_v9 = vpop.permute.xlu1 %126   ;;  %v246_v13 = vpop.permute.xlu2 %245  }
  0x7f   :  { %353 = vst.msk [vmem:[%s797_s1 + $0x30] sm:$0xff] %vm96_vm2, %v127_v9  }
  0x80   :  { %v105_v11 = vpop.permute.xlu0 %104  }
  0x81   :  { %347 = vst.msk [vmem:[%s797_s1 + $0x20] sm:$0xff] %vm96_vm2, %v105_v11  }
  0x82   :  { %358 = vst.msk [vmem:[%s797_s1 + $0x20] sm:$0xff] %vm139_vm3, %v148_v4  }
  0x86   :  { %v170_v12 = vpop.permute.xlu1 %169   ;;  %v279_v16 = vpop.permute.xlu2 %278  }
  0x87   :  { %364 = vst.msk [vmem:[%s797_s1 + $0x28] sm:$0xff] %vm139_vm3, %v170_v12  }
  0x88   :  { %v159_v14 = vpop.permute.xlu0 %158  }
  0x89   :  { %361 = vst.msk [vmem:[%s797_s1 + $0x8] sm:$0xff] %vm139_vm3, %v159_v14  }
  0x8a   :  { %384 = vst.msk [vmem:[%s797_s1 + $0x8] sm:$0xff] %vm226_vm4, %v246_v13  }
  0x8e   :  { %v203_v15 = vpop.permute.xlu1 %202  }
  0x8f   :  { %373 = vst.msk [vmem:[%s797_s1 + $0x18] sm:$0xff] %vm139_vm3, %v203_v15  }
  0x90   :  { %v192_v17 = vpop.permute.xlu0 %191  }
  0x91   :  { %370 = vst.msk [vmem:[%s797_s1 + $0x30] sm:$0xff] %vm139_vm3, %v192_v17  }
  0x92   :  { %393 = vst.msk [vmem:[%s797_s1 + $0x30] sm:$0xff] %vm226_vm4, %v279_v16  }
  0x96   :  { %v235_v18 = vpop.permute.xlu1 %234  }
  0x97   :  { %381 = vst.msk [vmem:[%s797_s1 + $0x20] sm:$0xff] %vm226_vm4, %v235_v18  }
  0x98   :  { %v225_v19 = vpop.permute.xlu0 %224  }
  0x99   :  { %227 = vst.msk [vmem:[%s797_s1] sm:$0xff] %vm226_vm4, %v225_v19  }
  0x9e   :  { %v268_v20 = vpop.permute.xlu1 %267  }
  0x9f   :  { %390 = vst.msk [vmem:[%s797_s1 + $0x10] sm:$0xff] %vm226_vm4, %v268_v20  }
  0xa0   :  { %v257_v21 = vpop.permute.xlu0 %256  }
  0xa1   :  { %387 = vst.msk [vmem:[%s797_s1 + $0x28] sm:$0xff] %vm226_vm4, %v257_v21  }
  0xa6   :  { %v301_v22 = vpop.permute.xlu1 %300  }
  0xa7   :  { %399 = vst.msk [vmem:[%s797_s1 + $0x38] sm:$0xff] %vm226_vm4, %v301_v22  }
  0xa8   :  { %v290_v23 = vpop.permute.xlu0 %289  }
  0xa9   :  { %396 = vst.msk [vmem:[%s797_s1 + $0x18] sm:$0xff] %vm226_vm4, %v290_v23  }

// kernel: _interaction_forward.1
= control target key start
LH: loop header
LB: loop body
LE: loop exit
PB: predicated region body
PF: predicated region fallthrough
CT: control target
= control target key end

     0   :  { %vm28_vm0 = vcmask 261120   ;;  %s7271_s0 = inlined_call_operand.vmem [shape: f32[2,32], index: 0, kind: input, shape index: {}]   ;;  %s7272_s1 = inlined_call_operand.vmem [shape: f32[2,224], index: 1, kind: input, shape index: {}]   ;;  %s7273_s2 = inlined_call_operand.vmem [shape: f32[32,224], index: 2, kind: input, shape index: {}]   ;;  %s7274_s3 = inlined_call_operand.vmem [shape: f32[224,7], index: 3, kind: input, shape index: {}]   ;;  %s7275_s4 = inlined_call_operand.hbm [shape: f32[2,28], index: 4, kind: output, shape index: {}]  }
   0x1   :  { %v26_v0 = vld [vmem:[%s7273_s2 + $0x30] sm:$0xff]  ;;  %v24_v1 = vld [vmem:[%s7273_s2 + $0x20] sm:$0xff]  ;;  %v27_v10 = vld [vmem:[%s7273_s2 + $0x38] sm:$0xff] }
   0x2   :  { %v22_v2 = vld [vmem:[%s7273_s2 + $0x10] sm:$0xff]  ;;  %v5068_v3 = vand.u32 4294901760, %v26_v0  ;;  %v5070_v4 = vand.u32 4294901760, %v24_v1  ;;  %v20_v6 = vld [vmem:[%s7273_s2] sm:$0xff]  ;;  %v25_v11 = vld [vmem:[%s7273_s2 + $0x28] sm:$0xff] }
   0x3   :  { %v5072_v5 = vand.u32 4294901760, %v22_v2  ;;  %v18_v7 = vld [vmem:[%s7271_s0] sm:$0x3]  ;;  %v5080_v8 = vand.u32 4294901760, %v20_v6  ;;  %v23_v12 = vld [vmem:[%s7273_s2 + $0x18] sm:$0xff] }
   0x4   :  { %v30_v9 = vsel %vm28_vm0, %v18_v7, 0  ;;  %45 = vmatpush.msra.mxu0 %v5068_v3  ;;  %v5094_v13 = vsub.f32 %v26_v0, %v5068_v3  ;;  %145 = vmatpush.msra.mxu3 %v5068_v3  ;;  %v5098_v14 = vsub.f32 %v24_v1, %v5070_v4 }
   0x5   :  { %v5101_v15 = vsub.f32 %v22_v2, %v5072_v5  ;;  %v5103_v16 = vand.u32 4294901760, %v30_v9 }
   0x6   :  { %9 = vsyncpa [#allocation3], 0  ;;  %v5106_v17 = vsub.f32 %v20_v6, %v5080_v8  ;;  %v5108_v18 = vand.u32 4294901760, %v27_v10  ;;  %v5110_v19 = vand.u32 4294901760, %v25_v11  ;;  %v5112_v20 = vand.u32 4294901760, %v23_v12  ;;  %116 = vmatpush.msra.mxu2 %v5094_v13  ;;  %47 = vmatpush.msra.mxu0 %v5070_v4  ;;  %v21_v36 = vld [vmem:[%s7273_s2 + $0x8] sm:$0xff] }
   0x7   :  { %v5117_v21 = vand.u32 4294901760, %v5094_v13  ;;  %v5120_v22 = vand.u32 4294901760, %v5098_v14  ;;  %v5123_v23 = vsub.f32 %v30_v9, %v5103_v16  ;;  %v5126_v24 = vand.u32 4294901760, %v5101_v15  ;;  %147 = vmatpush.msra.mxu3 %v5070_v4  ;;  %v425_v51 = vld [vmem:[%s7274_s3 + $0x78] sm:$0xff]  ;;  %v424_v54 = vld [vmem:[%s7274_s3 + $0x70] sm:$0xff]  ;;  %v423_v57 = vld [vmem:[%s7274_s3 + $0x68] sm:$0xff] }
   0x8   :  { %7404 = vst [vmem:[#allocation5_spill] sm:$0xff] %v5106_v17  ;;  %v5130_v25 = vsub.f32 %v27_v10, %v5108_v18  ;;  %v5133_v26 = vand.u32 4294901760, %v5106_v17  ;;  %v5136_v27 = vsub.f32 %v25_v11, %v5110_v19  ;;  %v5139_v28 = vsub.f32 %v23_v12, %v5112_v20  ;;  %119 = vmatpush.msra.mxu2 %v5098_v14  ;;  %v422_v60 = vld [vmem:[%s7274_s3 + $0x60] sm:$0xff]  ;;  %v421_v63 = vld [vmem:[%s7274_s3 + $0x58] sm:$0xff]  ;;  %v420_v2 = vld [vmem:[%s7274_s3 + $0x50] sm:$0xff]  ;;  %s5024_s24 = smov 96  }
   0x9   :  { %7405 = vst [vmem:[#allocation6_spill] sm:$0xff] %v5112_v20  ;;  %49 = vmatpush.msra.mxu0 %v5072_v5  ;;  %v76_v29 = vsub.f32 %v5094_v13, %v5117_v21  ;;  %v82_v30 = vsub.f32 %v5098_v14, %v5120_v22  ;;  %v5148_v31 = vand.u32 4294901760, %v5123_v23  ;;  %v88_v32 = vsub.f32 %v5101_v15, %v5126_v24  ;;  %v419_v10 = vld [vmem:[%s7274_s3 + $0x48] sm:$0xff]  ;;  %s5025_s16 = smov 64   ;;  %s5026_s19 = smov 32  }
   0xa   :  { %7406 = vst [vmem:[#allocation7_spill] sm:$0xff] %v5120_v22  ;;  %149 = vmatpush.msra.mxu3 %v5072_v5  ;;  %v260_v33 = vand.u32 4294901760, %v5130_v25  ;;  %v266_v34 = vand.u32 4294901760, %v5136_v27  ;;  %v5156_v35 = vand.u32 4294901760, %v5139_v28  ;;  %122 = vmatpush.msra.mxu2 %v5101_v15  ;;  %v94_v40 = vsub.f32 %v5106_v17, %v5133_v26  ;;  %s5027_s6 = smov 7   ;;  %s5032_s8 = smov 27  }
   0xb   :  { %7407 = vst [vmem:[#allocation8_spill] sm:$0xff] %v5126_v24  ;;  %v5161_v37 = vand.u32 4294901760, %v76_v29  ;;  %51 = vmatpush.msra.mxu0 %v5080_v8  ;;  %v5165_v38 = vand.u32 4294901760, %v82_v30  ;;  %v55_v39 = vsub.f32 %v5123_v23, %v5148_v31  ;;  %v5181_v44 = vand.u32 4294901760, %v88_v32  ;;  %v418_v30 = vld [vmem:[%s7274_s3 + $0x40] sm:$0xff]  ;;  %s5033_s9 = smov [#allocation2]  }
   0xc   :  { %7408 = vst [vmem:[#allocation9_spill] sm:$0xff] %v5133_v26  ;;  %151 = vmatpush.msra.mxu3 %v5080_v8  ;;  %v261_v41 = vsub.f32 %v5130_v25, %v260_v33  ;;  %v267_v42 = vsub.f32 %v5136_v27, %v266_v34  ;;  %125 = vmatpush.msra.mxu2 %v5106_v17  ;;  %v5185_v46 = vand.u32 4294901760, %v21_v36  ;;  %v5190_v49 = vand.u32 4294901760, %v94_v40  ;;  %s4977_s10 = sshll.u32 %s5033_s9, 4  ;;  %s4979_s13 = sshll.u32 %s7275_s4, 4  ;;  %s4978_s10 = int_to_ptr.vmem [resolvable:$true] %s4977_s10  ;;  %s4980_s13 = int_to_ptr.hbm [resolvable:$true] %s4979_s13 }
   0xd   :  { %7409 = vst [vmem:[#allocation10_spill] sm:$0xff] %v5139_v28  ;;  %174 = vmatpush.msrb.mxu0 %v5117_v21  ;;  %78 = vmatpush.msra.mxu1 %v5161_v37  ;;  %v56_v43 = vand.u32 4294901760, %v55_v39  ;;  %v273_v45 = vsub.f32 %v5139_v28, %v5156_v35  ;;  %v5210_v55 = vand.u32 4294901760, %v425_v51  ;;  %v5221_v58 = vand.u32 4294901760, %v424_v54 }
   0xe   :  { %7410 = vst [vmem:[#allocation11_spill] sm:$0xff] %v5156_v35  ;;  %128 = vmatmul.f32.vlgmr.msra.gmra.mxu2 %v5123_v23  ;;  %155 = vmatmul.f32.vlgmr.msra.gmra.mxu3 %v5148_v31  ;;  %v262_v47 = vand.u32 4294901760, %v261_v41  ;;  %v268_v48 = vand.u32 4294901760, %v267_v42  ;;  %v5193_v50 = vsub.f32 %v21_v36, %v5185_v46  ;;  %v5235_v62 = vand.u32 4294901760, %v423_v57  ;;  %v416_v41 = vld [vmem:[%s7274_s3 + $0x30] sm:$0xff] }
   0xf   :  { %7411 = vst [vmem:[#allocation12_spill] sm:$0xff] %v5185_v46  ;;  %84 = vmatpush.msra.mxu1 %v5165_v38  ;;  %57 = vmatmul.f32.vlgmr.msra.gmra.mxu0 %v56_v43  ;;  %v5201_v52 = vand.u32 4294901760, %v273_v45  ;;  %v5233_v61 = vsub.f32 %v425_v51, %v5210_v55  ;;  %v5244_v0 = vsub.f32 %v424_v54, %v5221_v58  ;;  %v5246_v1 = vand.u32 4294901760, %v422_v60 }
  0x10   :  { %7412 = vst [vmem:[#allocation13_spill] sm:$0xff] %v5193_v50  ;;  %230 = vmatpush.msrb.mxu2 %v5108_v18  ;;  %263 = vmatpush.msrb.mxu3 %v262_v47  ;;  %v5204_v53 = vand.u32 4294901760, %v5193_v50  ;;  %v5258_v7 = vsub.f32 %v423_v57, %v5235_v62  ;;  %v5260_v9 = vand.u32 4294901760, %v421_v63  ;;  %v5278_v29 = vand.u32 4294901760, %v419_v10 }
  0x11   :  { %90 = vmatpush.msra.mxu1 %v5181_v44  ;;  %178 = vmatpush.msrb.mxu0 %v5120_v22  ;;  %7413 = vst [vmem:[#allocation14_spill] sm:$0xff] %v5201_v52  ;;  %v7282_v6 = vand.u32 4294901760, %v5233_v61  ;;  %v7281_v11 = vand.u32 4294901760, %v5244_v0  ;;  %v5272_v12 = vsub.f32 %v422_v60, %v5246_v1  ;;  %v5306_v40 = vand.u32 4294901760, %v418_v30 }
  0x12   :  { %7414 = vst [vmem:[#allocation15_spill] sm:$0xff] %v5204_v53  ;;  %232 = vmatpush.msrb.mxu2 %v5110_v19  ;;  %269 = vmatpush.msrb.mxu3 %v268_v48  ;;  %v279_v56 = vsub.f32 %v5193_v50, %v5204_v53  ;;  %v7280_v32 = vand.u32 4294901760, %v5258_v7  ;;  %v5326_v48 = vand.u32 4294901760, %v416_v41  ;;  %vm438_vm1 = vcmask 785408  }
  0x13   :  { %96 = vmatpush.msra.mxu1 %v5190_v49  ;;  %182 = vmatpush.msrb.mxu0 %v5126_v24  ;;  %v7278_v36 = vand.u32 4294901760, %v5272_v12  ;;  %v5338_v57 = vsub.f32 %v418_v30, %v5306_v40  ;;  %vm1492_vm2 = vcmask 523264   ;;  %vm4958_vm3 = vcmask 56320  }
  0x14   :  { %98 = vmatmul.f32.vlgmr.msra.gmra.mxu1 %v5103_v16  ;;  %234 = vmatpush.msrb.mxu2 %v5112_v20  ;;  %v5225_v59 = vand.u32 4294901760, %v279_v56  ;;  %v5358_v30 = vsub.f32 %v416_v41, %v5326_v48  ;;  %vm4960_vm4 = vcmask 105472   ;;  %vm4962_vm5 = vcmask 146432  }
  0x15   :  { %205 = vmatpush.msrb.mxu1 %v5068_v3  ;;  %275 = vmatpush.msrb.mxu3 %v5201_v52  ;;  %v504_v54 = vsub.f32 %v5272_v12, %v7278_v36  ;;  %vm4964_vm6 = vcmask 179200   ;;  %vm4966_vm7 = vcmask 203776   ;;  %vm4968_vm8 = vcmask 220160  }
  0x16   :  { %7415 = vst [vmem:[#allocation16_spill] sm:$0xff] %v5225_v59  ;;  %236 = vmatpush.msrb.mxu2 %v5185_v46  ;;  %186 = vmatpush.msrb.mxu0 %v5133_v26  ;;  %vm4970_vm9 = vcmask 222208  }
  0x17   :  { %207 = vmatpush.msrb.mxu1 %v5070_v4  ;;  %281 = vmatpush.msrb.mxu3 %v5225_v59 }
  0x18   :  { %188 = vmatmul.f32.vlgmr.msrb.gmra.mxu0 %v5103_v16  ;;  %242 = vmatmul.f32.vlgmr.msrb.gmra.mxu2 %v56_v43  ;;  %v498_v43 = vsub.f32 %v5258_v7, %v7280_v32 }
  0x19   :  { %209 = vmatpush.msrb.mxu1 %v5072_v5  ;;  %283 = vmatmul.f32.vlgmr.msrb.gmra.mxu3 %v5103_v16 }
  0x1a   :  { %359 = vmatpush.msra.mxu2 %v260_v33  ;;  %301 = vmatpush.msra.mxu0 %v5130_v25  ;;  %v5274_v25 = vand.u32 4294901760, %v420_v2  ;;  %v5290_v33 = vsub.f32 %v421_v63, %v5260_v9  ;;  %v499_v63 = vand.u32 4294901760, %v498_v43 }
  0x1b   :  { %211 = vmatpush.msrb.mxu1 %v5080_v8  ;;  %390 = vmatpush.msra.mxu3 %v5108_v18 }
  0x1c   :  { %363 = vmatpush.msra.mxu2 %v266_v34  ;;  %304 = vmatpush.msra.mxu0 %v5136_v27  ;;  %v486_v27 = vsub.f32 %v5233_v61, %v7282_v6  ;;  %v417_v34 = vld [vmem:[%s7274_s3 + $0x38] sm:$0xff]  ;;  %v5304_v39 = vsub.f32 %v420_v2, %v5274_v25  ;;  %v7277_v45 = vand.u32 4294901760, %v5290_v33 }
  0x1d   :  { %213 = vmatmul.f32.vlgmr.msrb.gmra.mxu1 %v5103_v16  ;;  %392 = vmatpush.msra.mxu3 %v5110_v19  ;;  %v5322_v47 = vand.u32 4294901760, %v417_v34 }
  0x1e   :  { %330 = vmatpush.msra.mxu1 %v5108_v18  ;;  %367 = vmatpush.msra.mxu2 %v5156_v35  ;;  %v492_v18 = vsub.f32 %v5244_v0, %v7281_v11  ;;  %v487_v42 = vand.u32 4294901760, %v486_v27  ;;  %v7276_v56 = vand.u32 4294901760, %v5304_v39  ;;  %v510_v2 = vsub.f32 %v5290_v33, %v7277_v45  ;;  %v413_v27 = vld [vmem:[%s7274_s3 + $0x18] sm:$0xff] }
  0x1f   :  { %307 = vmatpush.msra.mxu0 %v5139_v28  ;;  %394 = vmatpush.msra.mxu3 %v5112_v20  ;;  %v5383_v36 = vand.u32 4294901760, %v413_v27 }
  0x20   :  { %332 = vmatpush.msra.mxu1 %v5110_v19  ;;  %371 = vmatpush.msra.mxu2 %v5204_v53  ;;  %v5314_v19 = vsub.f32 %v419_v10, %v5278_v29  ;;  %v493_v51 = vand.u32 4294901760, %v492_v18  ;;  %v5351_v10 = vsub.f32 %v417_v34, %v5322_v47  ;;  %v505_v18 = vand.u32 4294901760, %v504_v54 }
  0x21   :  { %310 = vmatpush.msra.mxu0 %v5193_v50  ;;  %373 = vmatmul.f32.vlgmr.msra.gmra.mxu2 %v5103_v16  ;;  %v516_v34 = vsub.f32 %v5304_v39, %v7276_v56  ;;  %v511_v54 = vand.u32 4294901760, %v510_v2 }
  0x22   :  { %313 = vmatmul.f32.vlgmr.msra.gmra.mxu0 %v5123_v23  ;;  %334 = vmatpush.msra.mxu1 %v5112_v20  ;;  %v415_v23 = vld [vmem:[%s7274_s3 + $0x28] sm:$0xff]  ;;  %v7279_v60 = vand.u32 4294901760, %v5314_v19  ;;  %v7285_v56 = vand.u32 4294901760, %v5351_v10 }
  0x23   :  { %396 = vmatpush.msra.mxu3 %v5185_v46  ;;  %443 = vmatpush.msrb.mxu0 %v5210_v55  ;;  %v517_v2 = vand.u32 4294901760, %v516_v34 }
  0x24   :  { %336 = vmatpush.msra.mxu1 %v5185_v46  ;;  %398 = vmatmul.f32.vlgmr.msra.gmra.mxu3 %v5103_v16  ;;  %v414_v16 = vld [vmem:[%s7274_s3 + $0x20] sm:$0xff]  ;;  %v522_v41 = vsub.f32 %v5314_v19, %v7279_v60  ;;  %v7286_v60 = vand.u32 4294901760, %v5358_v30  ;;  %v534_v34 = vsub.f32 %v5351_v10, %v7285_v56 }
  0x25   :  { %340 = vmatmul.f32.vlgmr.msra.gmra.mxu1 %v5148_v31  ;;  %445 = vmatpush.msrb.mxu0 %v5221_v58  ;;  %v5353_v31 = vand.u32 4294901760, %v415_v23  ;;  %v5368_v43 = vand.u32 4294901760, %v414_v16 }
  0x26   :  { %488 = vmatpush.msrb.mxu1 %v487_v42  ;;  %639 = vmatpush.msrb.mxu3 %v5210_v55  ;;  %v7283_v42 = vand.u32 4294901760, %v5338_v57  ;;  %v523_v6 = vand.u32 4294901760, %v522_v41  ;;  %v540_v53 = vsub.f32 %v5358_v30, %v7286_v60  ;;  %v535_v60 = vand.u32 4294901760, %v534_v34 }
  0x27   :  { %447 = vmatpush.msrb.mxu0 %v5235_v62  ;;  %586 = vmatpush.msrb.mxu2 %v5233_v61  ;;  %v5381_v45 = vsub.f32 %v415_v23, %v5353_v31  ;;  %v5396_v23 = vsub.f32 %v414_v16, %v5368_v43  ;;  %v5411_v16 = vsub.f32 %v413_v27, %v5383_v36 }
  0x28   :  { %494 = vmatpush.msrb.mxu1 %v493_v51  ;;  %641 = vmatpush.msrb.mxu3 %v5221_v58  ;;  %v412_v51 = vld [vmem:[%s7274_s3 + $0x10] sm:$0xff]  ;;  %v528_v32 = vsub.f32 %v5338_v57, %v7283_v42 }
  0x29   :  { %449 = vmatpush.msrb.mxu0 %v5246_v1  ;;  %589 = vmatpush.msrb.mxu2 %v5244_v0  ;;  %v5398_v11 = vand.u32 4294901760, %v412_v51  ;;  %v7416_v35 = vand.u32 4294901760, %v5381_v45 }
  0x2a   :  { %500 = vmatpush.msrb.mxu1 %v499_v63  ;;  %643 = vmatpush.msrb.mxu3 %v5235_v62  ;;  %v411_v63 = vld [vmem:[%s7274_s3 + $0x8] sm:$0xff] }
  0x2b   :  { %451 = vmatpush.msrb.mxu0 %v5260_v9  ;;  %592 = vmatpush.msrb.mxu2 %v5258_v7  ;;  %v5413_v41 = vand.u32 4294901760, %v411_v63  ;;  %v5423_v42 = vsub.f32 %v412_v51, %v5398_v11  ;;  %v541_v51 = vand.u32 4294901760, %v540_v53 }
  0x2c   :  { %506 = vmatpush.msrb.mxu1 %v505_v18  ;;  %645 = vmatpush.msrb.mxu3 %v5246_v1  ;;  %v410_v18 = vld [vmem:[%s7274_s3] sm:$0xff] }
  0x2d   :  { %453 = vmatpush.msrb.mxu0 %v5274_v25  ;;  %595 = vmatpush.msrb.mxu2 %v5272_v12  ;;  %v5425_v27 = vand.u32 4294901760, %v410_v18  ;;  %v5435_v56 = vsub.f32 %v411_v63, %v5413_v41  ;;  %v563_v59 = vand.u32 4294901760, %v5423_v42 }
  0x2e   :  { %512 = vmatpush.msrb.mxu1 %v511_v54  ;;  %647 = vmatpush.msrb.mxu3 %v5260_v9  ;;  %v529_v54 = vand.u32 4294901760, %v528_v32  ;;  %v7289_v32 = vand.u32 4294901760, %v5411_v16 }
  0x2f   :  { %455 = vmatpush.msrb.mxu0 %v5278_v29  ;;  %598 = vmatpush.msrb.mxu2 %v5290_v33 }
  0x30   :  { %518 = vmatpush.msrb.mxu1 %v517_v2  ;;  %649 = vmatpush.msrb.mxu3 %v5274_v25  ;;  %v546_v2 = vsub.f32 %v5381_v45, %v7416_v35  ;;  %v5445_v35 = vsub.f32 %v410_v18, %v5425_v27  ;;  %v558_v53 = vsub.f32 %v5411_v16, %v7289_v32 }
  0x31   :  { %457 = vmatpush.msrb.mxu0 %v5306_v40  ;;  %601 = vmatpush.msrb.mxu2 %v5304_v39 }
  0x32   :  { %524 = vmatpush.msrb.mxu1 %v523_v6  ;;  %651 = vmatpush.msrb.mxu3 %v5278_v29  ;;  %v7417_v6 = vand.u32 4294901760, %v5396_v23  ;;  %v547_v63 = vand.u32 4294901760, %v546_v2  ;;  %v559_v2 = vand.u32 4294901760, %v558_v53 }
  0x33   :  { %459 = vmatpush.msrb.mxu0 %v5322_v47  ;;  %604 = vmatpush.msrb.mxu2 %v5314_v19 }
  0x34   :  { %530 = vmatpush.msrb.mxu1 %v529_v54  ;;  %v552_v34 = vsub.f32 %v5396_v23, %v7417_v6  ;;  %653 = vmatpush.msrb.mxu3 %v5306_v40  ;;  %v569_v54 = vand.u32 4294901760, %v5435_v56  ;;  %v564_v6 = vsub.f32 %v5423_v42, %v563_v59 }
  0x35   :  { %461 = vmatpush.msrb.mxu0 %v5326_v48  ;;  %607 = vmatpush.msrb.mxu2 %v5338_v57 }
  0x36   :  { %536 = vmatpush.msrb.mxu1 %v535_v60  ;;  %655 = vmatpush.msrb.mxu3 %v5322_v47  ;;  %v553_v18 = vand.u32 4294901760, %v552_v34  ;;  %v575_v60 = vand.u32 4294901760, %v5445_v35  ;;  %v570_v32 = vsub.f32 %v5435_v56, %v569_v54 }
  0x37   :  { %463 = vmatpush.msrb.mxu0 %v5353_v31  ;;  %610 = vmatpush.msrb.mxu2 %v5351_v10 }
  0x38   :  { %542 = vmatpush.msrb.mxu1 %v541_v51  ;;  %657 = vmatpush.msrb.mxu3 %v5326_v48  ;;  %v565_v51 = vand.u32 4294901760, %v564_v6  ;;  %v576_v34 = vsub.f32 %v5445_v35, %v575_v60  ;;  %v7420_v6 = vand.u32 4294901760, %v5258_v7  ;;  %v7428_v7 = vand.u32 4294901760, %v5381_v45 }
  0x39   :  { %465 = vmatpush.msrb.mxu0 %v5368_v43  ;;  %613 = vmatpush.msrb.mxu2 %v5358_v30 }
  0x3a   :  { %548 = vmatpush.msrb.mxu1 %v547_v63  ;;  %659 = vmatpush.msrb.mxu3 %v5353_v31  ;;  %v571_v63 = vand.u32 4294901760, %v570_v32  ;;  %v577_v53 = vand.u32 4294901760, %v576_v34  ;;  %v7419_v32 = vand.u32 4294901760, %v5244_v0  ;;  %v7424_v0 = vand.u32 4294901760, %v5314_v19 }
  0x3b   :  { %467 = vmatpush.msrb.mxu0 %v5383_v36  ;;  %616 = vmatpush.msrb.mxu2 %v5381_v45  ;;  %v434_v45 = vld [vmem:[%s7274_s3 + $0xc0] sm:$0xff] }
  0x3c   :  { %554 = vmatpush.msrb.mxu1 %v553_v18  ;;  %661 = vmatpush.msrb.mxu3 %v5368_v43  ;;  %v7418_v18 = vand.u32 4294901760, %v5233_v61  ;;  %v7421_v61 = vand.u32 4294901760, %v5272_v12  ;;  %v7430_v12 = vand.u32 4294901760, %v5411_v16 }
  0x3d   :  { %469 = vmatpush.msrb.mxu0 %v5398_v11  ;;  %619 = vmatpush.msrb.mxu2 %v5396_v23 }
  0x3e   :  { %560 = vmatpush.msrb.mxu1 %v559_v2  ;;  %663 = vmatpush.msrb.mxu3 %v5383_v36  ;;  %v7422_v2 = vand.u32 4294901760, %v5290_v33 }
  0x3f   :  { %471 = vmatpush.msrb.mxu0 %v5413_v41  ;;  %622 = vmatpush.msrb.mxu2 %v5411_v16  ;;  %v432_v16 = vld [vmem:[%s7274_s3 + $0xb0] sm:$0xff] }
  0x40   :  { %566 = vmatpush.msrb.mxu1 %v565_v51  ;;  %665 = vmatpush.msrb.mxu3 %v5398_v11  ;;  %v431_v51 = vld [vmem:[%s7274_s3 + $0xa8] sm:$0xff] }
  0x41   :  { %473 = vmatpush.msrb.mxu0 %v5425_v27  ;;  %625 = vmatpush.msrb.mxu2 %v5423_v42 }
  0x42   :  { %572 = vmatpush.msrb.mxu1 %v571_v63  ;;  %667 = vmatpush.msrb.mxu3 %v5413_v41 }
  0x43   :  { %680 = vmatpush.msra.mxu0 %v7418_v18  ;;  %628 = vmatpush.msrb.mxu2 %v5435_v56  ;;  %v5601_v18 = vand.u32 4294901760, %v431_v51 }
  0x44   :  { %578 = vmatpush.msrb.mxu1 %v577_v53  ;;  %669 = vmatpush.msrb.mxu3 %v5425_v27 }
  0x45   :  { %684 = vmatpush.msra.mxu0 %v7419_v32  ;;  %631 = vmatpush.msrb.mxu2 %v5445_v35 }
  0x46   :  { %747 = vmatpush.msra.mxu1 %v5210_v55  ;;  %v7423_v55 = vand.u32 4294901760, %v5304_v39 }
  0x47   :  { %688 = vmatpush.msra.mxu0 %v7420_v6  ;;  %v430_v6 = vld [vmem:[%s7274_s3 + $0xa0] sm:$0xff] }
  0x48   :  { %749 = vmatpush.msra.mxu1 %v5221_v58  ;;  %v7425_v58 = vand.u32 4294901760, %v5338_v57  ;;  %v5564_v57 = vand.u32 4294901760, %v434_v45 }
  0x49   :  { %692 = vmatpush.msra.mxu0 %v7421_v61 }
  0x4a   :  { %751 = vmatpush.msra.mxu1 %v5235_v62  ;;  %v7426_v62 = vand.u32 4294901760, %v5351_v10  ;;  %v433_v10 = vld [vmem:[%s7274_s3 + $0xb8] sm:$0xff] }
  0x4b   :  { %696 = vmatpush.msra.mxu0 %v7422_v2 }
  0x4c   :  { %753 = vmatpush.msra.mxu1 %v5246_v1  ;;  %v7427_v1 = vand.u32 4294901760, %v5358_v30 }
  0x4d   :  { %700 = vmatpush.msra.mxu0 %v7423_v55  ;;  %v5614_v55 = vsub.f32 %v431_v51, %v5601_v18 }
  0x4e   :  { %755 = vmatpush.msra.mxu1 %v5260_v9  ;;  %v7429_v9 = vand.u32 4294901760, %v5396_v23  ;;  %v5577_v23 = vand.u32 4294901760, %v433_v10 }
  0x4f   :  { %704 = vmatpush.msra.mxu0 %v7424_v0  ;;  %v5616_v0 = vand.u32 4294901760, %v430_v6 }
  0x50   :  { %757 = vmatpush.msra.mxu1 %v5274_v25  ;;  %v437_v25 = vld [vmem:[%s7274_s3 + $0xd8] sm:$0xff] }
  0x51   :  { %708 = vmatpush.msra.mxu0 %v7425_v58 }
  0x52   :  { %759 = vmatpush.msra.mxu1 %v5278_v29  ;;  %v5532_v29 = vand.u32 4294901760, %v437_v25 }
  0x53   :  { %712 = vmatpush.msra.mxu0 %v7426_v62  ;;  %v429_v62 = vld [vmem:[%s7274_s3 + $0x98] sm:$0xff] }
  0x54   :  { %761 = vmatpush.msra.mxu1 %v5306_v40  ;;  %v5538_v33 = vsub.f32 %v437_v25, %v5532_v29  ;;  %788 = vmatpush.msra.mxu2 %v5532_v29  ;;  %v5635_v25 = vand.u32 4294901760, %v429_v62 }
  0x55   :  { %716 = vmatpush.msra.mxu0 %v7427_v1 }
  0x56   :  { %763 = vmatpush.msra.mxu1 %v5322_v47  ;;  %v7293_v39 = vand.u32 4294901760, %v5538_v33 }
  0x57   :  { %720 = vmatpush.msra.mxu0 %v7428_v7  ;;  %v19_v7 = vld [vmem:[%s7272_s1] sm:$0xf] }
  0x58   :  { %765 = vmatpush.msra.mxu1 %v5326_v48  ;;  %v827_v47 = vsub.f32 %v5538_v33, %v7293_v39  ;;  %403 = vst [vmem:[#allocation1] ss:$4 sm:$0xff] %v19_v7 }
  0x59   :  { %724 = vmatpush.msra.mxu0 %v7429_v9  ;;  %v5630_v9 = vand.u32 4294901760, %v5614_v55 }
  0x5a   :  { %767 = vmatpush.msra.mxu1 %v5353_v31  ;;  %v828_v31 = vand.u32 4294901760, %v827_v47 }
  0x5b   :  { %728 = vmatpush.msra.mxu0 %v7430_v12  ;;  %v5633_v12 = vsub.f32 %v430_v6, %v5616_v0  ;;  %v863_v47 = vsub.f32 %v5614_v55, %v5630_v9  ;;  %v426_v6 = vld [vmem:[%s7274_s3 + $0x80] sm:$0xff] }
  0x5c   :  { %769 = vmatpush.msra.mxu1 %v5368_v43  ;;  %v5574_v43 = vsub.f32 %v434_v45, %v5564_v57  ;;  %829 = vmatpush.msra.mxu3 %v828_v31  ;;  %v5651_v31 = vsub.f32 %v429_v62, %v5635_v25 }
  0x5d   :  { %732 = vmatpush.msra.mxu0 %v563_v59  ;;  %v436_v59 = vld [vmem:[%s7274_s3 + $0xd0] sm:$0xff] }
  0x5e   :  { %771 = vmatpush.msra.mxu1 %v5383_v36  ;;  %v435_v36 = vld [vmem:[%s7274_s3 + $0xc8] sm:$0xff]  ;;  %v7290_v35 = vand.u32 4294901760, %v5574_v43  ;;  %v5665_v51 = vand.u32 4294901760, %v5651_v31 }
  0x5f   :  { %736 = vmatpush.msra.mxu0 %v569_v54  ;;  %v5551_v19 = vand.u32 4294901760, %v435_v36  ;;  %v5586_v54 = vand.u32 4294901760, %v432_v16  ;;  %v404_v28 = vld.sshfl [vmem:[#allocation1] sm:$0xff pattern:$0x73625140] }
  0x60   :  { %773 = vmatpush.msra.mxu1 %v5398_v11  ;;  %v5541_v11 = vand.u32 4294901760, %v436_v59  ;;  %v845_v63 = vsub.f32 %v5574_v43, %v7290_v35 }
  0x61   :  { %740 = vmatpush.msra.mxu0 %v575_v60  ;;  %v5561_v56 = vsub.f32 %v435_v36, %v5551_v19  ;;  %v5589_v60 = vsub.f32 %v433_v10, %v5577_v23  ;;  %v5599_v53 = vsub.f32 %v432_v16, %v5586_v54  ;;  %v428_v36 = vld [vmem:[%s7274_s3 + $0x90] sm:$0xff]  ;;  %v5648_v10 = vand.u32 4294901760, %v5633_v12  ;;  %v427_v16 = vld [vmem:[%s7274_s3 + $0x88] sm:$0xff] }
  0x62   :  { %775 = vmatpush.msra.mxu1 %v5413_v41  ;;  %v5548_v40 = vsub.f32 %v436_v59, %v5541_v11  ;;  %790 = vmatpush.msra.mxu2 %v5541_v11  ;;  %v846_v61 = vand.u32 4294901760, %v845_v63 }
  0x63   :  { %v7291_v42 = vand.u32 4294901760, %v5561_v56  ;;  %v5604_v32 = vand.u32 4294901760, %v5589_v60  ;;  %v5611_v2 = vand.u32 4294901760, %v5599_v53 }
  0x64   :  { %777 = vmatpush.msra.mxu1 %v5425_v27  ;;  %v7292_v48 = vand.u32 4294901760, %v5548_v40  ;;  %792 = vmatpush.msra.mxu2 %v5551_v19 }
  0x65   :  { %v839_v27 = vsub.f32 %v5561_v56, %v7291_v42  ;;  %v851_v58 = vsub.f32 %v5589_v60, %v5604_v32  ;;  %v857_v1 = vsub.f32 %v5599_v53, %v5611_v2 }
  0x66   :  { %v833_v30 = vsub.f32 %v5548_v40, %v7292_v48  ;;  %794 = vmatpush.msra.mxu2 %v5564_v57 }
  0x67   :  { %v840_v34 = vand.u32 4294901760, %v839_v27  ;;  %v5637_v59 = vand.u32 4294901760, %v851_v58  ;;  %v5643_v45 = vand.u32 4294901760, %v857_v1  ;;  %v869_v27 = vsub.f32 %v5633_v12, %v5648_v10 }
  0x68   :  { %v834_v41 = vand.u32 4294901760, %v833_v30  ;;  %796 = vmatpush.msra.mxu2 %v5577_v23  ;;  %v5655_v30 = vand.u32 4294901760, %v428_v36  ;;  %v875_v58 = vsub.f32 %v5651_v31, %v5665_v51  ;;  %v5684_v1 = vand.u32 4294901760, %v426_v6 }
  0x69   :  { %7431 = vst [vmem:[#allocation17_spill] sm:$0xff] %v5637_v59 }
  0x6a   :  { %835 = vmatpush.msra.mxu3 %v834_v41  ;;  %798 = vmatpush.msra.mxu2 %v5586_v54  ;;  %7432 = vst [vmem:[#allocation18_spill] sm:$0xff] %v5643_v45  ;;  %v5660_v41 = vand.u32 4294901760, %v863_v47  ;;  %v5671_v63 = vsub.f32 %v428_v36, %v5655_v30  ;;  %v5691_v36 = vand.u32 4294901760, %v875_v58 }
  0x6c   :  { %841 = vmatpush.msra.mxu3 %v840_v34  ;;  %800 = vmatpush.msra.mxu2 %v5601_v18  ;;  %7433 = vst [vmem:[#allocation19_spill] sm:$0xff] %v5660_v41  ;;  %v5667_v34 = vand.u32 4294901760, %v427_v16  ;;  %v5688_v7 = vand.u32 4294901760, %v5671_v63 }
  0x6d   :  { %7435 = vst [vmem:[#allocation21_spill] sm:$0xff] %v5691_v36 }
  0x6e   :  { %847 = vmatpush.msra.mxu3 %v846_v61  ;;  %802 = vmatpush.msra.mxu2 %v5616_v0  ;;  %v5677_v61 = vand.u32 4294901760, %v869_v27  ;;  %v5682_v62 = vsub.f32 %v427_v16, %v5667_v34  ;;  %v5697_v27 = vsub.f32 %v426_v6, %v5684_v1  ;;  %v881_v16 = vsub.f32 %v5671_v63, %v5688_v7 }
  0x70   :  { %853 = vmatpush.msra.mxu3 %v5637_v59  ;;  %804 = vmatpush.msra.mxu2 %v5635_v25  ;;  %7434 = vst [vmem:[#allocation20_spill] sm:$0xff] %v5677_v61  ;;  %v5694_v47 = vand.u32 4294901760, %v5682_v62  ;;  %v5706_v42 = vand.u32 4294901760, %v5697_v27  ;;  %v5709_v58 = vand.u32 4294901760, %v881_v16 }
  0x71   :  { %7436 = vst [vmem:[#allocation22_spill] sm:$0xff] %v5697_v27 }
  0x72   :  { %859 = vmatpush.msra.mxu3 %v5643_v45  ;;  %806 = vmatpush.msra.mxu2 %v5655_v30  ;;  %v887_v35 = vsub.f32 %v5682_v62, %v5694_v47  ;;  %7437 = vst [vmem:[#allocation23_spill] sm:$0xff] %v5709_v58  ;;  %v893_v6 = vsub.f32 %v5697_v27, %v5706_v42 }
  0x74   :  { %865 = vmatpush.msra.mxu3 %v5660_v41  ;;  %808 = vmatpush.msra.mxu2 %v5667_v34  ;;  %v5711_v48 = vand.u32 4294901760, %v887_v35  ;;  %v5716_v39 = vand.u32 4294901760, %v893_v6 }
  0x76   :  { %871 = vmatpush.msra.mxu3 %v5677_v61  ;;  %810 = vmatpush.msra.mxu2 %v5684_v1  ;;  %7438 = vst [vmem:[#allocation24_spill] sm:$0xff] %v5711_v48 }
  0x77   :  { %7439 = vst [vmem:[#allocation25_spill] sm:$0xff] %v5716_v39 }
  0x78   :  { %877 = vmatpush.msra.mxu3 %v5691_v36 }
  0x7a   :  { %883 = vmatpush.msra.mxu3 %v5709_v58 }
  0x7c   :  { %889 = vmatpush.msra.mxu3 %v5711_v48 }
  0x7e   :  { %895 = vmatpush.msra.mxu3 %v5716_v39 }
  0x8c   :  { %v58_v61 = vpop.f32.mrf.mxu0 }
  0x91   :  { %v99_v41 = vpop.f32.mrf.mxu1  ;;  %v129_v45 = vpop.f32.mrf.mxu2 }
  0x92   :  { %v100_v59 = vadd.f32 %v99_v41, %v58_v61  ;;  %v156_v36 = vpop.f32.mrf.mxu3 }
  0x94   :  { %v130_v16 = vadd.f32 %v129_v45, %v100_v59 }
  0x95   :  { %v189_v50 = vpop.f32.mrf.mxu0 }
  0x96   :  { %v157_v35 = vadd.f32 %v156_v36, %v130_v16 }
  0x98   :  { %v190_v46 = vadd.f32 %v189_v50, %v157_v35  ;;  %v1081_v35 = vld [vmem:[%s7273_s2 + $0x38] sm:$0xff] }
  0x9a   :  { %v214_v52 = vpop.f32.mrf.mxu1 }
  0x9b   :  { %v215_v20 = vadd.f32 %v214_v52, %v190_v46  ;;  %v243_v26 = vpop.f32.mrf.mxu2 }
  0x9c   :  { %v284_v58 = vpop.f32.mrf.mxu3 }
  0x9d   :  { %v408_v6 = vmul.f32 %v404_v28, %v215_v20  ;;  %v285_v24 = vadd.f32 %v284_v58, %v243_v26  ;;  %v405_v26 = vld.sshfl [vmem:[#allocation1 + $0x8] sm:$0xff pattern:$0x73625140] }
  0x9f   :  { %v474_v17 = vand.u32 4294901760, %v408_v6  ;;  %v314_v48 = vpop.f32.mrf.mxu0 }
  0xa0   :  { %v315_v39 = vadd.f32 %v314_v48, %v285_v24 }
  0xa1   :  { %v475_v22 = vsub.f32 %v408_v6, %v474_v17  ;;  %580 = vmatmul.f32.vlgmr.msrb.gmra.mxu1 %v474_v17  ;;  %v5785_v6 = vand.u32 4294901760, %v1081_v35 }
  0xa2   :  { %1044 = vmatpush.msrb.mxu1 %v5532_v29  ;;  %v341_v41 = vpop.f32.mrf.mxu1 }
  0xa3   :  { %v342_v61 = vadd.f32 %v341_v41, %v315_v39  ;;  %634 = vmatmul.f32.vlgmr.msrb.gmra.mxu2 %v475_v22  ;;  %v476_v59 = vand.u32 4294901760, %v475_v22  ;;  %7444 = vst [vmem:[#allocation26_spill] sm:$0xff] %v5785_v6 }
  0xa4   :  { %1046 = vmatpush.msrb.mxu1 %v5541_v11  ;;  %v374_v50 = vpop.f32.mrf.mxu2  ;;  %907 = vmatpush.msrb.mxu2 %v5538_v33 }
  0xa5   :  { %v375_v46 = vadd.f32 %v374_v50, %v342_v61  ;;  %673 = vmatmul.f32.vlgmr.msrb.gmra.mxu3 %v476_v59  ;;  %v477_v20 = vsub.f32 %v475_v22, %v476_v59  ;;  %v7440_v22 = vand.u32 4294901760, %v5538_v33  ;;  %v7442_v33 = vand.u32 4294901760, %v5561_v56  ;;  %v1079_v61 = vld [vmem:[%s7273_s2 + $0x28] sm:$0xff] }
  0xa6   :  { %952 = vmatpush.msrb.mxu3 %v5532_v29  ;;  %1048 = vmatpush.msrb.mxu1 %v5551_v19  ;;  %v5801_v59 = vsub.f32 %v1081_v35, %v5785_v6  ;;  %v5803_v50 = vand.u32 4294901760, %v1079_v61 }
  0xa7   :  { %v399_v24 = vpop.f32.mrf.mxu3  ;;  %v478_v28 = vand.u32 4294901760, %v477_v20  ;;  %910 = vmatpush.msrb.mxu2 %v5548_v40 }
  0xa8   :  { %v400_v52 = vadd.f32 %v399_v24, %v375_v46  ;;  %954 = vmatpush.msrb.mxu3 %v5541_v11  ;;  %1050 = vmatpush.msrb.mxu1 %v5564_v57  ;;  %v7441_v11 = vand.u32 4294901760, %v5548_v40  ;;  %v7443_v40 = vand.u32 4294901760, %v5574_v43  ;;  %7445 = vst [vmem:[#allocation27_spill] sm:$0xff] %v5801_v59 }
  0xa9   :  { %479 = vmatmul.f32.vlgmr.msrb.gmra.mxu0 %v478_v28  ;;  %779 = vmatmul.f32.vlgmr.msra.gmra.mxu1 %v474_v17  ;;  %7446 = vst [vmem:[#allocation28_spill] sm:$0xff] %v5803_v50  ;;  %v5822_v28 = vsub.f32 %v1079_v61, %v5803_v50 }
  0xaa   :  { %v409_v39 = vmul.f32 %v405_v26, %v400_v52  ;;  %956 = vmatpush.msrb.mxu3 %v5551_v19  ;;  %989 = vmatpush.msrb.mxu0 %v7440_v22  ;;  %v1072_v19 = vld [vmem:[%s7272_s1] sm:$0x3] }
  0xab   :  { %1052 = vmatpush.msrb.mxu1 %v5577_v23  ;;  %913 = vmatpush.msrb.mxu2 %v5561_v56  ;;  %v1083_v45 = vsel %vm28_vm0, %v1072_v19, 0  ;;  %v2074_v26 = vld [vmem:[%s7272_s1] sm:$0x3]  ;;  %7447 = vst [vmem:[#allocation29_spill] sm:$0xff] %v5822_v28  ;;  %v7460_v19 = vld [vmem:[#allocation14_spill] sm:$0xff] }
  0xac   :  { %v440_v29 = vsel %vm438_vm1, %v409_v39, 0  ;;  %958 = vmatpush.msrb.mxu3 %v5564_v57  ;;  %993 = vmatpush.msrb.mxu0 %v7441_v11  ;;  %v5761_v58 = vand.u32 4294901760, %v1083_v45  ;;  %v1483_v39 = vld [vmem:[%s7274_s3 + $0x78] sm:$0xff] }
  0xad   :  { %v5737_v48 = vand.u32 4294901760, %v440_v29  ;;  %1054 = vmatpush.msrb.mxu1 %v5586_v54  ;;  %916 = vmatpush.msrb.mxu2 %v5574_v43  ;;  %v1073_v43 = vld [vmem:[%s7272_s1] sm:$0xf]  ;;  %v5849_v22 = vand.u32 4294901760, %v1483_v39 }
  0xae   :  { %960 = vmatpush.msrb.mxu3 %v5577_v23  ;;  %997 = vmatpush.msrb.mxu0 %v7442_v33  ;;  %1456 = vst [vmem:[#allocation1] ss:$4 sm:$0xff] %v1073_v43  ;;  %v5774_v16 = vsub.f32 %v1083_v45, %v5761_v58  ;;  %v7463_v45 = vld [vmem:[#allocation16_spill] sm:$0xff]  ;;  %v7465_v43 = vld [vmem:[#allocation11_spill] sm:$0xff] }
  0xaf   :  { %v812_v57 = vsub.f32 %v440_v29, %v5737_v48  ;;  %1056 = vmatpush.msrb.mxu1 %v5601_v18  ;;  %897 = vmatmul.f32.vlgmr.msra.gmra.mxu3 %v5737_v48  ;;  %v7450_v29 = vld [vmem:[#allocation7_spill] sm:$0xff] }
  0xb0   :  { %919 = vmatpush.msrb.mxu2 %v5589_v60  ;;  %962 = vmatpush.msrb.mxu3 %v5586_v54  ;;  %v5790_v41 = vand.u32 4294901760, %v5774_v16 }
  0xb1   :  { %1001 = vmatpush.msrb.mxu0 %v7443_v40  ;;  %1058 = vmatpush.msrb.mxu1 %v5616_v0  ;;  %v813_v56 = vand.u32 4294901760, %v812_v57  ;;  %v7461_v40 = vld [vmem:[#allocation12_spill] sm:$0xff] }
  0xb2   :  { %742 = vmatmul.f32.vlgmr.msra.gmra.mxu0 %v474_v17  ;;  %922 = vmatpush.msrb.mxu2 %v5599_v53  ;;  %v1108_v46 = vsub.f32 %v5774_v16, %v5790_v41 }
  0xb3   :  { %964 = vmatpush.msrb.mxu3 %v5601_v18  ;;  %1005 = vmatpush.msrb.mxu0 %v5604_v32  ;;  %v814_v36 = vsub.f32 %v812_v57, %v813_v56 }
  0xb4   :  { %1060 = vmatpush.msrb.mxu1 %v5635_v25  ;;  %925 = vmatpush.msrb.mxu2 %v5614_v55  ;;  %v1109_v52 = vand.u32 4294901760, %v1108_v46  ;;  %v1480_v46 = vld [vmem:[%s7274_s3 + $0x60] sm:$0xff] }
  0xb5   :  { %966 = vmatpush.msrb.mxu3 %v5616_v0  ;;  %1009 = vmatpush.msrb.mxu0 %v5611_v2  ;;  %v815_v17 = vand.u32 4294901760, %v814_v36  ;;  %v5808_v20 = vld.sshfl [vmem:[#allocation1] sm:$0xff pattern:$0x73625140] }
  0xb6   :  { %1062 = vmatpush.msrb.mxu1 %v5655_v30  ;;  %928 = vmatpush.msrb.mxu2 %v5633_v12  ;;  %v5812_v24 = vld.sshfl [vmem:[#allocation1 + $0x8] sm:$0xff pattern:$0x73625140] }
  0xb7   :  { %968 = vmatpush.msrb.mxu3 %v5635_v25  ;;  %1013 = vmatpush.msrb.mxu0 %v5630_v9  ;;  %2085 = vst [vmem:[#allocation1] ss:$4 sm:$0xff] %v2074_v26  ;;  %v5942_v26 = vand.u32 4294901760, %v1480_v46 }
  0xb8   :  { %1064 = vmatpush.msrb.mxu1 %v5667_v34  ;;  %816 = vmatmul.f32.vlgmr.msra.gmra.mxu2 %v815_v17  ;;  %v7466_v17 = vld [vmem:[#allocation15_spill] sm:$0xff] }
  0xb9   :  { %931 = vmatpush.msrb.mxu2 %v5651_v31  ;;  %970 = vmatpush.msrb.mxu3 %v5655_v30 }
  0xba   :  { %1017 = vmatpush.msrb.mxu0 %v5648_v10  ;;  %1066 = vmatpush.msrb.mxu1 %v5684_v1 }
  0xbb   :  { %1068 = vmatmul.f32.vlgmr.msrb.gmra.mxu1 %v5737_v48  ;;  %934 = vmatpush.msrb.mxu2 %v5671_v63 }
  0xbc   :  { %972 = vmatpush.msrb.mxu3 %v5667_v34  ;;  %1021 = vmatpush.msrb.mxu0 %v5665_v51 }
  0xbd   :  { %937 = vmatpush.msrb.mxu2 %v5682_v62  ;;  %1198 = vmatpush.msra.mxu1 %v5068_v3 }
  0xbe   :  { %974 = vmatpush.msrb.mxu3 %v5684_v1  ;;  %1025 = vmatpush.msrb.mxu0 %v5688_v7 }
  0xbf   :  { %978 = vmatmul.f32.vlgmr.msrb.gmra.mxu3 %v813_v56  ;;  %940 = vmatpush.msrb.mxu2 %v5697_v27  ;;  %v7462_v56 = vld [vmem:[#allocation13_spill] sm:$0xff] }
  0xc0   :  { %1029 = vmatpush.msrb.mxu0 %v5694_v47  ;;  %943 = vmatmul.f32.vlgmr.msrb.gmra.mxu2 %v812_v57 }
  0xc1   :  { %1098 = vmatpush.msra.mxu2 %v5068_v3  ;;  %1131 = vmatpush.msra.mxu3 %v5161_v37  ;;  %v5825_v37 = vand.u32 4294901760, %v5801_v59 }
  0xc2   :  { %1033 = vmatpush.msrb.mxu0 %v5706_v42  ;;  %1200 = vmatpush.msra.mxu1 %v5070_v4 }
  0xc3   :  { %1035 = vmatmul.f32.vlgmr.msrb.gmra.mxu0 %v5737_v48  ;;  %1100 = vmatpush.msra.mxu2 %v5070_v4  ;;  %7448 = vst [vmem:[#allocation30_spill] sm:$0xff] %v5825_v37  ;;  %v7453_v48 = vld [vmem:[#allocation8_spill] sm:$0xff] }
  0xc4   :  { %1137 = vmatpush.msra.mxu3 %v5165_v38  ;;  %1169 = vmatpush.msra.mxu0 %v5094_v13  ;;  %v1314_v38 = vsub.f32 %v5801_v59, %v5825_v37  ;;  %v5841_v13 = vand.u32 4294901760, %v5822_v28 }
  0xc5   :  { %1102 = vmatpush.msra.mxu2 %v5072_v5  ;;  %1202 = vmatpush.msra.mxu1 %v5072_v5 }
  0xc6   :  { %1143 = vmatpush.msra.mxu3 %v5181_v44  ;;  %1172 = vmatpush.msra.mxu0 %v5098_v14  ;;  %7449 = vst [vmem:[#allocation31_spill] sm:$0xff] %v5841_v13  ;;  %v2075_v44 = vld [vmem:[%s7272_s1] sm:$0xf]  ;;  %v5855_v11 = vand.u32 4294901760, %v1314_v38 }
  0xc7   :  { %1104 = vmatpush.msra.mxu2 %v5080_v8  ;;  %1204 = vmatpush.msra.mxu1 %v5080_v8  ;;  %v2086_v14 = vld.sshfl [vmem:[#allocation1] sm:$0xff pattern:$0x73625140] }
  0xc8   :  { %1149 = vmatpush.msra.mxu3 %v5190_v49  ;;  %1110 = vmatmul.f32.vlgmr.msra.gmra.mxu2 %v1109_v52  ;;  %2462 = vst [vmem:[#allocation1] ss:$4 sm:$0xff] %v2075_v44  ;;  %v1320_v49 = vsub.f32 %v5822_v28, %v5841_v13  ;;  %v5956_v44 = vsub.f32 %v1480_v46, %v5942_v26 }
  0xc9   :  { %1151 = vmatmul.f32.vlgmr.msra.gmra.mxu3 %v5761_v58  ;;  %1227 = vmatpush.msrb.mxu2 %v5117_v21  ;;  %7451 = vst [vmem:[#allocation7_spill] sm:$0xff] %v5855_v11  ;;  %v7452_v21 = vld [vmem:[#allocation5_spill] sm:$0xff] }
  0xca   :  { %1258 = vmatpush.msrb.mxu3 %v5068_v3  ;;  %1175 = vmatpush.msra.mxu0 %v5101_v15  ;;  %v5864_v3 = vsub.f32 %v1483_v39, %v5849_v22  ;;  %v7455_v15 = vld [vmem:[#allocation9_spill] sm:$0xff]  ;;  %v5870_v33 = vand.u32 4294901760, %v1320_v49  ;;  %7471 = vst [vmem:[#allocation16_spill] sm:$0xff] %v5956_v44 }
  0xcb   :  { %1231 = vmatpush.msrb.mxu2 %v7450_v29  ;;  %1208 = vmatmul.f32.vlgmr.msra.gmra.mxu1 %v5790_v41  ;;  %v1478_v29 = vld [vmem:[%s7274_s3 + $0x50] sm:$0xff] }
  0xcc   :  { %1260 = vmatpush.msrb.mxu3 %v5070_v4  ;;  %1178 = vmatpush.msra.mxu0 %v7452_v21  ;;  %7454 = vst [vmem:[#allocation5_spill] sm:$0xff] %v5864_v3  ;;  %v5877_v4 = vand.u32 4294901760, %v5864_v3 }
  0xcd   :  { %1235 = vmatpush.msrb.mxu2 %v7453_v48  ;;  %1181 = vmatmul.f32.vlgmr.msra.gmra.mxu0 %v5774_v16  ;;  %7456 = vst [vmem:[#allocation8_spill] sm:$0xff] %v5870_v33  ;;  %v5971_v48 = vand.u32 4294901760, %v5956_v44 }
  0xce   :  { %1262 = vmatpush.msrb.mxu3 %v5072_v5  ;;  %1283 = vmatpush.msrb.mxu0 %v5785_v6  ;;  %7457 = vst [vmem:[#allocation9_spill] sm:$0xff] %v5877_v4  ;;  %v7458_v5 = vld [vmem:[#allocation6_spill] sm:$0xff]  ;;  %v1540_v57 = vsub.f32 %v5864_v3, %v5877_v4 }
  0xcf   :  { %1239 = vmatpush.msrb.mxu2 %v7455_v15  ;;  %1316 = vmatpush.msrb.mxu1 %v5855_v11  ;;  %7473 = vst [vmem:[#allocation15_spill] sm:$0xff] %v5971_v48 }
  0xd0   :  { %1241 = vmatmul.f32.vlgmr.msrb.gmra.mxu2 %v5761_v58  ;;  %1264 = vmatpush.msrb.mxu3 %v5080_v8  ;;  %v7459_v8 = vld [vmem:[#allocation10_spill] sm:$0xff]  ;;  %v5896_v36 = vand.u32 4294901760, %v1540_v57  ;;  %v1558_v57 = vsub.f32 %v5956_v44, %v5971_v48 }
  0xd1   :  { %1354 = vmatpush.msra.mxu2 %v5801_v59  ;;  %1266 = vmatmul.f32.vlgmr.msrb.gmra.mxu3 %v5761_v58 }
  0xd2   :  { %1383 = vmatpush.msra.mxu3 %v5785_v6  ;;  %1285 = vmatpush.msrb.mxu0 %v5803_v50  ;;  %7464 = vst [vmem:[#allocation6_spill] sm:$0xff] %v5896_v36 }
  0xd3   :  { %1357 = vmatpush.msra.mxu2 %v5822_v28  ;;  %1322 = vmatpush.msrb.mxu1 %v5870_v33 }
  0xd4   :  { %1385 = vmatpush.msra.mxu3 %v5803_v50  ;;  %1287 = vmatpush.msrb.mxu0 %v7458_v5 }
  0xd5   :  { %1360 = vmatpush.msra.mxu2 %v7459_v8  ;;  %1328 = vmatpush.msrb.mxu1 %v7460_v19  ;;  %v1477_v8 = vld [vmem:[%s7274_s3 + $0x48] sm:$0xff] }
  0xd6   :  { %1387 = vmatpush.msra.mxu3 %v7458_v5  ;;  %1289 = vmatpush.msrb.mxu0 %v7461_v40 }
  0xd7   :  { %1363 = vmatpush.msra.mxu2 %v7462_v56  ;;  %1334 = vmatpush.msrb.mxu1 %v7463_v45  ;;  %v5992_v56 = vand.u32 4294901760, %v1477_v8 }
  0xd8   :  { %1366 = vmatmul.f32.vlgmr.msra.gmra.mxu2 %v5774_v16  ;;  %1389 = vmatpush.msra.mxu3 %v7461_v40  ;;  %v1482_v16 = vld [vmem:[%s7274_s3 + $0x70] sm:$0xff] }
  0xd9   :  { %1295 = vmatmul.f32.vlgmr.msrb.gmra.mxu0 %v1109_v52  ;;  %1336 = vmatmul.f32.vlgmr.msrb.gmra.mxu1 %v5761_v58  ;;  %v5921_v35 = vand.u32 4294901760, %v1482_v16  ;;  %v1479_v52 = vld [vmem:[%s7274_s3 + $0x58] sm:$0xff] }
  0xda   :  { %1393 = vmatmul.f32.vlgmr.msra.gmra.mxu3 %v5790_v41  ;;  %1412 = vmatpush.msra.mxu0 %v5825_v37  ;;  %v1481_v41 = vld [vmem:[%s7274_s3 + $0x68] sm:$0xff] }
  0xdb   :  { %1459 = vrot.lane.b32.xlu0 %v5808_v20, %s5024_s24  ;;  %1443 = vmatpush.msra.mxu1 %v5785_v6  ;;  %v5927_v61 = vsub.f32 %v1482_v16, %v5921_v35 }
  0xdc   :  { %1416 = vmatpush.msra.mxu0 %v5841_v13  ;;  %2087 = vrot.lane.b32.xlu1 %v2086_v14, %s5024_s24  ;;  %v5958_v14 = vand.u32 4294901760, %v1479_v52 }
  0xdd   :  { %1445 = vmatpush.msra.mxu1 %v5803_v50  ;;  %1542 = vmatpush.msrb.mxu3 %v5896_v36  ;;  %7467 = vst [vmem:[#allocation10_spill] sm:$0xff] %v5927_v61  ;;  %v5937_v20 = vand.u32 4294901760, %v5927_v61 }
  0xde   :  { %1420 = vmatpush.msra.mxu0 %v7465_v43  ;;  %1497 = vmatpush.msrb.mxu2 %v5849_v22  ;;  %v5974_v15 = vsub.f32 %v1479_v52, %v5958_v14  ;;  %v1476_v43 = vld [vmem:[%s7274_s3 + $0x40] sm:$0xff] }
  0xdf   :  { %1447 = vmatpush.msra.mxu1 %v7458_v5  ;;  %7468 = vst [vmem:[#allocation14_spill] sm:$0xff] %v5937_v20  ;;  %v1546_v39 = vsub.f32 %v5927_v61, %v5937_v20  ;;  %v5978_v5 = vand.u32 4294901760, %v1478_v29  ;;  %v6010_v46 = vand.u32 4294901760, %v1476_v43 }
  0xe0   :  { %1424 = vmatpush.msra.mxu0 %v7466_v17  ;;  %1499 = vmatpush.msrb.mxu2 %v5921_v35  ;;  %7474 = vst [vmem:[#allocation32_spill] sm:$0xff] %v5974_v15  ;;  %v6003_v17 = vand.u32 4294901760, %v1558_v57 }
  0xe1   :  { %1426 = vmatmul.f32.vlgmr.msra.gmra.mxu0 %v5761_v58  ;;  %1449 = vmatpush.msra.mxu1 %v7461_v40  ;;  %v5966_v49 = vand.u32 4294901760, %v1546_v39  ;;  %v5990_v40 = vand.u32 4294901760, %v5974_v15  ;;  %v5995_v45 = vsub.f32 %v1478_v29, %v5978_v5  ;;  %v1475_v39 = vld [vmem:[%s7274_s3 + $0x38] sm:$0xff] }
  0xe2   :  { %1451 = vmatmul.f32.vlgmr.msra.gmra.mxu1 %v5761_v58  ;;  %1640 = vmatpush.msrb.mxu0 %v5864_v3  ;;  %v5929_v58 = vand.u32 4294901760, %v1481_v41  ;;  %7478 = vst [vmem:[#allocation36_spill] sm:$0xff] %v6003_v17  ;;  %v6030_v57 = vand.u32 4294901760, %v1475_v39  ;;  %v1473_v3 = vld [vmem:[%s7274_s3 + $0x28] sm:$0xff] }
  0xe3   :  { %1461 = vrot.lane.b32.xlu0 %v5812_v24, %s5024_s24  ;;  %1693 = vmatpush.msrb.mxu1 %v5849_v22  ;;  %7472 = vst [vmem:[#allocation11_spill] sm:$0xff] %v5966_v49  ;;  %v1564_v16 = vsub.f32 %v5974_v15, %v5990_v40  ;;  %v6014_v52 = vand.u32 4294901760, %v5995_v45 }
  0xe4   :  { %v5940_v24 = vsub.f32 %v1481_v41, %v5929_v58  ;;  %1501 = vmatpush.msrb.mxu2 %v5929_v58  ;;  %1643 = vmatpush.msrb.mxu0 %v5927_v61  ;;  %7476 = vst [vmem:[#allocation34_spill] sm:$0xff] %v5990_v40  ;;  %v6008_v41 = vsub.f32 %v1477_v8, %v5992_v56 }
  0xe5   :  { %1695 = vmatpush.msrb.mxu1 %v5921_v35  ;;  %1548 = vmatpush.msrb.mxu3 %v5966_v49  ;;  %7477 = vst [vmem:[#allocation35_spill] sm:$0xff] %v5995_v45  ;;  %v6022_v29 = vand.u32 4294901760, %v1564_v16  ;;  %v6028_v8 = vsub.f32 %v1476_v43, %v6010_v46 }
  0xe6   :  { %7469 = vst [vmem:[#allocation12_spill] sm:$0xff] %v5940_v24  ;;  %v5953_v38 = vand.u32 4294901760, %v5940_v24  ;;  %1503 = vmatpush.msrb.mxu2 %v5942_v26  ;;  %1646 = vmatpush.msrb.mxu0 %v5940_v24 }
  0xe7   :  { %1697 = vmatpush.msrb.mxu1 %v5929_v58  ;;  %7479 = vst [vmem:[#allocation37_spill] sm:$0xff] %v6008_v41  ;;  %v6044_v16 = vand.u32 4294901760, %v6028_v8 }
  0xe8   :  { %7470 = vst [vmem:[#allocation13_spill] sm:$0xff] %v5953_v38  ;;  %v1552_v21 = vsub.f32 %v5940_v24, %v5953_v38  ;;  %1505 = vmatpush.msrb.mxu2 %v5958_v14  ;;  %1649 = vmatpush.msrb.mxu0 %v5956_v44  ;;  %v1474_v44 = vld [vmem:[%s7274_s3 + $0x30] sm:$0xff]  ;;  %v6047_v24 = vsub.f32 %v1475_v39, %v6030_v57 }
  0xe9   :  { %1699 = vmatpush.msrb.mxu1 %v5942_v26  ;;  %7480 = vst [vmem:[#allocation38_spill] sm:$0xff] %v6014_v52  ;;  %v1582_v39 = vsub.f32 %v6028_v8, %v6044_v16 }
  0xea   :  { %v5985_v19 = vand.u32 4294901760, %v1552_v21  ;;  %1507 = vmatpush.msrb.mxu2 %v5978_v5  ;;  %1652 = vmatpush.msrb.mxu0 %v5974_v15  ;;  %7481 = vst [vmem:[#allocation39_spill] sm:$0xff] %v6022_v29  ;;  %v6025_v21 = vand.u32 4294901760, %v6008_v41  ;;  %v1570_v15 = vsub.f32 %v5995_v45, %v6014_v52  ;;  %v6064_v37 = vand.u32 4294901760, %v6047_v24 }
  0xeb   :  { %1701 = vmatpush.msrb.mxu1 %v5958_v14  ;;  %7483 = vst [vmem:[#allocation41_spill] sm:$0xff] %v6028_v8 }
  0xec   :  { %7475 = vst [vmem:[#allocation33_spill] sm:$0xff] %v5985_v19  ;;  %1554 = vmatpush.msrb.mxu3 %v5985_v19  ;;  %1509 = vmatpush.msrb.mxu2 %v5992_v56  ;;  %v1576_v43 = vsub.f32 %v6008_v41, %v6025_v21  ;;  %v6052_v61 = vand.u32 4294901760, %v1570_v15  ;;  %v6071_v15 = vand.u32 4294901760, %v1473_v3 }
  0xed   :  { %1703 = vmatpush.msrb.mxu1 %v5978_v5  ;;  %7482 = vst [vmem:[#allocation40_spill] sm:$0xff] %v6025_v21  ;;  %1655 = vmatpush.msrb.mxu0 %v5995_v45  ;;  %v6049_v45 = vand.u32 4294901760, %v1474_v44 }
  0xee   :  { %1560 = vmatpush.msrb.mxu3 %v6003_v17  ;;  %1511 = vmatpush.msrb.mxu2 %v6010_v46  ;;  %7484 = vst [vmem:[#allocation42_spill] sm:$0xff] %v6044_v16  ;;  %v6059_v13 = vand.u32 4294901760, %v1576_v43  ;;  %v1472_v43 = vld [vmem:[%s7274_s3 + $0x20] sm:$0xff]  ;;  %v1588_v17 = vsub.f32 %v6047_v24, %v6064_v37 }
  0xef   :  { %1705 = vmatpush.msrb.mxu1 %v5992_v56  ;;  %7485 = vst [vmem:[#allocation43_spill] sm:$0xff] %v6047_v24  ;;  %1658 = vmatpush.msrb.mxu0 %v6008_v41  ;;  %v6067_v41 = vsub.f32 %v1474_v44, %v6049_v45  ;;  %v6084_v19 = vand.u32 4294901760, %v1472_v43 }
  0xf0   :  { %1566 = vmatpush.msrb.mxu3 %v6022_v29  ;;  %7486 = vst [vmem:[#allocation44_spill] sm:$0xff] %v6052_v61  ;;  %1513 = vmatpush.msrb.mxu2 %v6030_v57  ;;  %v6077_v29 = vand.u32 4294901760, %v1582_v39  ;;  %v1471_v39 = vld [vmem:[%s7274_s3 + $0x18] sm:$0xff] }
  0xf1   :  { %1707 = vmatpush.msrb.mxu1 %v6010_v46  ;;  %7487 = vst [vmem:[#allocation45_spill] sm:$0xff] %v6059_v13  ;;  %1661 = vmatpush.msrb.mxu0 %v6028_v8  ;;  %v6082_v44 = vand.u32 4294901760, %v6067_v41  ;;  %v6090_v8 = vsub.f32 %v1473_v3, %v6071_v15  ;;  %v6101_v36 = vsub.f32 %v1472_v43, %v6084_v19 }
  0xf2   :  { %7488 = vst [vmem:[#allocation46_spill] sm:$0xff] %v6064_v37  ;;  %1572 = vmatpush.msrb.mxu3 %v6052_v61  ;;  %1515 = vmatpush.msrb.mxu2 %v6049_v45  ;;  %v6096_v61 = vand.u32 4294901760, %v1588_v17  ;;  %v1470_v17 = vld [vmem:[%s7274_s3 + $0x10] sm:$0xff] }
  0xf3   :  { %1709 = vmatpush.msrb.mxu1 %v6030_v57  ;;  %7489 = vst [vmem:[#allocation47_spill] sm:$0xff] %v6067_v41  ;;  %1664 = vmatpush.msrb.mxu0 %v6047_v24  ;;  %v1594_v49 = vsub.f32 %v6067_v41, %v6082_v44  ;;  %v6103_v24 = vand.u32 4294901760, %v1471_v39  ;;  %v6109_v3 = vand.u32 4294901760, %v6090_v8  ;;  %v6118_v43 = vand.u32 4294901760, %v6101_v36 }
  0xf4   :  { %7490 = vst [vmem:[#allocation48_spill] sm:$0xff] %v6077_v29  ;;  %1578 = vmatpush.msrb.mxu3 %v6059_v13  ;;  %1517 = vmatpush.msrb.mxu2 %v6071_v15 }
  0xf5   :  { %7491 = vst [vmem:[#allocation49_spill] sm:$0xff] %v6082_v44  ;;  %1711 = vmatpush.msrb.mxu1 %v6049_v45  ;;  %1667 = vmatpush.msrb.mxu0 %v6067_v41  ;;  %v6115_v13 = vand.u32 4294901760, %v1594_v49  ;;  %v6121_v33 = vsub.f32 %v1471_v39, %v6103_v24  ;;  %v6123_v41 = vand.u32 4294901760, %v1470_v17  ;;  %v1469_v49 = vld [vmem:[%s7274_s3 + $0x8] sm:$0xff]  ;;  %v1606_v39 = vsub.f32 %v6101_v36, %v6118_v43 }
  0xf6   :  { %7492 = vst [vmem:[#allocation50_spill] sm:$0xff] %v6090_v8  ;;  %1584 = vmatpush.msrb.mxu3 %v6077_v29  ;;  %1519 = vmatpush.msrb.mxu2 %v6084_v19  ;;  %v1600_v29 = vsub.f32 %v6090_v8, %v6109_v3  ;;  %v6142_v59 = vand.u32 4294901760, %v1469_v49 }
  0xf7   :  { %7493 = vst [vmem:[#allocation51_spill] sm:$0xff] %v6096_v61  ;;  %1713 = vmatpush.msrb.mxu1 %v6071_v15  ;;  %1670 = vmatpush.msrb.mxu0 %v6090_v8  ;;  %v6137_v11 = vand.u32 4294901760, %v6121_v33  ;;  %v6140_v28 = vsub.f32 %v1470_v17, %v6123_v41  ;;  %v6153_v50 = vand.u32 4294901760, %v1606_v39 }
  0xf8   :  { %7494 = vst [vmem:[#allocation52_spill] sm:$0xff] %v6101_v36  ;;  %1590 = vmatpush.msrb.mxu3 %v6096_v61  ;;  %1521 = vmatpush.msrb.mxu2 %v6103_v24  ;;  %v6147_v8 = vand.u32 4294901760, %v1600_v29  ;;  %v1468_v61 = vld [vmem:[%s7274_s3] sm:$0xff] }
  0xf9   :  { %7495 = vst [vmem:[#allocation53_spill] sm:$0xff] %v6109_v3  ;;  %1715 = vmatpush.msrb.mxu1 %v6084_v19  ;;  %1673 = vmatpush.msrb.mxu0 %v6101_v36  ;;  %v1612_v17 = vsub.f32 %v6121_v33, %v6137_v11  ;;  %v6158_v27 = vand.u32 4294901760, %v6140_v28  ;;  %v6161_v36 = vsub.f32 %v1469_v49, %v6142_v59  ;;  %v6166_v29 = vand.u32 4294901760, %v1468_v61 }
  0xfa   :  { %7496 = vst [vmem:[#allocation54_spill] sm:$0xff] %v6115_v13  ;;  %1596 = vmatpush.msrb.mxu3 %v6115_v13  ;;  %1523 = vmatpush.msrb.mxu2 %v6123_v41 }
  0xfb   :  { %7497 = vst [vmem:[#allocation55_spill] sm:$0xff] %v6118_v43  ;;  %1717 = vmatpush.msrb.mxu1 %v6103_v24  ;;  %1676 = vmatpush.msrb.mxu0 %v6121_v33  ;;  %v6169_v39 = vand.u32 4294901760, %v1612_v17  ;;  %v1618_v13 = vsub.f32 %v6140_v28, %v6158_v27  ;;  %v6174_v6 = vand.u32 4294901760, %v6161_v36  ;;  %v6180_v49 = vsub.f32 %v1468_v61, %v6166_v29 }
  0xfc   :  { %7498 = vst [vmem:[#allocation56_spill] sm:$0xff] %v6121_v33  ;;  %1602 = vmatpush.msrb.mxu3 %v6147_v8  ;;  %1525 = vmatpush.msrb.mxu2 %v6142_v59 }
  0xfd   :  { %7499 = vst [vmem:[#allocation57_spill] sm:$0xff] %v6137_v11  ;;  %1719 = vmatpush.msrb.mxu1 %v6123_v41  ;;  %1679 = vmatpush.msrb.mxu0 %v6140_v28  ;;  %v6183_v33 = vand.u32 4294901760, %v1618_v13  ;;  %v1624_v17 = vsub.f32 %v6161_v36, %v6174_v6 }
  0xfe   :  { %7500 = vst [vmem:[#allocation58_spill] sm:$0xff] %v6140_v28  ;;  %1608 = vmatpush.msrb.mxu3 %v6153_v50  ;;  %1527 = vmatpush.msrb.mxu2 %v6166_v29  ;;  %v6191_v28 = vand.u32 4294901760, %v6180_v49 }
  0xff   :  { %7501 = vst [vmem:[#allocation59_spill] sm:$0xff] %v6142_v59  ;;  %1721 = vmatpush.msrb.mxu1 %v6142_v59  ;;  %v6194_v61 = vand.u32 4294901760, %v1624_v17  ;;  %1682 = vmatpush.msrb.mxu0 %v6161_v36  ;;  %v7511_v17 = vld [vmem:[#allocation19_spill] sm:$0xff] }
 0x100   :  { %7502 = vst [vmem:[#allocation60_spill] sm:$0xff] %v6153_v50  ;;  %1734 = vmatpush.msra.mxu2 %v5877_v4  ;;  %1614 = vmatpush.msrb.mxu3 %v6169_v39  ;;  %v7509_v50 = vld [vmem:[#allocation17_spill] sm:$0xff]  ;;  %v1630_v13 = vsub.f32 %v6180_v49, %v6191_v28  ;;  %v7510_v4 = vld [vmem:[#allocation18_spill] sm:$0xff] }
 0x101   :  { %7503 = vst [vmem:[#allocation61_spill] sm:$0xff] %v6158_v27  ;;  %1723 = vmatpush.msrb.mxu1 %v6166_v29  ;;  %1685 = vmatpush.msrb.mxu0 %v6180_v49 }
 0x102   :  { %7504 = vst [vmem:[#allocation62_spill] sm:$0xff] %v6161_v36  ;;  %1738 = vmatpush.msra.mxu2 %v5937_v20  ;;  %1620 = vmatpush.msrb.mxu3 %v6183_v33  ;;  %v7512_v36 = vld [vmem:[#allocation20_spill] sm:$0xff] }
 0x103   :  { %7505 = vst [vmem:[#allocation63_spill] sm:$0xff] %v6166_v29  ;;  %1883 = vmatpush.msra.mxu1 %v7509_v50  ;;  %v6205_v50 = vand.u32 4294901760, %v1630_v13  ;;  %1846 = vmatpush.msra.mxu0 %v5577_v23  ;;  %v7514_v13 = vld [vmem:[#allocation23_spill] sm:$0xff] }
 0x104   :  { %7506 = vst [vmem:[#allocation64_spill] sm:$0xff] %v6174_v6  ;;  %1742 = vmatpush.msra.mxu2 %v5953_v38  ;;  %1626 = vmatpush.msrb.mxu3 %v6194_v61 }
 0x105   :  { %7507 = vst [vmem:[#allocation65_spill] sm:$0xff] %v6180_v49  ;;  %1889 = vmatpush.msra.mxu1 %v7510_v4  ;;  %v7513_v4 = vld [vmem:[#allocation21_spill] sm:$0xff]  ;;  %1848 = vmatpush.msra.mxu0 %v5586_v54 }
 0x106   :  { %7508 = vst [vmem:[#allocation66_spill] sm:$0xff] %v6191_v28  ;;  %1746 = vmatpush.msra.mxu2 %v5971_v48  ;;  %1632 = vmatpush.msrb.mxu3 %v6205_v50 }
 0x107   :  { %1895 = vmatpush.msra.mxu1 %v7511_v17  ;;  %1850 = vmatpush.msra.mxu0 %v5601_v18  ;;  %v7516_v17 = vld [vmem:[#allocation25_spill] sm:$0xff] }
 0x108   :  { %1801 = vmatpush.msra.mxu3 %v5849_v22  ;;  %1750 = vmatpush.msra.mxu2 %v5990_v40 }
 0x109   :  { %1901 = vmatpush.msra.mxu1 %v7512_v36  ;;  %v7515_v36 = vld [vmem:[#allocation24_spill] sm:$0xff]  ;;  %1852 = vmatpush.msra.mxu0 %v5616_v0 }
 0x10a   :  { %1803 = vmatpush.msra.mxu3 %v5921_v35  ;;  %1754 = vmatpush.msra.mxu2 %v6014_v52 }
 0x10b   :  { %1907 = vmatpush.msra.mxu1 %v7513_v4  ;;  %1854 = vmatpush.msra.mxu0 %v5635_v25 }
 0x10c   :  { %1805 = vmatpush.msra.mxu3 %v5929_v58  ;;  %1758 = vmatpush.msra.mxu2 %v6025_v21 }
 0x10d   :  { %1913 = vmatpush.msra.mxu1 %v7514_v13  ;;  %1856 = vmatpush.msra.mxu0 %v5655_v30 }
 0x10e   :  { %1807 = vmatpush.msra.mxu3 %v5942_v26  ;;  %1762 = vmatpush.msra.mxu2 %v6044_v16 }
 0x10f   :  { %1919 = vmatpush.msra.mxu1 %v7515_v36  ;;  %1858 = vmatpush.msra.mxu0 %v5667_v34 }
 0x110   :  { %1809 = vmatpush.msra.mxu3 %v5958_v14  ;;  %1766 = vmatpush.msra.mxu2 %v6064_v37 }
 0x111   :  { %1925 = vmatpush.msra.mxu1 %v7516_v17  ;;  %1860 = vmatpush.msra.mxu0 %v5684_v1 }
 0x112   :  { %1811 = vmatpush.msra.mxu3 %v5978_v5  ;;  %1770 = vmatpush.msra.mxu2 %v6082_v44 }
 0x114   :  { %1813 = vmatpush.msra.mxu3 %v5992_v56  ;;  %1774 = vmatpush.msra.mxu2 %v6109_v3 }
 0x116   :  { %1815 = vmatpush.msra.mxu3 %v6010_v46  ;;  %1778 = vmatpush.msra.mxu2 %v6118_v43 }
 0x118   :  { %1817 = vmatpush.msra.mxu3 %v6030_v57  ;;  %1782 = vmatpush.msra.mxu2 %v6137_v11 }
 0x11a   :  { %1819 = vmatpush.msra.mxu3 %v6049_v45  ;;  %1786 = vmatpush.msra.mxu2 %v6158_v27 }
 0x11c   :  { %1821 = vmatpush.msra.mxu3 %v6071_v15  ;;  %1790 = vmatpush.msra.mxu2 %v6174_v6 }
 0x11e   :  { %v581_v13 = vpop.f32.mrf.mxu1  ;;  %1823 = vmatpush.msra.mxu3 %v6084_v19  ;;  %1794 = vmatpush.msra.mxu2 %v6191_v28 }
 0x120   :  { %1825 = vmatpush.msra.mxu3 %v6103_v24 }
 0x122   :  { %1827 = vmatpush.msra.mxu3 %v6123_v41 }
 0x124   :  { %1829 = vmatpush.msra.mxu3 %v6142_v59 }
 0x126   :  { %v480_v4 = vpop.f32.mrf.mxu0  ;;  %v635_v17 = vpop.f32.mrf.mxu2  ;;  %1831 = vmatpush.msra.mxu3 %v6166_v29 }
 0x127   :  { %v582_v36 = vadd.f32 %v581_v13, %v480_v4 }
 0x128   :  { %v674_v44 = vpop.f32.mrf.mxu3 }
 0x129   :  { %v636_v37 = vadd.f32 %v635_v17, %v582_v36  ;;  %v780_v36 = vpop.f32.mrf.mxu1 }
 0x12b   :  { %v675_v13 = vadd.f32 %v674_v44, %v636_v37 }
 0x12f   :  { %v743_v4 = vpop.f32.mrf.mxu0 }
 0x130   :  { %v744_v3 = vadd.f32 %v743_v4, %v675_v13 }
 0x132   :  { %v781_v17 = vadd.f32 %v780_v36, %v744_v3  ;;  %v898_v43 = vpop.f32.mrf.mxu3 }
 0x138   :  { %v6253_v28 = vpop.f32.mrf.mxu1 }
 0x139   :  { %7518 = vst [vmem:[#allocation18_spill] sm:$0xff] %v6253_v28 }
 0x13b   :  { %v817_v11 = vpop.f32.mrf.mxu2 }
 0x13c   :  { %v818_v27 = vadd.f32 %v817_v11, %v781_v17 }
 0x13e   :  { %v899_v37 = vadd.f32 %v898_v43, %v818_v27 }
 0x140   :  { %v6251_v4 = vpop.f32.mrf.mxu0 }
 0x141   :  { %7517 = vst [vmem:[#allocation17_spill] sm:$0xff] %v6251_v4 }
 0x142   :  { %v979_v13 = vpop.f32.mrf.mxu3 }
 0x143   :  { %v944_v44 = vpop.f32.mrf.mxu2 }
 0x144   :  { %v945_v6 = vadd.f32 %v944_v44, %v899_v37 }
 0x146   :  { %v6255_v16 = vadd.f32 %v979_v13, %v945_v6 }
 0x148   :  { %7519 = vst [vmem:[#allocation19_spill] sm:$0xff] %v6255_v16  ;;  %v1209_v11 = vpop.f32.mrf.mxu1 }
 0x14a   :  { %v1182_v49 = vpop.f32.mrf.mxu0 }
 0x14b   :  { %v1111_v3 = vpop.f32.mrf.mxu2 }
 0x14c   :  { %v1152_v36 = vpop.f32.mrf.mxu3 }
 0x14d   :  { %v1153_v21 = vadd.f32 %v1152_v36, %v1111_v3  ;;  %v1460_v52 = vpop.permute.xlu0 %1459 }
 0x14f   :  { %v1183_v17 = vadd.f32 %v1182_v49, %v1153_v21  ;;  %v2082_v21 = vld [vmem:[%s7273_s2 + $0x30] sm:$0xff] }
 0x151   :  { %v1210_v40 = vadd.f32 %v1209_v11, %v1183_v17 }
 0x153   :  { %v1242_v27 = vpop.f32.mrf.mxu2 }
 0x154   :  { %v1243_v43 = vadd.f32 %v1242_v27, %v1210_v40  ;;  %v1267_v48 = vpop.f32.mrf.mxu3 }
 0x155   :  { %v1462_v38 = vpop.permute.xlu0 %1461 }
 0x156   :  { %v1268_v20 = vadd.f32 %v1267_v48, %v1243_v43  ;;  %v1463_v4 = vsel %vm438_vm1, %v1460_v52, %v1462_v38  ;;  %v1296_v37 = vpop.f32.mrf.mxu0  ;;  %v1337_v44 = vpop.f32.mrf.mxu1 }
 0x157   :  { %v1338_v13 = vadd.f32 %v1337_v44, %v1296_v37 }
 0x158   :  { %v1466_v28 = vmul.f32 %v1463_v4, %v1268_v20  ;;  %v6264_v4 = vand.u32 4294901760, %v2082_v21 }
 0x15a   :  { %v1528_v6 = vand.u32 4294901760, %v1466_v28 }
 0x15b   :  { %v1367_v16 = vpop.f32.mrf.mxu2 }
 0x15c   :  { %v1529_v29 = vsub.f32 %v1466_v28, %v1528_v6  ;;  %v1368_v59 = vadd.f32 %v1367_v16, %v1338_v13  ;;  %1634 = vmatmul.f32.vlgmr.msrb.gmra.mxu3 %v1528_v6  ;;  %v2080_v28 = vld [vmem:[%s7273_s2 + $0x20] sm:$0xff] }
 0x15d   :  { %v1394_v49 = vpop.f32.mrf.mxu3  ;;  %2054 = vmatpush.msrb.mxu3 %v5577_v23 }
 0x15e   :  { %v1395_v40 = vadd.f32 %v1394_v49, %v1368_v59  ;;  %1688 = vmatmul.f32.vlgmr.msrb.gmra.mxu0 %v1529_v29  ;;  %v1427_v48 = vpop.f32.mrf.mxu0  ;;  %v1530_v52 = vand.u32 4294901760, %v1529_v29  ;;  %v2078_v59 = vld [vmem:[%s7273_s2 + $0x10] sm:$0xff] }
 0x15f   :  { %2056 = vmatpush.msrb.mxu3 %v5586_v54  ;;  %v1452_v20 = vpop.f32.mrf.mxu1  ;;  %1941 = vmatpush.msrb.mxu0 %v5589_v60  ;;  %v6275_v60 = vand.u32 4294901760, %v2080_v28  ;;  %v6285_v27 = vand.u32 4294901760, %v2078_v59 }
 0x160   :  { %v1428_v16 = vadd.f32 %v1427_v48, %v1395_v40  ;;  %1727 = vmatmul.f32.vlgmr.msrb.gmra.mxu1 %v1530_v52  ;;  %v1531_v3 = vsub.f32 %v1529_v29, %v1530_v52  ;;  %v6280_v29 = vsub.f32 %v2082_v21, %v6264_v4  ;;  %v7521_v40 = vld [vmem:[#allocation22_spill] sm:$0xff]  ;;  %v7522_v52 = vld [vmem:[#allocation28_spill] sm:$0xff] }
 0x161   :  { %2058 = vmatpush.msrb.mxu3 %v5601_v18  ;;  %1978 = vmatpush.msrb.mxu1 %v5577_v23  ;;  %v2076_v23 = vld [vmem:[%s7273_s2] sm:$0xff]  ;;  %v6295_v43 = vsub.f32 %v2080_v28, %v6275_v60 }
 0x162   :  { %v1453_v36 = vadd.f32 %v1452_v20, %v1428_v16  ;;  %v1532_v11 = vand.u32 4294901760, %v1531_v3  ;;  %1944 = vmatpush.msrb.mxu0 %v5599_v53 }
 0x163   :  { %2060 = vmatpush.msrb.mxu3 %v5616_v0  ;;  %1980 = vmatpush.msrb.mxu1 %v5586_v54  ;;  %v6292_v54 = vand.u32 4294901760, %v2076_v23 }
 0x164   :  { %v1467_v17 = vmul.f32 %v1462_v38, %v1453_v36  ;;  %1533 = vmatmul.f32.vlgmr.msrb.gmra.mxu2 %v1532_v11  ;;  %1833 = vmatmul.f32.vlgmr.msra.gmra.mxu3 %v1528_v6  ;;  %v2464_v36 = vld.sshfl [vmem:[#allocation1 + $0x8] sm:$0xff pattern:$0x73625140]  ;;  %v3023_v11 = vld [vmem:[%s7272_s1] sm:$0x3] }
 0x165   :  { %2011 = vmatpush.msrb.mxu2 %v5604_v32  ;;  %2062 = vmatpush.msrb.mxu3 %v5635_v25  ;;  %v6300_v32 = vand.u32 4294901760, %v6280_v29  ;;  %v6314_v37 = vsub.f32 %v2076_v23, %v6292_v54 }
 0x166   :  { %v1494_v53 = vsel %vm1492_vm2, %v1467_v17, 0  ;;  %1982 = vmatpush.msrb.mxu1 %v5601_v18  ;;  %1947 = vmatpush.msrb.mxu0 %v5614_v55  ;;  %v6305_v18 = vsub.f32 %v2078_v59, %v6285_v27  ;;  %v2463_v59 = vld.sshfl [vmem:[#allocation1] sm:$0xff pattern:$0x73625140] }
 0x167   :  { %v1861_v38 = vand.u32 4294901760, %v1494_v53  ;;  %2015 = vmatpush.msrb.mxu2 %v5611_v2  ;;  %2064 = vmatpush.msrb.mxu3 %v5655_v30  ;;  %v6311_v2 = vand.u32 4294901760, %v6295_v43  ;;  %3030 = vst [vmem:[#allocation1] ss:$4 sm:$0xff] %v3023_v11  ;;  %v7539_v11 = vld [vmem:[#allocation54_spill] sm:$0xff] }
 0x168   :  { %1984 = vmatpush.msrb.mxu1 %v5616_v0  ;;  %1950 = vmatpush.msrb.mxu0 %v5633_v12  ;;  %v2135_v12 = vsub.f32 %v6280_v29, %v6300_v32 }
 0x169   :  { %v1862_v55 = vsub.f32 %v1494_v53, %v1861_v38  ;;  %1927 = vmatmul.f32.vlgmr.msra.gmra.mxu1 %v1861_v38  ;;  %2019 = vmatpush.msrb.mxu2 %v5630_v9  ;;  %v2088_v9 = vpop.permute.xlu1 %2087 }
 0x16a   :  { %2066 = vmatpush.msrb.mxu3 %v5667_v34  ;;  %1986 = vmatpush.msrb.mxu1 %v5635_v25  ;;  %v6322_v25 = vand.u32 4294901760, %v6305_v18  ;;  %v6334_v21 = vand.u32 4294901760, %v2135_v12  ;;  %v7524_v12 = vld [vmem:[#allocation29_spill] sm:$0xff] }
 0x16b   :  { %2023 = vmatpush.msrb.mxu2 %v5648_v10  ;;  %v1863_v0 = vand.u32 4294901760, %v1862_v55  ;;  %1953 = vmatpush.msrb.mxu0 %v5651_v31  ;;  %v2141_v10 = vsub.f32 %v6295_v43, %v6311_v2  ;;  %v6330_v31 = vand.u32 4294901760, %v6314_v37 }
 0x16c   :  { %2068 = vmatpush.msrb.mxu3 %v5684_v1  ;;  %1796 = vmatmul.f32.vlgmr.msra.gmra.mxu2 %v1528_v6  ;;  %v2089_v6 = vsel %vm28_vm0, %v2088_v9, 0  ;;  %v3024_v9 = vld [vmem:[%s7272_s1] sm:$0xf] }
 0x16d   :  { %1988 = vmatpush.msrb.mxu1 %v5655_v30  ;;  %2070 = vmatmul.f32.vlgmr.msrb.gmra.mxu3 %v1861_v38  ;;  %v1864_v44 = vsub.f32 %v1862_v55, %v1863_v0  ;;  %v2147_v30 = vsub.f32 %v6305_v18, %v6322_v25 }
 0x16e   :  { %2027 = vmatpush.msrb.mxu2 %v5665_v51  ;;  %2264 = vmatpush.msra.mxu3 %v6264_v4  ;;  %v6342_v51 = vand.u32 4294901760, %v2089_v6 }
 0x16f   :  { %1990 = vmatpush.msrb.mxu1 %v5667_v34  ;;  %v1865_v13 = vand.u32 4294901760, %v1864_v44  ;;  %1956 = vmatpush.msrb.mxu0 %v5671_v63  ;;  %v6345_v34 = vand.u32 4294901760, %v2141_v10  ;;  %v2153_v63 = vsub.f32 %v6314_v37, %v6330_v31  ;;  %v3031_v10 = vld.sshfl [vmem:[#allocation1] sm:$0xff pattern:$0x73625140] }
 0x170   :  { %2031 = vmatpush.msrb.mxu2 %v5688_v7  ;;  %2266 = vmatpush.msra.mxu3 %v6275_v60  ;;  %v2079_v7 = vld [vmem:[%s7273_s2 + $0x18] sm:$0xff]  ;;  %3222 = vst [vmem:[#allocation1] ss:$4 sm:$0xff] %v3024_v9 }
 0x171   :  { %1992 = vmatpush.msrb.mxu1 %v5684_v1  ;;  %1866 = vmatmul.f32.vlgmr.msra.gmra.mxu0 %v1865_v13  ;;  %v6353_v1 = vand.u32 4294901760, %v2147_v30  ;;  %v6364_v49 = vand.u32 4294901760, %v2153_v63  ;;  %v6373_v48 = vand.u32 4294901760, %v2079_v7  ;;  %v7526_v30 = vld [vmem:[#allocation8_spill] sm:$0xff]  ;;  %v7557_v9 = vld [vmem:[#allocation15_spill] sm:$0xff] }
 0x172   :  { %1996 = vmatmul.f32.vlgmr.msrb.gmra.mxu1 %v1863_v0  ;;  %2035 = vmatpush.msrb.mxu2 %v5694_v47  ;;  %v6360_v47 = vsub.f32 %v2089_v6, %v6342_v51  ;;  %v7525_v6 = vld [vmem:[#allocation7_spill] sm:$0xff] }
 0x173   :  { %2268 = vmatpush.msra.mxu3 %v6285_v27  ;;  %2137 = vmatpush.msra.mxu1 %v6334_v21  ;;  %v6382_v16 = vsub.f32 %v2079_v7, %v6373_v48  ;;  %v7527_v7 = vld [vmem:[#allocation6_spill] sm:$0xff] }
 0x174   :  { %2039 = vmatpush.msrb.mxu2 %v5706_v42  ;;  %1959 = vmatpush.msrb.mxu0 %v5682_v62  ;;  %v7520_v42 = vld [vmem:[#allocation26_spill] sm:$0xff]  ;;  %v2077_v62 = vld [vmem:[%s7273_s2 + $0x8] sm:$0xff]  ;;  %v2113_v28 = vand.u32 4294901760, %v6360_v47 }
 0x175   :  { %2270 = vmatpush.msra.mxu3 %v6292_v54  ;;  %2041 = vmatmul.f32.vlgmr.msrb.gmra.mxu2 %v1861_v38  ;;  %v6378_v20 = vand.u32 4294901760, %v2077_v62  ;;  %v2331_v17 = vand.u32 4294901760, %v6382_v16  ;;  %v7523_v38 = vld [vmem:[#allocation27_spill] sm:$0xff] }
 0x176   :  { %2143 = vmatpush.msra.mxu1 %v6345_v34  ;;  %2272 = vmatmul.f32.vlgmr.msra.gmra.mxu3 %v6342_v51  ;;  %v2114_v23 = vsub.f32 %v6360_v47, %v2113_v28 }
 0x177   :  { %2233 = vmatpush.msra.mxu2 %v6300_v32  ;;  %2389 = vmatpush.msrb.mxu3 %v7520_v42  ;;  %v6389_v3 = vsub.f32 %v2077_v62, %v6378_v20  ;;  %v2332_v0 = vsub.f32 %v6382_v16, %v2331_v17  ;;  %v7528_v62 = vld [vmem:[#allocation11_spill] sm:$0xff] }
 0x178   :  { %2149 = vmatpush.msra.mxu1 %v6353_v1  ;;  %1962 = vmatpush.msrb.mxu0 %v7521_v40  ;;  %v7529_v40 = vld [vmem:[#allocation33_spill] sm:$0xff] }
 0x179   :  { %2237 = vmatpush.msra.mxu2 %v6311_v2  ;;  %2391 = vmatpush.msrb.mxu3 %v7522_v52  ;;  %v2337_v53 = vand.u32 4294901760, %v6389_v3  ;;  %v2333_v13 = vand.u32 4294901760, %v2332_v0  ;;  %v7553_v0 = vld [vmem:[#allocation14_spill] sm:$0xff] }
 0x17a   :  { %2155 = vmatpush.msra.mxu1 %v6364_v49  ;;  %1965 = vmatmul.f32.vlgmr.msrb.gmra.mxu0 %v1862_v55  ;;  %v2115_v55 = vand.u32 4294901760, %v2114_v23  ;;  %v7542_v23 = vld [vmem:[#allocation60_spill] sm:$0xff] }
 0x17b   :  { %2104 = vmatpush.msra.mxu0 %v6264_v4  ;;  %2157 = vmatmul.f32.vlgmr.msra.gmra.mxu1 %v6342_v51  ;;  %v2338_v44 = vsub.f32 %v6389_v3, %v2337_v53 }
 0x17c   :  { %2241 = vmatpush.msra.mxu2 %v6322_v25  ;;  %2393 = vmatpush.msrb.mxu3 %v6373_v48 }
 0x17d   :  { %2204 = vmatpush.msrb.mxu1 %v6264_v4  ;;  %2106 = vmatpush.msra.mxu0 %v6275_v60  ;;  %v2339_v63 = vand.u32 4294901760, %v2338_v44  ;;  %v3224_v44 = vld.sshfl [vmem:[#allocation1 + $0x8] sm:$0xff pattern:$0x73625140] }
 0x17e   :  { %2245 = vmatpush.msra.mxu2 %v6330_v31  ;;  %2395 = vmatpush.msrb.mxu3 %v6378_v20 }
 0x17f   :  { %2206 = vmatpush.msrb.mxu1 %v6275_v60  ;;  %2247 = vmatmul.f32.vlgmr.msra.gmra.mxu2 %v6342_v51 }
 0x180   :  { %2399 = vmatmul.f32.vlgmr.msrb.gmra.mxu3 %v2113_v28  ;;  %2108 = vmatpush.msra.mxu0 %v6285_v27 }
 0x181   :  { %2360 = vmatpush.msrb.mxu2 %v7523_v38  ;;  %2208 = vmatpush.msrb.mxu1 %v6285_v27  ;;  %v7549_v38 = vld [vmem:[#allocation43_spill] sm:$0xff] }
 0x182   :  { %2110 = vmatpush.msra.mxu0 %v6292_v54  ;;  %2465 = vrot.lane.b32.xlu1 %v2463_v59, %s5025_s16  ;;  %v7537_v59 = vld [vmem:[#allocation51_spill] sm:$0xff] }
 0x183   :  { %2363 = vmatpush.msrb.mxu2 %v7524_v12  ;;  %2210 = vmatpush.msrb.mxu1 %v6292_v54  ;;  %v7555_v12 = vld [vmem:[#allocation13_spill] sm:$0xff] }
 0x184   :  { %2116 = vmatmul.f32.vlgmr.msra.gmra.mxu0 %v2115_v55  ;;  %2214 = vmatmul.f32.vlgmr.msrb.gmra.mxu1 %v2113_v28  ;;  %v7530_v28 = vld [vmem:[#allocation36_spill] sm:$0xff] }
 0x185   :  { %2175 = vmatpush.msrb.mxu0 %v6280_v29  ;;  %2366 = vmatpush.msrb.mxu2 %v6382_v16  ;;  %v7540_v16 = vld [vmem:[#allocation10_spill] sm:$0xff] }
 0x186   :  { %2322 = vmatpush.msra.mxu1 %v7525_v6  ;;  %2467 = vrot.lane.b32.xlu2 %v2464_v36, %s5025_s16  ;;  %v7538_v36 = vld [vmem:[#allocation5_spill] sm:$0xff]  ;;  %v7562_v6 = vld [vmem:[#allocation62_spill] sm:$0xff] }
 0x187   :  { %2178 = vmatpush.msrb.mxu0 %v6295_v43  ;;  %2369 = vmatpush.msrb.mxu2 %v6389_v3  ;;  %v7534_v3 = vld [vmem:[#allocation31_spill] sm:$0xff] }
 0x188   :  { %2328 = vmatpush.msra.mxu1 %v7526_v30  ;;  %2372 = vmatmul.f32.vlgmr.msrb.gmra.mxu2 %v6360_v47  ;;  %v7565_v30 = vld [vmem:[#allocation42_spill] sm:$0xff] }
 0x189   :  { %2181 = vmatpush.msrb.mxu0 %v6305_v18  ;;  %2543 = vmatpush.msra.mxu3 %v7527_v7  ;;  %v7568_v7 = vld [vmem:[#allocation53_spill] sm:$0xff] }
 0x18a   :  { %2334 = vmatpush.msra.mxu1 %v2333_v13  ;;  %2498 = vmatpush.msra.mxu2 %v5849_v22  ;;  %v7563_v13 = vld [vmem:[#allocation40_spill] sm:$0xff] }
 0x18b   :  { %2184 = vmatpush.msrb.mxu0 %v6314_v37  ;;  %2549 = vmatpush.msra.mxu3 %v7528_v62  ;;  %v3223_v62 = vld.sshfl [vmem:[#allocation1] sm:$0xff pattern:$0x73625140] }
 0x18c   :  { %2340 = vmatpush.msra.mxu1 %v2339_v63  ;;  %2187 = vmatmul.f32.vlgmr.msrb.gmra.mxu0 %v6360_v47  ;;  %v7531_v47 = vld [vmem:[#allocation39_spill] sm:$0xff]  ;;  %v7566_v63 = vld [vmem:[#allocation46_spill] sm:$0xff] }
 0x18d   :  { %2289 = vmatpush.msra.mxu0 %v7520_v42  ;;  %2342 = vmatmul.f32.vlgmr.msra.gmra.mxu1 %v6342_v51 }
 0x18e   :  { %2449 = vmatpush.msrb.mxu1 %v7520_v42  ;;  %3032 = vrot.lane.b32.xlu2 %v3031_v10, %s5025_s16  ;;  %v7532_v42 = vld [vmem:[#allocation30_spill] sm:$0xff] }
 0x18f   :  { %2291 = vmatpush.msra.mxu0 %v7522_v52  ;;  %2555 = vmatpush.msra.mxu3 %v7529_v40  ;;  %v7560_v10 = vld [vmem:[#allocation58_spill] sm:$0xff] }
 0x190   :  { %2451 = vmatpush.msrb.mxu1 %v7522_v52  ;;  %2500 = vmatpush.msra.mxu2 %v5921_v35  ;;  %v7533_v52 = vld [vmem:[#allocation44_spill] sm:$0xff] }
 0x191   :  { %2293 = vmatpush.msra.mxu0 %v6373_v48  ;;  %2561 = vmatpush.msra.mxu3 %v7530_v28  ;;  %v6546_v28 = vld [vmem:[%s7272_s1 + $0x2] sm:$0x3] }
 0x192   :  { %2453 = vmatpush.msrb.mxu1 %v6373_v48  ;;  %2502 = vmatpush.msra.mxu2 %v5929_v58  ;;  %v7535_v48 = vld [vmem:[#allocation45_spill] sm:$0xff]  ;;  %7574 = vst [vmem:[#allocation20_spill] sm:$0xff] %v6546_v28 }
 0x193   :  { %2295 = vmatpush.msra.mxu0 %v6378_v20  ;;  %2567 = vmatpush.msra.mxu3 %v7531_v47 }
 0x194   :  { %2455 = vmatpush.msrb.mxu1 %v6378_v20  ;;  %2301 = vmatmul.f32.vlgmr.msra.gmra.mxu0 %v2115_v55  ;;  %v7536_v20 = vld [vmem:[#allocation48_spill] sm:$0xff]  ;;  %v7551_v55 = vld [vmem:[#allocation9_spill] sm:$0xff] }
 0x195   :  { %2418 = vmatpush.msrb.mxu0 %v7532_v42  ;;  %2457 = vmatmul.f32.vlgmr.msrb.gmra.mxu1 %v6342_v51 }
 0x196   :  { %2573 = vmatpush.msra.mxu3 %v7533_v52  ;;  %2504 = vmatpush.msra.mxu2 %v5942_v26 }
 0x197   :  { %2422 = vmatpush.msrb.mxu0 %v7534_v3  ;;  %2694 = vmatpush.msra.mxu1 %v5849_v22 }
 0x198   :  { %2579 = vmatpush.msra.mxu3 %v7535_v48  ;;  %2506 = vmatpush.msra.mxu2 %v5958_v14 }
 0x199   :  { %2426 = vmatpush.msrb.mxu0 %v2331_v17  ;;  %2696 = vmatpush.msra.mxu1 %v5921_v35  ;;  %v7543_v17 = vld [vmem:[#allocation16_spill] sm:$0xff] }
 0x19a   :  { %2585 = vmatpush.msra.mxu3 %v7536_v20  ;;  %2508 = vmatpush.msra.mxu2 %v5978_v5 }
 0x19b   :  { %2430 = vmatpush.msrb.mxu0 %v2337_v53  ;;  %2698 = vmatpush.msra.mxu1 %v5929_v58  ;;  %v7545_v53 = vld [vmem:[#allocation35_spill] sm:$0xff] }
 0x19c   :  { %2432 = vmatmul.f32.vlgmr.msrb.gmra.mxu0 %v6342_v51  ;;  %2591 = vmatpush.msra.mxu3 %v7537_v59  ;;  %v7541_v51 = vld [vmem:[#allocation12_spill] sm:$0xff] }
 0x19d   :  { %2510 = vmatpush.msra.mxu2 %v5992_v56  ;;  %2641 = vmatpush.msra.mxu0 %v7538_v36 }
 0x19e   :  { %2597 = vmatpush.msra.mxu3 %v7539_v11  ;;  %2700 = vmatpush.msra.mxu1 %v5942_v26 }
 0x19f   :  { %2512 = vmatpush.msra.mxu2 %v6010_v46  ;;  %2644 = vmatpush.msra.mxu0 %v7540_v16 }
 0x1a0   :  { %2603 = vmatpush.msra.mxu3 %v6147_v8  ;;  %2702 = vmatpush.msra.mxu1 %v5958_v14  ;;  %v7544_v8 = vld [vmem:[#allocation32_spill] sm:$0xff] }
 0x1a1   :  { %2514 = vmatpush.msra.mxu2 %v6030_v57  ;;  %2647 = vmatpush.msra.mxu0 %v7541_v51 }
 0x1a2   :  { %2609 = vmatpush.msra.mxu3 %v7542_v23  ;;  %2704 = vmatpush.msra.mxu1 %v5978_v5 }
 0x1a3   :  { %2516 = vmatpush.msra.mxu2 %v6049_v45  ;;  %2650 = vmatpush.msra.mxu0 %v7543_v17 }
 0x1a4   :  { %2615 = vmatpush.msra.mxu3 %v6169_v39  ;;  %2706 = vmatpush.msra.mxu1 %v5992_v56  ;;  %v7546_v39 = vld [vmem:[#allocation37_spill] sm:$0xff] }
 0x1a5   :  { %2518 = vmatpush.msra.mxu2 %v6071_v15  ;;  %2653 = vmatpush.msra.mxu0 %v7544_v8 }
 0x1a6   :  { %2621 = vmatpush.msra.mxu3 %v6183_v33  ;;  %2708 = vmatpush.msra.mxu1 %v6010_v46  ;;  %v7547_v33 = vld [vmem:[#allocation41_spill] sm:$0xff] }
 0x1a7   :  { %2520 = vmatpush.msra.mxu2 %v6084_v19  ;;  %2656 = vmatpush.msra.mxu0 %v7545_v53  ;;  %v2493_v53 = vld [vmem:[%s7274_s3 + $0x98] sm:$0xff] }
 0x1a8   :  { %2627 = vmatpush.msra.mxu3 %v6194_v61  ;;  %2710 = vmatpush.msra.mxu1 %v6030_v57  ;;  %v7548_v61 = vld [vmem:[#allocation59_spill] sm:$0xff] }
 0x1a9   :  { %2522 = vmatpush.msra.mxu2 %v6103_v24  ;;  %2659 = vmatpush.msra.mxu0 %v7546_v39 }
 0x1aa   :  { %2633 = vmatpush.msra.mxu3 %v6205_v50  ;;  %2712 = vmatpush.msra.mxu1 %v6049_v45  ;;  %v7550_v50 = vld [vmem:[#allocation63_spill] sm:$0xff] }
 0x1ab   :  { %2524 = vmatpush.msra.mxu2 %v6123_v41  ;;  %2662 = vmatpush.msra.mxu0 %v7547_v33  ;;  %v6553_v33 = vand.u32 4294901760, %v2493_v53 }
 0x1ac   :  { %2802 = vmatpush.msrb.mxu3 %v5849_v22  ;;  %2714 = vmatpush.msra.mxu1 %v6071_v15  ;;  %v7552_v22 = vld [vmem:[#allocation47_spill] sm:$0xff] }
 0x1ad   :  { %2526 = vmatpush.msra.mxu2 %v7548_v61  ;;  %2665 = vmatpush.msra.mxu0 %v7549_v38  ;;  %v2492_v38 = vld [vmem:[%s7274_s3 + $0x90] sm:$0xff] }
 0x1ae   :  { %2804 = vmatpush.msrb.mxu3 %v5921_v35  ;;  %2716 = vmatpush.msra.mxu1 %v6084_v19  ;;  %v7554_v35 = vld [vmem:[#allocation50_spill] sm:$0xff] }
 0x1af   :  { %2528 = vmatpush.msra.mxu2 %v7550_v50  ;;  %2668 = vmatpush.msra.mxu0 %v7552_v22 }
 0x1b0   :  { %2806 = vmatpush.msrb.mxu3 %v5929_v58  ;;  %2718 = vmatpush.msra.mxu1 %v6103_v24  ;;  %v7556_v58 = vld [vmem:[#allocation52_spill] sm:$0xff] }
 0x1b1   :  { %2735 = vmatpush.msrb.mxu2 %v7551_v55  ;;  %2671 = vmatpush.msra.mxu0 %v7554_v35  ;;  %v6561_v55 = vand.u32 4294901760, %v2492_v38 }
 0x1b2   :  { %2808 = vmatpush.msrb.mxu3 %v5942_v26  ;;  %2720 = vmatpush.msra.mxu1 %v6123_v41  ;;  %v7558_v26 = vld [vmem:[#allocation56_spill] sm:$0xff] }
 0x1b3   :  { %2739 = vmatpush.msrb.mxu2 %v7553_v0  ;;  %2674 = vmatpush.msra.mxu0 %v7556_v58  ;;  %v2491_v0 = vld [vmem:[%s7274_s3 + $0x88] sm:$0xff]  ;;  %v6569_v58 = vsub.f32 %v2492_v38, %v6561_v55 }
 0x1b4   :  { %2810 = vmatpush.msrb.mxu3 %v5958_v14  ;;  %2722 = vmatpush.msra.mxu1 %v7548_v61  ;;  %v7559_v14 = vld [vmem:[#allocation34_spill] sm:$0xff] }
 0x1b5   :  { %2743 = vmatpush.msrb.mxu2 %v7555_v12  ;;  %2677 = vmatpush.msra.mxu0 %v7558_v26 }
 0x1b6   :  { %2812 = vmatpush.msrb.mxu3 %v5978_v5  ;;  %2724 = vmatpush.msra.mxu1 %v7550_v50  ;;  %v7561_v5 = vld [vmem:[#allocation38_spill] sm:$0xff] }
 0x1b7   :  { %2747 = vmatpush.msrb.mxu2 %v7557_v9  ;;  %2680 = vmatpush.msra.mxu0 %v7560_v10  ;;  %v6571_v9 = vand.u32 4294901760, %v2491_v0  ;;  %v2887_v10 = vand.u32 4294901760, %v6569_v58 }
 0x1b8   :  { %2814 = vmatpush.msrb.mxu3 %v5992_v56  ;;  %3227 = vrot.lane.b32.xlu1 %v3224_v44, %s5026_s19  ;;  %v7564_v56 = vld [vmem:[#allocation65_spill] sm:$0xff]  ;;  %v2490_v44 = vld [vmem:[%s7274_s3 + $0x80] sm:$0xff] }
 0x1b9   :  { %2751 = vmatpush.msrb.mxu2 %v7559_v14  ;;  %2683 = vmatpush.msra.mxu0 %v7562_v6  ;;  %v6584_v6 = vand.u32 4294901760, %v2490_v44 }
 0x1ba   :  { %2816 = vmatpush.msrb.mxu3 %v6010_v46  ;;  %v7567_v46 = vld [vmem:[#allocation49_spill] sm:$0xff]  ;;  %3225 = vrot.lane.b32.xlu0 %v3223_v62, %s5026_s19 }
 0x1bb   :  { %2755 = vmatpush.msrb.mxu2 %v7561_v5  ;;  %2686 = vmatpush.msra.mxu0 %v7564_v56  ;;  %v6582_v5 = vsub.f32 %v2491_v0, %v6571_v9 }
 0x1bc   :  { %2818 = vmatpush.msrb.mxu3 %v6030_v57  ;;  %v7569_v57 = vld [vmem:[#allocation55_spill] sm:$0xff] }
 0x1bd   :  { %2759 = vmatpush.msrb.mxu2 %v7563_v13  ;;  %2851 = vmatpush.msrb.mxu0 %v6553_v33 }
 0x1be   :  { %2820 = vmatpush.msrb.mxu3 %v6049_v45  ;;  %v7570_v45 = vld [vmem:[#allocation57_spill] sm:$0xff] }
 0x1bf   :  { %2763 = vmatpush.msrb.mxu2 %v7565_v30  ;;  %2853 = vmatpush.msrb.mxu0 %v6561_v55 }
 0x1c0   :  { %2822 = vmatpush.msrb.mxu3 %v6071_v15  ;;  %v7571_v15 = vld [vmem:[#allocation61_spill] sm:$0xff] }
 0x1c1   :  { %2767 = vmatpush.msrb.mxu2 %v7566_v63  ;;  %2855 = vmatpush.msrb.mxu0 %v6571_v9  ;;  %v2888_v63 = vsub.f32 %v6569_v58, %v2887_v10 }
 0x1c2   :  { %2824 = vmatpush.msrb.mxu3 %v6084_v19  ;;  %v3589_v19 = vld [vmem:[%s7272_s1] sm:$0x3] }
 0x1c3   :  { %2771 = vmatpush.msrb.mxu2 %v7567_v46  ;;  %3596 = vst [vmem:[#allocation1] ss:$4 sm:$0xff] %v3589_v19  ;;  %v2893_v46 = vand.u32 4294901760, %v6582_v5  ;;  %2857 = vmatpush.msrb.mxu0 %v6584_v6  ;;  %v2889_v62 = vand.u32 4294901760, %v2888_v63 }
 0x1c4   :  { %2826 = vmatpush.msrb.mxu3 %v6103_v24  ;;  %v7572_v24 = vld [vmem:[#allocation64_spill] sm:$0xff] }
 0x1c5   :  { %2775 = vmatpush.msrb.mxu2 %v7568_v7  ;;  %v6592_v7 = vsub.f32 %v2490_v44, %v6584_v6  ;;  %v2894_v19 = vsub.f32 %v6582_v5, %v2893_v46 }
 0x1c6   :  { %2828 = vmatpush.msrb.mxu3 %v6123_v41  ;;  %v7573_v41 = vld [vmem:[#allocation66_spill] sm:$0xff] }
 0x1c7   :  { %2779 = vmatpush.msrb.mxu2 %v7569_v57 }
 0x1c8   :  { %2830 = vmatpush.msrb.mxu3 %v7548_v61 }
 0x1c9   :  { %2783 = vmatpush.msrb.mxu2 %v7570_v45 }
 0x1ca   :  { %2832 = vmatpush.msrb.mxu3 %v7550_v50  ;;  %v3597_v40 = vld.sshfl [vmem:[#allocation1] sm:$0xff pattern:$0x73625140]  ;;  %v6559_v50 = vsub.f32 %v2493_v53, %v6553_v33 }
 0x1cb   :  { %2787 = vmatpush.msrb.mxu2 %v7571_v15  ;;  %4285 = vst [vmem:[#allocation1] ss:$4 sm:$0xff] %v6546_v28  ;;  %3598 = vrot.lane.b32.xlu2 %v3597_v40, %s5026_s19  ;;  %v2895_v40 = vand.u32 4294901760, %v2894_v19 }
 0x1cc   :  { %v2881_v12 = vand.u32 4294901760, %v6559_v50 }
 0x1cd   :  { %2791 = vmatpush.msrb.mxu2 %v7572_v24  ;;  %v2899_v24 = vand.u32 4294901760, %v6592_v7 }
 0x1ce   :  { %v2882_v14 = vsub.f32 %v6559_v50, %v2881_v12 }
 0x1cf   :  { %2795 = vmatpush.msrb.mxu2 %v7573_v41 }
 0x1d0   :  { %v2883_v30 = vand.u32 4294901760, %v2882_v14 }
 0x1d2   :  { %v4286_v47 = vld.sshfl [vmem:[#allocation1] sm:$0xff pattern:$0x73625140]  ;;  %2884 = vmatpush.msrb.mxu1 %v2883_v30 }
 0x1d3   :  { %4287 = vrot.lane.b32.xlu0 %v4286_v47, %s5024_s24  ;;  %v2900_v47 = vsub.f32 %v6592_v7, %v2899_v24 }
 0x1d4   :  { %2890 = vmatpush.msrb.mxu1 %v2889_v62 }
 0x1d6   :  { %2896 = vmatpush.msrb.mxu1 %v2895_v40 }
 0x1db   :  { %v1689_v52 = vpop.f32.mrf.mxu0 }
 0x1dd   :  { %v1728_v42 = vpop.f32.mrf.mxu1 }
 0x1df   :  { %v1635_v3 = vpop.f32.mrf.mxu3 }
 0x1e6   :  { %v1928_v59 = vpop.f32.mrf.mxu1 }
 0x1e7   :  { %v1534_v48 = vpop.f32.mrf.mxu2  ;;  %v1834_v17 = vpop.f32.mrf.mxu3 }
 0x1e8   :  { %v1636_v20 = vadd.f32 %v1635_v3, %v1534_v48 }
 0x1ea   :  { %v1690_v36 = vadd.f32 %v1689_v52, %v1636_v20  ;;  %v2901_v52 = vand.u32 4294901760, %v2900_v47 }
 0x1ec   :  { %v1729_v16 = vadd.f32 %v1728_v42, %v1690_v36  ;;  %2902 = vmatpush.msrb.mxu1 %v2901_v52 }
 0x1ee   :  { %v1867_v11 = vpop.f32.mrf.mxu0 }
 0x1ef   :  { %v1797_v51 = vpop.f32.mrf.mxu2  ;;  %v1997_v39 = vpop.f32.mrf.mxu1 }
 0x1f0   :  { %v1798_v23 = vadd.f32 %v1797_v51, %v1729_v16  ;;  %v2071_v45 = vpop.f32.mrf.mxu3  ;;  %v2468_v16 = vpop.permute.xlu2 %2467 }
 0x1f2   :  { %v1835_v8 = vadd.f32 %v1834_v17, %v1798_v23 }
 0x1f4   :  { %v1868_v61 = vadd.f32 %v1867_v11, %v1835_v8  ;;  %v2466_v51 = vpop.permute.xlu1 %2465 }
 0x1f5   :  { %v2469_v8 = vsel %vm1492_vm2, %v2466_v51, %v2468_v16 }
 0x1f6   :  { %v1929_v22 = vadd.f32 %v1928_v59, %v1868_v61 }
 0x1f7   :  { %v1966_v35 = vpop.f32.mrf.mxu0 }
 0x1f8   :  { %v1967_v26 = vadd.f32 %v1966_v35, %v1929_v22  ;;  %v2042_v56 = vpop.f32.mrf.mxu2  ;;  %v2158_v15 = vpop.f32.mrf.mxu1 }
 0x1f9   :  { %v2273_v23 = vpop.f32.mrf.mxu3 }
 0x1fa   :  { %v1998_v13 = vadd.f32 %v1997_v39, %v1967_v26 }
 0x1fc   :  { %v2043_v57 = vadd.f32 %v2042_v56, %v1998_v13  ;;  %v3033_v13 = vpop.permute.xlu2 %3032 }
 0x1fe   :  { %v2072_v41 = vadd.f32 %v2071_v45, %v2043_v57 }
 0x200   :  { %4935 = vrot.lane.b32.xlu0 %v2072_v41, %s5027_s6 }
 0x201   :  { %v2117_v42 = vpop.f32.mrf.mxu0  ;;  %v2215_v3 = vpop.f32.mrf.mxu1 }
 0x202   :  { %v2159_v48 = vadd.f32 %v2158_v15, %v2117_v42  ;;  %v2248_v20 = vpop.f32.mrf.mxu2  ;;  %v3034_v15 = vsel %vm28_vm0, %v3033_v13, 0 }
 0x203   :  { %v2400_v14 = vpop.f32.mrf.mxu3  ;;  %v3056_v40 = vand.u32 4294901760, %v3034_v15 }
 0x209   :  { %v2188_v59 = vpop.f32.mrf.mxu0 }
 0x20a   :  { %v2189_v36 = vadd.f32 %v2188_v59, %v2159_v48  ;;  %v2343_v39 = vpop.f32.mrf.mxu1 }
 0x20b   :  { %v2373_v0 = vpop.f32.mrf.mxu2 }
 0x20c   :  { %v2216_v11 = vadd.f32 %v2215_v3, %v2189_v36  ;;  %v3057_v3 = vsub.f32 %v3034_v15, %v3056_v40 }
 0x20e   :  { %v2249_v17 = vadd.f32 %v2248_v20, %v2216_v11  ;;  %v3058_v59 = vand.u32 4294901760, %v3057_v3 }
 0x210   :  { %v2274_v53 = vadd.f32 %v2273_v23, %v2249_v17 }
 0x211   :  { %v2302_v61 = vpop.f32.mrf.mxu0 }
 0x212   :  { %v2472_v38 = vmul.f32 %v2469_v8, %v2274_v53  ;;  %v2344_v22 = vadd.f32 %v2343_v39, %v2302_v61  ;;  %v2458_v62 = vpop.f32.mrf.mxu1  ;;  %v3240_v39 = vld [vmem:[%s7274_s3 + $0x40] sm:$0xff] }
 0x214   :  { %v2529_v35 = vand.u32 4294901760, %v2472_v38  ;;  %v2374_v26 = vadd.f32 %v2373_v0, %v2344_v22  ;;  %v6746_v0 = vand.u32 4294901760, %v3240_v39 }
 0x216   :  { %v2530_v44 = vsub.f32 %v2472_v38, %v2529_v35  ;;  %2635 = vmatmul.f32.vlgmr.msra.gmra.mxu3 %v2529_v35  ;;  %v2401_v56 = vadd.f32 %v2400_v14, %v2374_v26  ;;  %v3239_v26 = vld [vmem:[%s7274_s3 + $0x38] sm:$0xff]  ;;  %v6762_v13 = vsub.f32 %v3240_v39, %v6746_v0 }
 0x217   :  { %3149 = vmatpush.msra.mxu3 %v6264_v4 }
 0x218   :  { %2689 = vmatmul.f32.vlgmr.msra.gmra.mxu0 %v2530_v44  ;;  %v2531_v30 = vand.u32 4294901760, %v2530_v44  ;;  %v6779_v15 = vand.u32 4294901760, %v6762_v13 }
 0x219   :  { %v2433_v63 = vpop.f32.mrf.mxu0  ;;  %2922 = vmatpush.msra.mxu0 %v6559_v50  ;;  %3151 = vmatpush.msra.mxu3 %v6275_v60  ;;  %v3243_v50 = vld [vmem:[%s7274_s3 + $0x58] sm:$0xff] }
 0x21a   :  { %v2434_v57 = vadd.f32 %v2433_v63, %v2401_v56  ;;  %2728 = vmatmul.f32.vlgmr.msra.gmra.mxu1 %v2531_v30  ;;  %v2532_v45 = vsub.f32 %v2530_v44, %v2531_v30  ;;  %v6764_v56 = vand.u32 4294901760, %v3239_v26  ;;  %v3238_v63 = vld [vmem:[%s7274_s3 + $0x30] sm:$0xff]  ;;  %7578 = vst [vmem:[#allocation25_spill] sm:$0xff] %v6779_v15 }
 0x21b   :  { %2951 = vmatpush.msra.mxu1 %v6553_v33  ;;  %2925 = vmatpush.msra.mxu0 %v6569_v58 }
 0x21c   :  { %v2459_v19 = vadd.f32 %v2458_v62, %v2434_v57  ;;  %v2533_v41 = vand.u32 4294901760, %v2532_v45  ;;  %3153 = vmatpush.msra.mxu3 %v6285_v27  ;;  %v6782_v62 = vsub.f32 %v3239_v26, %v6764_v56 }
 0x21d   :  { %2953 = vmatpush.msra.mxu1 %v6561_v55  ;;  %2928 = vmatpush.msra.mxu0 %v6582_v5  ;;  %v3242_v5 = vld [vmem:[%s7274_s3 + $0x50] sm:$0xff] }
 0x21e   :  { %v2473_v47 = vmul.f32 %v2468_v16, %v2459_v19  ;;  %2534 = vmatmul.f32.vlgmr.msra.gmra.mxu2 %v2533_v41  ;;  %2834 = vmatmul.f32.vlgmr.msrb.gmra.mxu3 %v2529_v35  ;;  %v3241_v16 = vld [vmem:[%s7274_s3 + $0x48] sm:$0xff]  ;;  %v6786_v19 = vand.u32 4294901760, %v3238_v63 }
 0x21f   :  { %2955 = vmatpush.msra.mxu1 %v6571_v9  ;;  %2931 = vmatpush.msra.mxu0 %v6592_v7  ;;  %v6730_v8 = vand.u32 4294901760, %v3241_v16  ;;  %v3237_v41 = vld [vmem:[%s7274_s3 + $0x28] sm:$0xff] }
 0x220   :  { %v2495_v42 = vsel %vm28_vm0, %v2473_v47, 0  ;;  %3120 = vmatpush.msra.mxu2 %v6280_v29  ;;  %3155 = vmatpush.msra.mxu3 %v6292_v54  ;;  %v3334_v47 = vsub.f32 %v6762_v13, %v6779_v15 }
 0x221   :  { %v2858_v52 = vand.u32 4294901760, %v2495_v42  ;;  %2957 = vmatpush.msra.mxu1 %v6584_v6  ;;  %v6744_v22 = vsub.f32 %v3241_v16, %v6730_v8  ;;  %v4539_v16 = vld [vmem:[%s7272_s1 + $0x2] sm:$0x3] }
 0x222   :  { %3123 = vmatpush.msra.mxu2 %v6295_v43  ;;  %v3059_v43 = vsub.f32 %v3057_v3, %v3058_v59  ;;  %4545 = vst [vmem:[#allocation1] ss:$4 sm:$0xff] %v4539_v16 }
 0x223   :  { %v2859_v48 = vsub.f32 %v2495_v42, %v2858_v52  ;;  %2904 = vmatmul.f32.vlgmr.msrb.gmra.mxu1 %v2858_v52  ;;  %v6759_v14 = vand.u32 4294901760, %v6744_v22  ;;  %v6797_v42 = vand.u32 4294901760, %v6782_v62 }
 0x224   :  { %3011 = vmatpush.msrb.mxu1 %v6553_v33  ;;  %3126 = vmatpush.msra.mxu2 %v6305_v18 }
 0x225   :  { %v2860_v20 = vand.u32 4294901760, %v2859_v48  ;;  %7577 = vst [vmem:[#allocation24_spill] sm:$0xff] %v6759_v14  ;;  %v3328_v45 = vsub.f32 %v6744_v22, %v6759_v14 }
 0x226   :  { %2797 = vmatmul.f32.vlgmr.msrb.gmra.mxu2 %v2529_v35  ;;  %3013 = vmatpush.msrb.mxu1 %v6561_v55  ;;  %7579 = vst [vmem:[#allocation26_spill] sm:$0xff] %v6797_v42 }
 0x227   :  { %v2861_v29 = vsub.f32 %v2859_v48, %v2860_v20  ;;  %3129 = vmatpush.msra.mxu2 %v6314_v37  ;;  %3159 = vmatmul.f32.vlgmr.msra.gmra.mxu3 %v3058_v59  ;;  %v3340_v59 = vsub.f32 %v6782_v62, %v6797_v42 }
 0x228   :  { %3015 = vmatpush.msrb.mxu1 %v6571_v9 }
 0x229   :  { %v2862_v36 = vand.u32 4294901760, %v2861_v29 }
 0x22a   :  { %3017 = vmatpush.msrb.mxu1 %v6584_v6 }
 0x22b   :  { %2863 = vmatmul.f32.vlgmr.msrb.gmra.mxu0 %v2862_v36  ;;  %2961 = vmatmul.f32.vlgmr.msra.gmra.mxu1 %v2860_v20  ;;  %v6811_v20 = vand.u32 4294901760, %v3334_v47 }
 0x22c   :  { %2980 = vmatpush.msrb.mxu0 %v2881_v12  ;;  %3082 = vmatpush.msra.mxu1 %v6334_v21  ;;  %v3244_v21 = vld [vmem:[%s7274_s3 + $0x60] sm:$0xff] }
 0x22d   :  { %v6686_v33 = vand.u32 4294901760, %v3244_v21 }
 0x22e   :  { %2984 = vmatpush.msrb.mxu0 %v2887_v10  ;;  %3088 = vmatpush.msra.mxu1 %v6345_v34  ;;  %v6703_v10 = vand.u32 4294901760, %v3243_v50 }
 0x22f   :  { %3132 = vmatmul.f32.vlgmr.msra.gmra.mxu2 %v3057_v3  ;;  %v6699_v9 = vsub.f32 %v3244_v21, %v6686_v33  ;;  %v6805_v3 = vsub.f32 %v3238_v63, %v6786_v19 }
 0x230   :  { %2988 = vmatpush.msrb.mxu0 %v2893_v46  ;;  %3094 = vmatpush.msra.mxu1 %v6353_v1  ;;  %v6717_v11 = vsub.f32 %v3243_v50, %v6703_v10  ;;  %v3234_v50 = vld [vmem:[%s7274_s3 + $0x10] sm:$0xff] }
 0x231   :  { %v3309_v7 = vand.u32 4294901760, %v6699_v9 }
 0x232   :  { %2992 = vmatpush.msrb.mxu0 %v2899_v24  ;;  %3100 = vmatpush.msra.mxu1 %v6364_v49  ;;  %v6713_v24 = vand.u32 4294901760, %v3242_v5  ;;  %v6733_v53 = vand.u32 4294901760, %v6717_v11 }
 0x233   :  { %2934 = vmatmul.f32.vlgmr.msra.gmra.mxu0 %v2859_v48  ;;  %3019 = vmatmul.f32.vlgmr.msrb.gmra.mxu1 %v2858_v52  ;;  %v3310_v23 = vsub.f32 %v6699_v9, %v3309_v7  ;;  %v3236_v48 = vld [vmem:[%s7274_s3 + $0x20] sm:$0xff] }
 0x234   :  { %3049 = vmatpush.msra.mxu0 %v6264_v4  ;;  %3209 = vmatpush.msrb.mxu1 %v6264_v4  ;;  %v3060_v4 = vand.u32 4294901760, %v3059_v43  ;;  %v6728_v17 = vsub.f32 %v3242_v5, %v6713_v24  ;;  %7575 = vst [vmem:[#allocation21_spill] sm:$0xff] %v6733_v53  ;;  %v3316_v35 = vsub.f32 %v6717_v11, %v6733_v53  ;;  %v6818_v36 = vand.u32 4294901760, %v3236_v48 }
 0x235   :  { %v3311_v61 = vand.u32 4294901760, %v3310_v23  ;;  %v6824_v43 = vand.u32 4294901760, %v6805_v3 }
 0x236   :  { %3051 = vmatpush.msra.mxu0 %v6275_v60  ;;  %3211 = vmatpush.msrb.mxu1 %v6275_v60  ;;  %v3247_v60 = vld [vmem:[%s7274_s3 + $0x78] sm:$0xff]  ;;  %v6741_v38 = vand.u32 4294901760, %v6728_v17  ;;  %v6767_v30 = vand.u32 4294901760, %v3316_v35 }
 0x237   :  { %7580 = vst [vmem:[#allocation22_spill] sm:$0xff] %v6824_v43 }
 0x238   :  { %3053 = vmatpush.msra.mxu0 %v6285_v27  ;;  %3213 = vmatpush.msrb.mxu1 %v6285_v27  ;;  %v6652_v27 = vand.u32 4294901760, %v3247_v60  ;;  %7576 = vst [vmem:[#allocation23_spill] sm:$0xff] %v6741_v38  ;;  %v3322_v44 = vsub.f32 %v6728_v17, %v6741_v38 }
 0x23a   :  { %3055 = vmatpush.msra.mxu0 %v6292_v54  ;;  %3215 = vmatpush.msrb.mxu1 %v6292_v54  ;;  %v3246_v54 = vld [vmem:[%s7274_s3 + $0x70] sm:$0xff]  ;;  %v6774_v57 = vand.u32 4294901760, %v3322_v44  ;;  %v3232_v44 = vld [vmem:[%s7274_s3] sm:$0xff] }
 0x23b   :  { %2994 = vmatmul.f32.vlgmr.msrb.gmra.mxu0 %v2858_v52  ;;  %3102 = vmatmul.f32.vlgmr.msra.gmra.mxu1 %v3056_v40  ;;  %v6660_v18 = vand.u32 4294901760, %v3246_v54  ;;  %v6799_v52 = vand.u32 4294901760, %v3237_v41  ;;  %v6897_v47 = vand.u32 4294901760, %v3232_v44 }
 0x23c   :  { %3178 = vmatpush.msrb.mxu0 %v6300_v32  ;;  %v6658_v32 = vsub.f32 %v3247_v60, %v6652_v27  ;;  %3249 = vmatpush.msrb.mxu2 %v6652_v27  ;;  %v6830_v60 = vand.u32 4294901760, %v3340_v59 }
 0x23d   :  { %3445 = vmatpush.msra.mxu1 %v6652_v27  ;;  %v6816_v29 = vsub.f32 %v3237_v41, %v6799_v52 }
 0x23e   :  { %3182 = vmatpush.msrb.mxu0 %v6311_v2  ;;  %v3245_v2 = vld [vmem:[%s7274_s3 + $0x68] sm:$0xff]  ;;  %v3291_v37 = vand.u32 4294901760, %v6658_v32  ;;  %3251 = vmatpush.msrb.mxu2 %v6660_v18 }
 0x23f   :  { %3447 = vmatpush.msra.mxu1 %v6660_v18 }
 0x240   :  { %3186 = vmatpush.msrb.mxu0 %v6322_v25  ;;  %v6669_v25 = vsub.f32 %v3246_v54, %v6660_v18  ;;  %v3292_v34 = vsub.f32 %v6658_v32, %v3291_v37  ;;  %v6833_v54 = vand.u32 4294901760, %v6816_v29 }
 0x242   :  { %3190 = vmatpush.msrb.mxu0 %v6330_v31  ;;  %v6671_v31 = vand.u32 4294901760, %v3245_v2  ;;  %v3297_v1 = vand.u32 4294901760, %v6669_v25  ;;  %v3293_v55 = vand.u32 4294901760, %v3292_v34  ;;  %7581 = vst [vmem:[#allocation28_spill] sm:$0xff] %v6833_v54  ;;  %v3346_v34 = vsub.f32 %v6805_v3, %v6824_v43 }
 0x243   :  { %3061 = vmatmul.f32.vlgmr.msra.gmra.mxu0 %v3060_v4  ;;  %3217 = vmatmul.f32.vlgmr.msrb.gmra.mxu1 %v3056_v40  ;;  %v3235_v4 = vld [vmem:[%s7274_s3 + $0x18] sm:$0xff] }
 0x244   :  { %3392 = vmatpush.msra.mxu0 %v6658_v32  ;;  %v6684_v49 = vsub.f32 %v3245_v2, %v6671_v31  ;;  %3253 = vmatpush.msrb.mxu2 %v6671_v31  ;;  %v3298_v12 = vsub.f32 %v6669_v25, %v3297_v1  ;;  %v6836_v2 = vsub.f32 %v3236_v48, %v6818_v36  ;;  %v6838_v21 = vand.u32 4294901760, %v3235_v4 }
 0x245   :  { %3449 = vmatpush.msra.mxu1 %v6671_v31  ;;  %3294 = vmatpush.msrb.mxu3 %v3293_v55  ;;  %v3352_v55 = vsub.f32 %v6816_v29, %v6833_v54 }
 0x246   :  { %3395 = vmatpush.msra.mxu0 %v6669_v25  ;;  %v3303_v58 = vand.u32 4294901760, %v6684_v49  ;;  %3255 = vmatpush.msrb.mxu2 %v6686_v33  ;;  %v3299_v6 = vand.u32 4294901760, %v3298_v12  ;;  %v6852_v12 = vand.u32 4294901760, %v6836_v2  ;;  %v6855_v5 = vsub.f32 %v3235_v4, %v6838_v21 }
 0x247   :  { %3451 = vmatpush.msra.mxu1 %v6686_v33  ;;  %v6871_v23 = vand.u32 4294901760, %v3352_v55 }
 0x248   :  { %3398 = vmatpush.msra.mxu0 %v6684_v49  ;;  %v3304_v46 = vsub.f32 %v6684_v49, %v3303_v58  ;;  %3257 = vmatpush.msrb.mxu2 %v6703_v10  ;;  %7582 = vst [vmem:[#allocation27_spill] sm:$0xff] %v6852_v12  ;;  %v3358_v39 = vsub.f32 %v6836_v2, %v6852_v12 }
 0x249   :  { %3453 = vmatpush.msra.mxu1 %v6703_v10  ;;  %3300 = vmatpush.msrb.mxu3 %v3299_v6  ;;  %v6857_v6 = vand.u32 4294901760, %v3234_v50 }
 0x24a   :  { %3401 = vmatpush.msra.mxu0 %v6699_v9  ;;  %v3305_v51 = vand.u32 4294901760, %v3304_v46  ;;  %3259 = vmatpush.msrb.mxu2 %v6713_v24  ;;  %v6862_v46 = vand.u32 4294901760, %v3346_v34  ;;  %v6890_v63 = vand.u32 4294901760, %v3358_v39  ;;  %v6911_v34 = vsub.f32 %v3232_v44, %v6897_v47  ;;  %v4546_v39 = vld.sshfl [vmem:[#allocation1] sm:$0xff pattern:$0x73625140] }
 0x24b   :  { %3192 = vmatmul.f32.vlgmr.msrb.gmra.mxu0 %v3056_v40  ;;  %3455 = vmatpush.msra.mxu1 %v6713_v24  ;;  %v6792_v40 = vand.u32 4294901760, %v3328_v45  ;;  %v6879_v35 = vsub.f32 %v3234_v50, %v6857_v6  ;;  %4736 = vst [vmem:[#allocation1] ss:$4 sm:$0xff] %v4539_v16 }
 0x24c   :  { %3404 = vmatpush.msra.mxu0 %v6717_v11  ;;  %3306 = vmatpush.msrb.mxu3 %v3305_v51  ;;  %v3233_v51 = vld [vmem:[%s7274_s3 + $0x8] sm:$0xff] }
 0x24d   :  { %3261 = vmatpush.msrb.mxu2 %v6730_v8  ;;  %3457 = vmatpush.msra.mxu1 %v6730_v8  ;;  %v6884_v26 = vand.u32 4294901760, %v3233_v51  ;;  %v6895_v41 = vand.u32 4294901760, %v6879_v35 }
 0x24e   :  { %3407 = vmatpush.msra.mxu0 %v6728_v17  ;;  %3312 = vmatpush.msrb.mxu3 %v3311_v61  ;;  %v6876_v61 = vand.u32 4294901760, %v6855_v5 }
 0x24f   :  { %3263 = vmatpush.msrb.mxu2 %v6746_v0  ;;  %3459 = vmatpush.msra.mxu1 %v6746_v0  ;;  %7584 = vst [vmem:[#allocation7_spill] sm:$0xff] %v6895_v41  ;;  %v6903_v48 = vsub.f32 %v3233_v51, %v6884_v26  ;;  %v3370_v4 = vsub.f32 %v6879_v35, %v6895_v41  ;;  %v6923_v51 = vand.u32 4294901760, %v6911_v34 }
 0x250   :  { %3410 = vmatpush.msra.mxu0 %v6744_v22  ;;  %3318 = vmatpush.msrb.mxu3 %v6767_v30  ;;  %7583 = vst [vmem:[#allocation29_spill] sm:$0xff] %v6876_v61  ;;  %v3364_v45 = vsub.f32 %v6855_v5, %v6876_v61 }
 0x251   :  { %3265 = vmatpush.msrb.mxu2 %v6764_v56  ;;  %3461 = vmatpush.msra.mxu1 %v6764_v56  ;;  %v6917_v50 = vand.u32 4294901760, %v6903_v48  ;;  %v6920_v55 = vand.u32 4294901760, %v3370_v4  ;;  %7586 = vst [vmem:[#allocation6_spill] sm:$0xff] %v6923_v51 }
 0x252   :  { %3413 = vmatpush.msra.mxu0 %v6762_v13  ;;  %3324 = vmatpush.msrb.mxu3 %v6774_v57  ;;  %v6906_v59 = vand.u32 4294901760, %v3364_v45  ;;  %v3382_v45 = vsub.f32 %v6911_v34, %v6923_v51 }
 0x253   :  { %3267 = vmatpush.msrb.mxu2 %v6786_v19  ;;  %3463 = vmatpush.msra.mxu1 %v6786_v19  ;;  %7585 = vst [vmem:[#allocation8_spill] sm:$0xff] %v6917_v50  ;;  %v3376_v44 = vsub.f32 %v6903_v48, %v6917_v50 }
 0x254   :  { %3416 = vmatpush.msra.mxu0 %v6782_v62  ;;  %3330 = vmatpush.msrb.mxu3 %v6792_v40  ;;  %v6941_v4 = vand.u32 4294901760, %v3382_v45  ;;  %v3594_v45 = vld [vmem:[%s7273_s2 + $0x30] sm:$0xff] }
 0x255   :  { %3269 = vmatpush.msrb.mxu2 %v6799_v52  ;;  %3465 = vmatpush.msra.mxu1 %v6799_v52  ;;  %v6938_v32 = vand.u32 4294901760, %v3376_v44 }
 0x256   :  { %3419 = vmatpush.msra.mxu0 %v6805_v3  ;;  %3336 = vmatpush.msrb.mxu3 %v6811_v20  ;;  %7588 = vst [vmem:[#allocation33_spill] sm:$0xff] %v6941_v4 }
 0x257   :  { %3271 = vmatpush.msrb.mxu2 %v6818_v36  ;;  %3467 = vmatpush.msra.mxu1 %v6818_v36  ;;  %7587 = vst [vmem:[#allocation11_spill] sm:$0xff] %v6938_v32 }
 0x258   :  { %3422 = vmatpush.msra.mxu0 %v6816_v29  ;;  %3342 = vmatpush.msrb.mxu3 %v6830_v60 }
 0x259   :  { %3273 = vmatpush.msrb.mxu2 %v6838_v21  ;;  %3469 = vmatpush.msra.mxu1 %v6838_v21 }
 0x25a   :  { %3425 = vmatpush.msra.mxu0 %v6836_v2  ;;  %3348 = vmatpush.msrb.mxu3 %v6862_v46 }
 0x25b   :  { %3275 = vmatpush.msrb.mxu2 %v6857_v6  ;;  %3471 = vmatpush.msra.mxu1 %v6857_v6 }
 0x25c   :  { %3428 = vmatpush.msra.mxu0 %v6855_v5  ;;  %3354 = vmatpush.msrb.mxu3 %v6871_v23 }
 0x25d   :  { %3277 = vmatpush.msrb.mxu2 %v6884_v26  ;;  %3473 = vmatpush.msra.mxu1 %v6884_v26 }
 0x25e   :  { %3431 = vmatpush.msra.mxu0 %v6879_v35  ;;  %3360 = vmatpush.msrb.mxu3 %v6890_v63 }
 0x25f   :  { %3279 = vmatpush.msrb.mxu2 %v6897_v47  ;;  %3475 = vmatpush.msra.mxu1 %v6897_v47 }
 0x260   :  { %3434 = vmatpush.msra.mxu0 %v6903_v48  ;;  %3366 = vmatpush.msrb.mxu3 %v6906_v59 }
 0x261   :  { %3486 = vmatpush.msra.mxu2 %v3291_v37  ;;  %4547 = vrot.lane.b32.xlu1 %v4546_v39, %s5024_s24 }
 0x262   :  { %3372 = vmatpush.msrb.mxu3 %v6920_v55  ;;  %3437 = vmatpush.msra.mxu0 %v6911_v34 }
 0x263   :  { %3490 = vmatpush.msra.mxu2 %v3297_v1 }
 0x264   :  { %3378 = vmatpush.msrb.mxu3 %v6938_v32 }
 0x265   :  { %3494 = vmatpush.msra.mxu2 %v3303_v58 }
 0x266   :  { %3384 = vmatpush.msrb.mxu3 %v6941_v4 }
 0x267   :  { %3498 = vmatpush.msra.mxu2 %v3309_v7 }
 0x268   :  { %3553 = vmatpush.msra.mxu3 %v6652_v27 }
 0x269   :  { %3502 = vmatpush.msra.mxu2 %v6733_v53  ;;  %v3228_v53 = vpop.permute.xlu1 %3227 }
 0x26a   :  { %3555 = vmatpush.msra.mxu3 %v6660_v18 }
 0x26b   :  { %3506 = vmatpush.msra.mxu2 %v6741_v38 }
 0x26c   :  { %3557 = vmatpush.msra.mxu3 %v6671_v31 }
 0x26d   :  { %3510 = vmatpush.msra.mxu2 %v6759_v14  ;;  %v3599_v14 = vpop.permute.xlu2 %3598 }
 0x26e   :  { %3559 = vmatpush.msra.mxu3 %v6686_v33  ;;  %v3600_v4 = vsel %vm28_vm0, %v3599_v14, 0 }
 0x26f   :  { %3514 = vmatpush.msra.mxu2 %v6779_v15 }
 0x270   :  { %3561 = vmatpush.msra.mxu3 %v6703_v10 }
 0x271   :  { %3518 = vmatpush.msra.mxu2 %v6797_v42 }
 0x272   :  { %3563 = vmatpush.msra.mxu3 %v6713_v24 }
 0x273   :  { %3522 = vmatpush.msra.mxu2 %v6824_v43 }
 0x274   :  { %3565 = vmatpush.msra.mxu3 %v6730_v8 }
 0x275   :  { %3526 = vmatpush.msra.mxu2 %v6833_v54 }
 0x276   :  { %3567 = vmatpush.msra.mxu3 %v6746_v0 }
 0x277   :  { %3530 = vmatpush.msra.mxu2 %v6852_v12 }
 0x278   :  { %3569 = vmatpush.msra.mxu3 %v6764_v56 }
 0x279   :  { %3534 = vmatpush.msra.mxu2 %v6876_v61 }
 0x27a   :  { %3571 = vmatpush.msra.mxu3 %v6786_v19 }
 0x27b   :  { %3538 = vmatpush.msra.mxu2 %v6895_v41 }
 0x27c   :  { %3573 = vmatpush.msra.mxu3 %v6799_v52 }
 0x27d   :  { %3542 = vmatpush.msra.mxu2 %v6917_v50 }
 0x27e   :  { %3575 = vmatpush.msra.mxu3 %v6818_v36 }
 0x27f   :  { %3546 = vmatpush.msra.mxu2 %v6923_v51 }
 0x280   :  { %3577 = vmatpush.msra.mxu3 %v6838_v21 }
 0x282   :  { %3579 = vmatpush.msra.mxu3 %v6857_v6 }
 0x284   :  { %3581 = vmatpush.msra.mxu3 %v6884_v26 }
 0x286   :  { %3583 = vmatpush.msra.mxu3 %v6897_v47 }
 0x295   :  { %v2690_v25 = vpop.f32.mrf.mxu0 }
 0x297   :  { %v2729_v37 = vpop.f32.mrf.mxu1 }
 0x299   :  { %v2636_v1 = vpop.f32.mrf.mxu3 }
 0x2a0   :  { %v2905_v58 = vpop.f32.mrf.mxu1 }
 0x2a1   :  { %v2535_v49 = vpop.f32.mrf.mxu2  ;;  %v2835_v33 = vpop.f32.mrf.mxu3 }
 0x2a2   :  { %v2637_v9 = vadd.f32 %v2636_v1, %v2535_v49  ;;  %v3593_v1 = vld [vmem:[%s7273_s2 + $0x20] sm:$0xff] }
 0x2a4   :  { %v2691_v27 = vadd.f32 %v2690_v25, %v2637_v9  ;;  %v6981_v9 = vand.u32 4294901760, %v3593_v1 }
 0x2a6   :  { %v2730_v31 = vadd.f32 %v2729_v37, %v2691_v27  ;;  %v6970_v37 = vand.u32 4294901760, %v3594_v45 }
 0x2a8   :  { %v2864_v18 = vpop.f32.mrf.mxu0  ;;  %v2962_v39 = vpop.f32.mrf.mxu1  ;;  %3615 = vmatpush.msrb.mxu0 %v6970_v37  ;;  %v6979_v49 = vsub.f32 %v3594_v45, %v6970_v37 }
 0x2a9   :  { %v2798_v7 = vpop.f32.mrf.mxu2 }
 0x2aa   :  { %v2799_v16 = vadd.f32 %v2798_v7, %v2730_v31  ;;  %3617 = vmatpush.msrb.mxu0 %v6981_v9  ;;  %v6990_v7 = vand.u32 4294901760, %v6979_v49  ;;  %v3160_v38 = vpop.f32.mrf.mxu3 }
 0x2ac   :  { %v2836_v44 = vadd.f32 %v2835_v33, %v2799_v16  ;;  %v6995_v33 = vsub.f32 %v3593_v1, %v6981_v9  ;;  %v3646_v45 = vsub.f32 %v6979_v49, %v6990_v7 }
 0x2ae   :  { %v2865_v25 = vadd.f32 %v2864_v18, %v2836_v44  ;;  %v3592_v18 = vld [vmem:[%s7273_s2 + $0x10] sm:$0xff]  ;;  %v3591_v44 = vld [vmem:[%s7273_s2] sm:$0xff]  ;;  %s5028_s2 = smov 13  }
 0x2af   :  { %v6992_v16 = vand.u32 4294901760, %v3592_v18  ;;  %v7008_v28 = vand.u32 4294901760, %v3591_v44 }
 0x2b0   :  { %v2906_v27 = vadd.f32 %v2905_v58, %v2865_v25  ;;  %v2935_v31 = vpop.f32.mrf.mxu0  ;;  %v7006_v25 = vand.u32 4294901760, %v6995_v33  ;;  %v3020_v41 = vpop.f32.mrf.mxu1 }
 0x2b1   :  { %3619 = vmatpush.msrb.mxu0 %v6992_v16  ;;  %v7011_v1 = vsub.f32 %v3592_v18, %v6992_v16  ;;  %v7023_v50 = vsub.f32 %v3591_v44, %v7008_v28 }
 0x2b2   :  { %v2936_v58 = vadd.f32 %v2935_v31, %v2906_v27  ;;  %v7014_v27 = vand.u32 4294901760, %v3646_v45  ;;  %v3652_v31 = vsub.f32 %v6995_v33, %v7006_v25  ;;  %v3133_v15 = vpop.f32.mrf.mxu2 }
 0x2b3   :  { %3621 = vmatpush.msrb.mxu0 %v7008_v28  ;;  %v7020_v51 = vand.u32 4294901760, %v7011_v1  ;;  %v7032_v12 = vand.u32 4294901760, %v7023_v50 }
 0x2b4   :  { %7589 = vst [vmem:[#allocation36_spill] sm:$0xff] %v7014_v27  ;;  %v2963_v18 = vadd.f32 %v2962_v39, %v2936_v58  ;;  %3648 = vmatpush.msrb.mxu1 %v7014_v27  ;;  %v7027_v61 = vand.u32 4294901760, %v3652_v31 }
 0x2b5   :  { %v3658_v45 = vsub.f32 %v7011_v1, %v7020_v51  ;;  %v3664_v39 = vsub.f32 %v7023_v50, %v7032_v12 }
 0x2b6   :  { %7590 = vst [vmem:[#allocation39_spill] sm:$0xff] %v7027_v61  ;;  %3654 = vmatpush.msrb.mxu1 %v7027_v61 }
 0x2b7   :  { %v7036_v44 = vand.u32 4294901760, %v3658_v45  ;;  %v7042_v31 = vand.u32 4294901760, %v3664_v39  ;;  %v7046_v39 = vand.u32 4294901760, %v3600_v4 }
 0x2b8   :  { %v2995_v54 = vpop.f32.mrf.mxu0  ;;  %v3103_v42 = vpop.f32.mrf.mxu1 }
 0x2b9   :  { %v2996_v43 = vadd.f32 %v2995_v54, %v2963_v18  ;;  %7591 = vst [vmem:[#allocation30_spill] sm:$0xff] %v7036_v44  ;;  %3660 = vmatpush.msrb.mxu1 %v7036_v44 }
 0x2ba   :  { %7592 = vst [vmem:[#allocation44_spill] sm:$0xff] %v7042_v31 }
 0x2bb   :  { %v3021_v58 = vadd.f32 %v3020_v41, %v2996_v43  ;;  %3666 = vmatpush.msrb.mxu1 %v7042_v31  ;;  %v3226_v41 = vpop.permute.xlu0 %3225 }
 0x2bd   :  { %4939 = vrot.lane.b32.xlu1 %v3021_v58, %s5028_s2  ;;  %v3229_v58 = vsel %vm28_vm0, %v3226_v41, %v3228_v53  ;;  %v4737_v41 = vld.sshfl [vmem:[#allocation1] sm:$0xff pattern:$0x73625140] }
 0x2be   :  { %4738 = vrot.lane.b32.xlu2 %v4737_v41, %s5025_s16  ;;  %s5029_s16 = smov 18  }
 0x2c0   :  { %v3062_v54 = vpop.f32.mrf.mxu0  ;;  %v3218_v32 = vpop.f32.mrf.mxu1 }
 0x2c1   :  { %v3104_v18 = vadd.f32 %v3103_v42, %v3062_v54  ;;  %v3623_v42 = vsub.f32 %v3600_v4, %v7046_v39  ;;  %v7601_v4 = vld [vmem:[#allocation44_spill] sm:$0xff] }
 0x2c3   :  { %v3134_v45 = vadd.f32 %v3133_v15, %v3104_v18  ;;  %v3624_v18 = vand.u32 4294901760, %v3623_v42 }
 0x2c5   :  { %v3161_v61 = vadd.f32 %v3160_v38, %v3134_v45  ;;  %v3625_v14 = vsub.f32 %v3623_v42, %v3624_v18  ;;  %v7609_v45 = vld [vmem:[#allocation8_spill] sm:$0xff] }
 0x2c8   :  { %v3193_v43 = vpop.f32.mrf.mxu0 }
 0x2c9   :  { %v3194_v44 = vadd.f32 %v3193_v43, %v3161_v61  ;;  %v7610_v43 = vld [vmem:[#allocation6_spill] sm:$0xff] }
 0x2cb   :  { %v3219_v31 = vadd.f32 %v3218_v32, %v3194_v44  ;;  %v3626_v32 = vand.u32 4294901760, %v3625_v14  ;;  %v7603_v44 = vld [vmem:[#allocation26_spill] sm:$0xff] }
 0x2cd   :  { %v3231_v27 = vmul.f32 %v3229_v58, %v3219_v31  ;;  %v7605_v31 = vld [vmem:[#allocation28_spill] sm:$0xff] }
 0x2cf   :  { %v3280_v54 = vand.u32 4294901760, %v3231_v27 }
 0x2d1   :  { %v3281_v15 = vsub.f32 %v3231_v27, %v3280_v54  ;;  %3386 = vmatmul.f32.vlgmr.msrb.gmra.mxu3 %v3280_v54  ;;  %v7602_v27 = vld [vmem:[#allocation25_spill] sm:$0xff] }
 0x2d2   :  { %3972 = vmatpush.msrb.mxu3 %v6703_v10 }
 0x2d3   :  { %3440 = vmatmul.f32.vlgmr.msra.gmra.mxu0 %v3281_v15  ;;  %v3282_v38 = vand.u32 4294901760, %v3281_v15 }
 0x2d4   :  { %3686 = vmatpush.msra.mxu0 %v6979_v49  ;;  %3974 = vmatpush.msrb.mxu3 %v6713_v24 }
 0x2d5   :  { %3479 = vmatmul.f32.vlgmr.msra.gmra.mxu1 %v3282_v38  ;;  %v3283_v61 = vsub.f32 %v3281_v15, %v3282_v38 }
 0x2d6   :  { %3689 = vmatpush.msra.mxu0 %v6995_v33  ;;  %3715 = vmatpush.msra.mxu1 %v6970_v37 }
 0x2d7   :  { %v3284_v53 = vand.u32 4294901760, %v3283_v61  ;;  %3976 = vmatpush.msrb.mxu3 %v6730_v8 }
 0x2d8   :  { %3692 = vmatpush.msra.mxu0 %v7011_v1  ;;  %3717 = vmatpush.msra.mxu1 %v6981_v9 }
 0x2d9   :  { %3285 = vmatmul.f32.vlgmr.msrb.gmra.mxu2 %v3284_v53  ;;  %3585 = vmatmul.f32.vlgmr.msra.gmra.mxu3 %v3280_v54 }
 0x2da   :  { %3695 = vmatpush.msra.mxu0 %v7023_v50  ;;  %3719 = vmatpush.msra.mxu1 %v6992_v16 }
 0x2db   :  { %3627 = vmatmul.f32.vlgmr.msrb.gmra.mxu0 %v3626_v32  ;;  %3927 = vmatpush.msrb.mxu2 %v6717_v11  ;;  %v7593_v11 = vld [vmem:[#allocation36_spill] sm:$0xff] }
 0x2dc   :  { %3721 = vmatpush.msra.mxu1 %v7008_v28  ;;  %3744 = vmatpush.msrb.mxu0 %v6990_v7 }
 0x2dd   :  { %3668 = vmatmul.f32.vlgmr.msrb.gmra.mxu1 %v7046_v39  ;;  %3930 = vmatpush.msrb.mxu2 %v6728_v17  ;;  %v7594_v17 = vld [vmem:[#allocation11_spill] sm:$0xff] }
 0x2de   :  { %3748 = vmatpush.msrb.mxu0 %v7006_v25  ;;  %3775 = vmatpush.msrb.mxu1 %v6970_v37 }
 0x2df   :  { %3933 = vmatpush.msrb.mxu2 %v6744_v22  ;;  %3978 = vmatpush.msrb.mxu3 %v6746_v0  ;;  %v7595_v22 = vld [vmem:[#allocation21_spill] sm:$0xff] }
 0x2e0   :  { %3752 = vmatpush.msrb.mxu0 %v7020_v51  ;;  %3777 = vmatpush.msrb.mxu1 %v6981_v9 }
 0x2e1   :  { %3548 = vmatmul.f32.vlgmr.msra.gmra.mxu2 %v3280_v54  ;;  %3980 = vmatpush.msrb.mxu3 %v6764_v56 }
 0x2e2   :  { %3756 = vmatpush.msrb.mxu0 %v7032_v12  ;;  %3779 = vmatpush.msrb.mxu1 %v6992_v16 }
 0x2e3   :  { %3698 = vmatmul.f32.vlgmr.msra.gmra.mxu0 %v3623_v42  ;;  %3936 = vmatpush.msrb.mxu2 %v6762_v13  ;;  %v7596_v13 = vld [vmem:[#allocation39_spill] sm:$0xff] }
 0x2e4   :  { %3781 = vmatpush.msrb.mxu1 %v7008_v28  ;;  %3808 = vmatpush.msra.mxu0 %v6703_v10 }
 0x2e5   :  { %3725 = vmatmul.f32.vlgmr.msra.gmra.mxu1 %v3624_v18  ;;  %3939 = vmatpush.msrb.mxu2 %v6782_v62 }
 0x2e6   :  { %3849 = vmatpush.msra.mxu1 %v6767_v30  ;;  %3810 = vmatpush.msra.mxu0 %v6713_v24  ;;  %v7597_v30 = vld [vmem:[#allocation33_spill] sm:$0xff] }
 0x2e7   :  { %3942 = vmatpush.msrb.mxu2 %v6805_v3  ;;  %3982 = vmatpush.msrb.mxu3 %v6786_v19 }
 0x2e8   :  { %3855 = vmatpush.msra.mxu1 %v6774_v57  ;;  %3812 = vmatpush.msra.mxu0 %v6730_v8  ;;  %v7598_v57 = vld [vmem:[#allocation23_spill] sm:$0xff] }
 0x2e9   :  { %3945 = vmatpush.msrb.mxu2 %v6816_v29  ;;  %3984 = vmatpush.msrb.mxu3 %v6799_v52 }
 0x2ea   :  { %3861 = vmatpush.msra.mxu1 %v6792_v40  ;;  %3814 = vmatpush.msra.mxu0 %v6746_v0  ;;  %v7599_v40 = vld [vmem:[#allocation30_spill] sm:$0xff] }
 0x2eb   :  { %3758 = vmatmul.f32.vlgmr.msrb.gmra.mxu0 %v7046_v39  ;;  %3948 = vmatpush.msrb.mxu2 %v6836_v2 }
 0x2ec   :  { %3867 = vmatpush.msra.mxu1 %v6811_v20  ;;  %3816 = vmatpush.msra.mxu0 %v6764_v56  ;;  %v7600_v20 = vld [vmem:[#allocation24_spill] sm:$0xff] }
 0x2ed   :  { %3783 = vmatmul.f32.vlgmr.msrb.gmra.mxu1 %v7046_v39  ;;  %3951 = vmatpush.msrb.mxu2 %v6855_v5 }
 0x2ee   :  { %3873 = vmatpush.msra.mxu1 %v6830_v60  ;;  %3818 = vmatpush.msra.mxu0 %v6786_v19 }
 0x2ef   :  { %3986 = vmatpush.msrb.mxu3 %v6818_v36  ;;  %3954 = vmatpush.msrb.mxu2 %v6879_v35 }
 0x2f0   :  { %3879 = vmatpush.msra.mxu1 %v6862_v46  ;;  %3820 = vmatpush.msra.mxu0 %v6799_v52 }
 0x2f1   :  { %3988 = vmatpush.msrb.mxu3 %v6838_v21  ;;  %3957 = vmatpush.msrb.mxu2 %v6903_v48 }
 0x2f2   :  { %3885 = vmatpush.msra.mxu1 %v6871_v23  ;;  %3822 = vmatpush.msra.mxu0 %v6818_v36 }
 0x2f3   :  { %3990 = vmatpush.msrb.mxu3 %v6857_v6  ;;  %3960 = vmatpush.msrb.mxu2 %v6911_v34 }
 0x2f4   :  { %3891 = vmatpush.msra.mxu1 %v6890_v63  ;;  %3824 = vmatpush.msra.mxu0 %v6838_v21 }
 0x2f5   :  { %3992 = vmatpush.msrb.mxu3 %v6884_v26  ;;  %4113 = vmatpush.msra.mxu2 %v6970_v37 }
 0x2f6   :  { %3897 = vmatpush.msra.mxu1 %v6906_v59  ;;  %3826 = vmatpush.msra.mxu0 %v6857_v6 }
 0x2f7   :  { %3994 = vmatpush.msrb.mxu3 %v6897_v47  ;;  %4115 = vmatpush.msra.mxu2 %v6981_v9 }
 0x2f8   :  { %3903 = vmatpush.msra.mxu1 %v6920_v55  ;;  %3828 = vmatpush.msra.mxu0 %v6884_v26 }
 0x2f9   :  { %4146 = vmatpush.msra.mxu3 %v7593_v11  ;;  %4117 = vmatpush.msra.mxu2 %v6992_v16 }
 0x2fa   :  { %3909 = vmatpush.msra.mxu1 %v7594_v17  ;;  %3830 = vmatpush.msra.mxu0 %v6897_v47 }
 0x2fb   :  { %4152 = vmatpush.msra.mxu3 %v7596_v13  ;;  %4119 = vmatpush.msra.mxu2 %v7008_v28 }
 0x2fc   :  { %4009 = vmatpush.msrb.mxu0 %v7595_v22  ;;  %3915 = vmatpush.msra.mxu1 %v7597_v30 }
 0x2fd   :  { %4158 = vmatpush.msra.mxu3 %v7599_v40 }
 0x2fe   :  { %4064 = vmatpush.msrb.mxu1 %v6703_v10  ;;  %4013 = vmatpush.msrb.mxu0 %v7598_v57  ;;  %v7604_v10 = vld [vmem:[#allocation22_spill] sm:$0xff] }
 0x2ff   :  { %4164 = vmatpush.msra.mxu3 %v7601_v4 }
 0x300   :  { %4066 = vmatpush.msrb.mxu1 %v6713_v24  ;;  %4017 = vmatpush.msrb.mxu0 %v7600_v20  ;;  %v7606_v24 = vld [vmem:[#allocation27_spill] sm:$0xff] }
 0x302   :  { %4068 = vmatpush.msrb.mxu1 %v6730_v8  ;;  %4021 = vmatpush.msrb.mxu0 %v7602_v27  ;;  %v7607_v8 = vld [vmem:[#allocation29_spill] sm:$0xff] }
 0x304   :  { %4070 = vmatpush.msrb.mxu1 %v6746_v0  ;;  %4025 = vmatpush.msrb.mxu0 %v7603_v44  ;;  %v7608_v0 = vld [vmem:[#allocation7_spill] sm:$0xff] }
 0x306   :  { %4072 = vmatpush.msrb.mxu1 %v6764_v56  ;;  %4029 = vmatpush.msrb.mxu0 %v7604_v10 }
 0x308   :  { %4074 = vmatpush.msrb.mxu1 %v6786_v19  ;;  %4033 = vmatpush.msrb.mxu0 %v7605_v31 }
 0x30a   :  { %4076 = vmatpush.msrb.mxu1 %v6799_v52  ;;  %4037 = vmatpush.msrb.mxu0 %v7606_v24 }
 0x30c   :  { %4078 = vmatpush.msrb.mxu1 %v6818_v36  ;;  %4041 = vmatpush.msrb.mxu0 %v7607_v8 }
 0x30e   :  { %4080 = vmatpush.msrb.mxu1 %v6838_v21  ;;  %4045 = vmatpush.msrb.mxu0 %v7608_v0 }
 0x310   :  { %4082 = vmatpush.msrb.mxu1 %v6857_v6  ;;  %4049 = vmatpush.msrb.mxu0 %v7609_v45 }
 0x312   :  { %4084 = vmatpush.msrb.mxu1 %v6884_v26  ;;  %4053 = vmatpush.msrb.mxu0 %v7610_v43  ;;  %v7611_v43 = vld [vmem:[#allocation20_spill] sm:$0xff] }
 0x313   :  { %v4098_v45 = vsel %vm28_vm0, %v7611_v43, 0 }
 0x314   :  { %4086 = vmatpush.msrb.mxu1 %v6897_v47  ;;  %v7152_v40 = vand.u32 4294901760, %v4098_v45 }
 0x350   :  { %v3441_v39 = vpop.f32.mrf.mxu0 }
 0x352   :  { %v3480_v58 = vpop.f32.mrf.mxu1 }
 0x354   :  { %v3387_v15 = vpop.f32.mrf.mxu3 }
 0x358   :  { %v3628_v42 = vpop.f32.mrf.mxu0 }
 0x35a   :  { %v3669_v54 = vpop.f32.mrf.mxu1 }
 0x35b   :  { %v3670_v53 = vadd.f32 %v3669_v54, %v3628_v42  ;;  %v4121_v54 = vsub.f32 %v4098_v45, %v7152_v40 }
 0x35c   :  { %v3286_v18 = vpop.f32.mrf.mxu2  ;;  %v3586_v0 = vpop.f32.mrf.mxu3 }
 0x35d   :  { %v3388_v38 = vadd.f32 %v3387_v15, %v3286_v18 }
 0x35f   :  { %v3442_v14 = vadd.f32 %v3441_v39, %v3388_v38  ;;  %v3590_v39 = vld [vmem:[%s7272_s1 + $0x2] sm:$0x3]  ;;  %v4122_v38 = vand.u32 4294901760, %v4121_v54  ;;  %s5030_s1 = smov 22  }
 0x360   :  { %v3699_v61 = vpop.f32.mrf.mxu0 }
 0x361   :  { %v3700_v22 = vadd.f32 %v3699_v61, %v3670_v53  ;;  %v3481_v57 = vadd.f32 %v3480_v58, %v3442_v14 }
 0x362   :  { %v3726_v32 = vpop.f32.mrf.mxu1 }
 0x363   :  { %v3727_v41 = vadd.f32 %v3726_v32, %v3700_v22  ;;  %v4288_v32 = vpop.permute.xlu0 %4287 }
 0x364   :  { %v3549_v20 = vpop.f32.mrf.mxu2 }
 0x365   :  { %v3550_v27 = vadd.f32 %v3549_v20, %v3481_v57 }
 0x367   :  { %v3587_v4 = vadd.f32 %v3586_v0, %v3550_v27 }
 0x368   :  { %v3759_v8 = vpop.f32.mrf.mxu0 }
 0x369   :  { %v3760_v24 = vadd.f32 %v3759_v8, %v3727_v41  ;;  %4943 = vrot.lane.b32.xlu2 %v3587_v4, %s5029_s16  ;;  %v4123_v4 = vsub.f32 %v4121_v54, %v4122_v38 }
 0x36a   :  { %v3784_v42 = vpop.f32.mrf.mxu1 }
 0x36b   :  { %v3785_v58 = vadd.f32 %v3784_v42, %v3760_v24  ;;  %v4124_v45 = vand.u32 4294901760, %v4123_v4 }
 0x36d   :  { %v3787_v15 = vmul.f32 %v3785_v58, %v3590_v39 }
 0x36f   :  { %v3801_v43 = vsel %vm438_vm1, %v3787_v15, 0 }
 0x370   :  { %v3831_v18 = vand.u32 4294901760, %v3801_v43 }
 0x372   :  { %v3832_v0 = vsub.f32 %v3801_v43, %v3831_v18  ;;  %3917 = vmatmul.f32.vlgmr.msra.gmra.mxu1 %v3831_v18 }
 0x373   :  { %4348 = vmatpush.msra.mxu1 %v6830_v60 }
 0x374   :  { %3963 = vmatmul.f32.vlgmr.msrb.gmra.mxu2 %v3832_v0  ;;  %v3833_v8 = vand.u32 4294901760, %v3832_v0 }
 0x375   :  { %4184 = vmatpush.msrb.mxu2 %v6979_v49  ;;  %4354 = vmatpush.msra.mxu1 %v6862_v46 }
 0x376   :  { %v3834_v14 = vsub.f32 %v3832_v0, %v3833_v8  ;;  %3998 = vmatmul.f32.vlgmr.msrb.gmra.mxu3 %v3833_v8 }
 0x377   :  { %4187 = vmatpush.msrb.mxu2 %v6995_v33  ;;  %4213 = vmatpush.msrb.mxu3 %v6970_v37 }
 0x378   :  { %v3835_v24 = vand.u32 4294901760, %v3834_v14  ;;  %4360 = vmatpush.msra.mxu1 %v6871_v23 }
 0x379   :  { %4190 = vmatpush.msrb.mxu2 %v7011_v1  ;;  %4215 = vmatpush.msrb.mxu3 %v6981_v9 }
 0x37a   :  { %3836 = vmatmul.f32.vlgmr.msra.gmra.mxu0 %v3835_v24  ;;  %4088 = vmatmul.f32.vlgmr.msrb.gmra.mxu1 %v3831_v18 }
 0x37b   :  { %4193 = vmatpush.msrb.mxu2 %v7023_v50  ;;  %4217 = vmatpush.msrb.mxu3 %v6992_v16 }
 0x37c   :  { %4125 = vmatmul.f32.vlgmr.msra.gmra.mxu2 %v4124_v45  ;;  %4366 = vmatpush.msra.mxu1 %v6890_v63 }
 0x37d   :  { %4219 = vmatpush.msrb.mxu3 %v7008_v28  ;;  %4242 = vmatpush.msra.mxu2 %v6990_v7 }
 0x37e   :  { %4166 = vmatmul.f32.vlgmr.msra.gmra.mxu3 %v7152_v40  ;;  %4311 = vmatpush.msra.mxu0 %v6764_v56 }
 0x37f   :  { %4246 = vmatpush.msra.mxu2 %v7006_v25  ;;  %4273 = vmatpush.msra.mxu3 %v6970_v37 }
 0x380   :  { %4372 = vmatpush.msra.mxu1 %v6906_v59  ;;  %4313 = vmatpush.msra.mxu0 %v6786_v19 }
 0x381   :  { %4250 = vmatpush.msra.mxu2 %v7020_v51  ;;  %4275 = vmatpush.msra.mxu3 %v6981_v9 }
 0x382   :  { %4055 = vmatmul.f32.vlgmr.msrb.gmra.mxu0 %v3831_v18  ;;  %4378 = vmatpush.msra.mxu1 %v6920_v55 }
 0x383   :  { %4254 = vmatpush.msra.mxu2 %v7032_v12  ;;  %4277 = vmatpush.msra.mxu3 %v6992_v16 }
 0x384   :  { %4196 = vmatmul.f32.vlgmr.msrb.gmra.mxu2 %v4121_v54  ;;  %4315 = vmatpush.msra.mxu0 %v6799_v52 }
 0x385   :  { %4279 = vmatpush.msra.mxu3 %v7008_v28  ;;  %4406 = vmatpush.msrb.mxu2 %v6782_v62  ;;  %v7613_v62 = vld [vmem:[#allocation30_spill] sm:$0xff] }
 0x386   :  { %4223 = vmatmul.f32.vlgmr.msrb.gmra.mxu3 %v4122_v38  ;;  %4384 = vmatpush.msra.mxu1 %v7594_v17 }
 0x387   :  { %4409 = vmatpush.msrb.mxu2 %v6805_v3  ;;  %4443 = vmatpush.msrb.mxu3 %v6764_v56  ;;  %v7616_v3 = vld [vmem:[#allocation7_spill] sm:$0xff] }
 0x388   :  { %4317 = vmatpush.msra.mxu0 %v6818_v36  ;;  %4390 = vmatpush.msra.mxu1 %v7597_v30 }
 0x389   :  { %4412 = vmatpush.msrb.mxu2 %v6816_v29  ;;  %4445 = vmatpush.msrb.mxu3 %v6786_v19  ;;  %v7617_v29 = vld [vmem:[#allocation8_spill] sm:$0xff] }
 0x38a   :  { %4519 = vmatpush.msrb.mxu1 %v6764_v56  ;;  %4319 = vmatpush.msra.mxu0 %v6838_v21  ;;  %v7612_v56 = vld [vmem:[#allocation27_spill] sm:$0xff] }
 0x38b   :  { %4415 = vmatpush.msrb.mxu2 %v6836_v2  ;;  %4447 = vmatpush.msrb.mxu3 %v6799_v52 }
 0x38c   :  { %4256 = vmatmul.f32.vlgmr.msra.gmra.mxu2 %v7152_v40  ;;  %4521 = vmatpush.msrb.mxu1 %v6786_v19  ;;  %v7614_v19 = vld [vmem:[#allocation29_spill] sm:$0xff] }
 0x38d   :  { %4418 = vmatpush.msrb.mxu2 %v6855_v5  ;;  %4449 = vmatpush.msrb.mxu3 %v6818_v36 }
 0x38e   :  { %4281 = vmatmul.f32.vlgmr.msra.gmra.mxu3 %v7152_v40  ;;  %4321 = vmatpush.msra.mxu0 %v6857_v6 }
 0x38f   :  { %4421 = vmatpush.msrb.mxu2 %v6879_v35  ;;  %4451 = vmatpush.msrb.mxu3 %v6838_v21 }
 0x390   :  { %4523 = vmatpush.msrb.mxu1 %v6799_v52  ;;  %4323 = vmatpush.msra.mxu0 %v6884_v26  ;;  %v7615_v52 = vld [vmem:[#allocation44_spill] sm:$0xff] }
 0x391   :  { %4424 = vmatpush.msrb.mxu2 %v6903_v48  ;;  %4453 = vmatpush.msrb.mxu3 %v6857_v6 }
 0x392   :  { %4525 = vmatpush.msrb.mxu1 %v6818_v36  ;;  %4325 = vmatpush.msra.mxu0 %v6897_v47  ;;  %v7618_v36 = vld [vmem:[#allocation6_spill] sm:$0xff] }
 0x393   :  { %4427 = vmatpush.msrb.mxu2 %v6911_v34  ;;  %4455 = vmatpush.msrb.mxu3 %v6884_v26 }
 0x394   :  { %4476 = vmatpush.msrb.mxu0 %v7603_v44  ;;  %4527 = vmatpush.msrb.mxu1 %v6838_v21 }
 0x395   :  { %4564 = vmatpush.msra.mxu2 %v6970_v37  ;;  %4457 = vmatpush.msrb.mxu3 %v6897_v47 }
 0x396   :  { %4480 = vmatpush.msrb.mxu0 %v7604_v10  ;;  %4529 = vmatpush.msrb.mxu1 %v6857_v6 }
 0x397   :  { %4566 = vmatpush.msra.mxu2 %v6981_v9  ;;  %4597 = vmatpush.msra.mxu3 %v7593_v11 }
 0x398   :  { %4484 = vmatpush.msrb.mxu0 %v7605_v31  ;;  %4531 = vmatpush.msrb.mxu1 %v6884_v26 }
 0x399   :  { %4568 = vmatpush.msra.mxu2 %v6992_v16  ;;  %4603 = vmatpush.msra.mxu3 %v7596_v13  ;;  %v4548_v13 = vpop.permute.xlu1 %4547 }
 0x39a   :  { %4488 = vmatpush.msrb.mxu0 %v7612_v56  ;;  %4533 = vmatpush.msrb.mxu1 %v6897_v47  ;;  %v4549_v30 = vsel %vm28_vm0, %v4548_v13, 0 }
 0x39b   :  { %4570 = vmatpush.msra.mxu2 %v7008_v28  ;;  %4609 = vmatpush.msra.mxu3 %v7613_v62  ;;  %v4571_v31 = vand.u32 4294901760, %v4549_v30 }
 0x39c   :  { %4492 = vmatpush.msrb.mxu0 %v7614_v19 }
 0x39d   :  { %4615 = vmatpush.msra.mxu3 %v7615_v52  ;;  %v4572_v57 = vsub.f32 %v4549_v30, %v4571_v31 }
 0x39e   :  { %4496 = vmatpush.msrb.mxu0 %v7616_v3 }
 0x39f   :  { %v4573_v41 = vand.u32 4294901760, %v4572_v57 }
 0x3a0   :  { %4500 = vmatpush.msrb.mxu0 %v7617_v29 }
 0x3a1   :  { %v4574_v58 = vsub.f32 %v4572_v57, %v4573_v41 }
 0x3a2   :  { %4504 = vmatpush.msrb.mxu0 %v7618_v36 }
 0x3a3   :  { %v4575_v43 = vand.u32 4294901760, %v4574_v58 }
 0x3ef   :  { %v3918_v60 = vpop.f32.mrf.mxu1 }
 0x3f7   :  { %v3837_v2 = vpop.f32.mrf.mxu0  ;;  %v3964_v21 = vpop.f32.mrf.mxu2 }
 0x3f8   :  { %v3919_v5 = vadd.f32 %v3918_v60, %v3837_v2  ;;  %v4089_v47 = vpop.f32.mrf.mxu1 }
 0x3f9   :  { %v3999_v6 = vpop.f32.mrf.mxu3 }
 0x3fa   :  { %v3965_v46 = vadd.f32 %v3964_v21, %v3919_v5 }
 0x3fc   :  { %v4000_v23 = vadd.f32 %v3999_v6, %v3965_v46 }
 0x3ff   :  { %v4056_v35 = vpop.f32.mrf.mxu0  ;;  %v4126_v26 = vpop.f32.mrf.mxu2 }
 0x400   :  { %v4057_v63 = vadd.f32 %v4056_v35, %v4000_v23 }
 0x401   :  { %v4167_v48 = vpop.f32.mrf.mxu3 }
 0x402   :  { %v4090_v59 = vadd.f32 %v4089_v47, %v4057_v63  ;;  %v4168_v55 = vadd.f32 %v4167_v48, %v4126_v26 }
 0x404   :  { %4947 = vrot.lane.b32.xlu0 %v4090_v59, %s5030_s1 }
 0x407   :  { %v4197_v34 = vpop.f32.mrf.mxu2 }
 0x408   :  { %v4198_v17 = vadd.f32 %v4197_v34, %v4168_v55 }
 0x409   :  { %v4224_v11 = vpop.f32.mrf.mxu3 }
 0x40a   :  { %v4225_v40 = vadd.f32 %v4224_v11, %v4198_v17 }
 0x40f   :  { %v4257_v44 = vpop.f32.mrf.mxu2 }
 0x410   :  { %v4258_v10 = vadd.f32 %v4257_v44, %v4225_v40  ;;  %v4739_v40 = vpop.permute.xlu2 %4738 }
 0x411   :  { %v4282_v61 = vpop.f32.mrf.mxu3 }
 0x412   :  { %v4283_v53 = vadd.f32 %v4282_v61, %v4258_v10 }
 0x414   :  { %v4290_v22 = vmul.f32 %v4288_v32, %v4283_v53 }
 0x416   :  { %v4300_v20 = vsel %vm1492_vm2, %v4290_v22, 0 }
 0x417   :  { %v4326_v27 = vand.u32 4294901760, %v4300_v20 }
 0x419   :  { %v4327_v39 = vsub.f32 %v4300_v20, %v4326_v27  ;;  %4392 = vmatmul.f32.vlgmr.msra.gmra.mxu1 %v4326_v27 }
 0x41a   :  { %4724 = vmatpush.msra.mxu1 %v6970_v37 }
 0x41b   :  { %4430 = vmatmul.f32.vlgmr.msrb.gmra.mxu2 %v4327_v39  ;;  %v4328_v42 = vand.u32 4294901760, %v4327_v39 }
 0x41c   :  { %4635 = vmatpush.msrb.mxu2 %v6979_v49  ;;  %4726 = vmatpush.msra.mxu1 %v6981_v9 }
 0x41d   :  { %v4329_v54 = vsub.f32 %v4327_v39, %v4328_v42  ;;  %4461 = vmatmul.f32.vlgmr.msrb.gmra.mxu3 %v4328_v42 }
 0x41e   :  { %4638 = vmatpush.msrb.mxu2 %v6995_v33  ;;  %4664 = vmatpush.msrb.mxu3 %v6970_v37  ;;  %v4742_v33 = vld [vmem:[%s7274_s3] sm:$0xff] }
 0x41f   :  { %v4330_v15 = vand.u32 4294901760, %v4329_v54  ;;  %4728 = vmatpush.msra.mxu1 %v6992_v16  ;;  %v4767_v38 = vand.u32 4294901760, %v4742_v33 }
 0x420   :  { %4641 = vmatpush.msrb.mxu2 %v7011_v1  ;;  %4666 = vmatpush.msrb.mxu3 %v6981_v9 }
 0x421   :  { %4331 = vmatmul.f32.vlgmr.msra.gmra.mxu0 %v4330_v15  ;;  %4535 = vmatmul.f32.vlgmr.msrb.gmra.mxu1 %v4326_v27  ;;  %v4809_v14 = vsub.f32 %v4742_v33, %v4767_v38 }
 0x422   :  { %4730 = vmatpush.msra.mxu1 %v7008_v28  ;;  %4644 = vmatpush.msrb.mxu2 %v7023_v50  ;;  %v4745_v50 = vld [vmem:[%s7274_s3 + $0x18] sm:$0xff] }
 0x423   :  { %4576 = vmatmul.f32.vlgmr.msra.gmra.mxu2 %v4575_v43  ;;  %4668 = vmatpush.msrb.mxu3 %v6992_v16  ;;  %v4761_v37 = vand.u32 4294901760, %v4745_v50  ;;  %v4810_v56 = vand.u32 4294901760, %v4809_v14 }
 0x424   :  { %4693 = vmatpush.msra.mxu0 %v6990_v7 }
 0x425   :  { %4617 = vmatmul.f32.vlgmr.msra.gmra.mxu3 %v4571_v31  ;;  %v4791_v49 = vsub.f32 %v4745_v50, %v4761_v37  ;;  %4862 = vmatpush.msrb.mxu1 %v4761_v37  ;;  %v4811_v19 = vsub.f32 %v4809_v14, %v4810_v56 }
 0x426   :  { %4670 = vmatpush.msrb.mxu3 %v7008_v28  ;;  %4697 = vmatpush.msra.mxu0 %v7006_v25  ;;  %v4744_v28 = vld [vmem:[%s7274_s3 + $0x10] sm:$0xff] }
 0x427   :  { %v4763_v9 = vand.u32 4294901760, %v4744_v28  ;;  %4762 = vmatpush.msra.mxu2 %v4761_v37  ;;  %v4812_v52 = vand.u32 4294901760, %v4811_v19 }
 0x428   :  { %4701 = vmatpush.msra.mxu0 %v7020_v51  ;;  %v4792_v51 = vand.u32 4294901760, %v4791_v49 }
 0x429   :  { %4506 = vmatmul.f32.vlgmr.msrb.gmra.mxu0 %v4326_v27  ;;  %4732 = vmatmul.f32.vlgmr.msra.gmra.mxu1 %v4571_v31  ;;  %v4797_v7 = vsub.f32 %v4744_v28, %v4763_v9  ;;  %v4940_v28 = vpop.permute.xlu1 %4939 }
 0x42a   :  { %4705 = vmatpush.msra.mxu0 %v7032_v12  ;;  %v4743_v12 = vld [vmem:[%s7274_s3 + $0x8] sm:$0xff]  ;;  %4864 = vmatpush.msrb.mxu1 %v4763_v9  ;;  %v4793_v25 = vsub.f32 %v4791_v49, %v4792_v51  ;;  %s5031_s3 = smov 25  }
 0x42b   :  { %4647 = vmatmul.f32.vlgmr.msrb.gmra.mxu2 %v4572_v57  ;;  %v4765_v16 = vand.u32 4294901760, %v4743_v12  ;;  %v4798_v1 = vand.u32 4294901760, %v4797_v7 }
 0x42c   :  { %4833 = vmatpush.msrb.mxu0 %v4791_v49  ;;  %4764 = vmatpush.msra.mxu2 %v4763_v9  ;;  %v4794_v0 = vand.u32 4294901760, %v4793_v25  ;;  %v7619_v49 = vld [vmem:[#allocation19_spill] sm:$0xff] }
 0x42d   :  { %4674 = vmatmul.f32.vlgmr.msrb.gmra.mxu3 %v4573_v41  ;;  %v4803_v18 = vsub.f32 %v4743_v12, %v4765_v16  ;;  %4866 = vmatpush.msrb.mxu1 %v4765_v16  ;;  %v4799_v8 = vsub.f32 %v4797_v7, %v4798_v1 }
 0x42e   :  { %4836 = vmatpush.msrb.mxu0 %v4797_v7  ;;  %4766 = vmatpush.msra.mxu2 %v4765_v16  ;;  %v7621_v7 = vld [vmem:[#allocation18_spill] sm:$0xff] }
 0x42f   :  { %v4804_v4 = vand.u32 4294901760, %v4803_v18  ;;  %4868 = vmatpush.msrb.mxu1 %v4767_v38  ;;  %4795 = vmatpush.msra.mxu3 %v4794_v0  ;;  %v4800_v24 = vand.u32 4294901760, %v4799_v8 }
 0x430   :  { %4839 = vmatpush.msrb.mxu0 %v4803_v18  ;;  %4768 = vmatpush.msra.mxu2 %v4767_v38 }
 0x431   :  { %4707 = vmatmul.f32.vlgmr.msra.gmra.mxu0 %v4571_v31  ;;  %v4805_v45 = vsub.f32 %v4803_v18, %v4804_v4  ;;  %4801 = vmatpush.msra.mxu3 %v4800_v24 }
 0x432   :  { %4842 = vmatpush.msrb.mxu0 %v4809_v14  ;;  %4891 = vmatpush.msrb.mxu2 %v4792_v51  ;;  %v4944_v51 = vpop.permute.xlu2 %4943 }
 0x433   :  { %v4806_v62 = vand.u32 4294901760, %v4805_v45 }
 0x434   :  { %4895 = vmatpush.msrb.mxu2 %v4798_v1 }
 0x435   :  { %4807 = vmatpush.msra.mxu3 %v4806_v62 }
 0x436   :  { %4899 = vmatpush.msrb.mxu2 %v4804_v4 }
 0x437   :  { %4813 = vmatpush.msra.mxu3 %v4812_v52 }
 0x438   :  { %4903 = vmatpush.msrb.mxu2 %v4810_v56 }
 0x439   :  { %4922 = vmatpush.msrb.mxu3 %v4761_v37  ;;  %v4936_v37 = vpop.permute.xlu0 %4935 }
 0x43b   :  { %4924 = vmatpush.msrb.mxu3 %v4763_v9  ;;  %v7620_v9 = vld [vmem:[#allocation17_spill] sm:$0xff] }
 0x43c   :  { %v1037_v12 = vadd.f32 %v7620_v9, %v7619_v49 }
 0x43d   :  { %4926 = vmatpush.msrb.mxu3 %v4765_v16 }
 0x43e   :  { %v1070_v16 = vadd.f32 %v7621_v7, %v1037_v12 }
 0x43f   :  { %4928 = vmatpush.msrb.mxu3 %v4767_v38 }
 0x440   :  { %v4959_v33 = vsel %vm4958_vm3, %v1070_v16, %v4936_v37 }
 0x441   :  { %v4961_v1 = vsel %vm4960_vm4, %v4959_v33, %v4940_v28 }
 0x442   :  { %v4963_v38 = vsel %vm4962_vm5, %v4961_v1, %v4944_v51 }
 0x476   :  { %v4948_v25 = vpop.permute.xlu0 %4947 }
 0x477   :  { %v4965_v0 = vsel %vm4964_vm6, %v4963_v38, %v4948_v25 }
 0x496   :  { %v4393_v3 = vpop.f32.mrf.mxu1 }
 0x49e   :  { %v4332_v29 = vpop.f32.mrf.mxu0  ;;  %v4431_v36 = vpop.f32.mrf.mxu2 }
 0x49f   :  { %v4394_v60 = vadd.f32 %v4393_v3, %v4332_v29  ;;  %v4536_v35 = vpop.f32.mrf.mxu1 }
 0x4a0   :  { %v4462_v2 = vpop.f32.mrf.mxu3 }
 0x4a1   :  { %v4432_v21 = vadd.f32 %v4431_v36, %v4394_v60 }
 0x4a3   :  { %v4463_v5 = vadd.f32 %v4462_v2, %v4432_v21 }
 0x4a6   :  { %v4507_v6 = vpop.f32.mrf.mxu0  ;;  %v4577_v46 = vpop.f32.mrf.mxu2 }
 0x4a7   :  { %v4508_v23 = vadd.f32 %v4507_v6, %v4463_v5  ;;  %v4733_v13 = vpop.f32.mrf.mxu1 }
 0x4a8   :  { %v4618_v26 = vpop.f32.mrf.mxu3 }
 0x4a9   :  { %v4537_v63 = vadd.f32 %v4536_v35, %v4508_v23  ;;  %v4619_v47 = vadd.f32 %v4618_v26, %v4577_v46 }
 0x4ab   :  { %4951 = vrot.lane.b32.xlu1 %v4537_v63, %s5031_s3 }
 0x4ae   :  { %v4648_v48 = vpop.f32.mrf.mxu2  ;;  %v4708_v11 = vpop.f32.mrf.mxu0 }
 0x4af   :  { %v4649_v59 = vadd.f32 %v4648_v48, %v4619_v47 }
 0x4b0   :  { %v4675_v34 = vpop.f32.mrf.mxu3 }
 0x4b1   :  { %v4676_v55 = vadd.f32 %v4675_v34, %v4649_v59 }
 0x4b3   :  { %v4709_v17 = vadd.f32 %v4708_v11, %v4676_v55 }
 0x4b5   :  { %v4734_v30 = vadd.f32 %v4733_v13, %v4709_v17 }
 0x4b7   :  { %v4741_v44 = vmul.f32 %v4739_v40, %v4734_v30 }
 0x4b9   :  { %v4747_v10 = vsel %vm28_vm0, %v4741_v44, 0 }
 0x4ba   :  { %v4769_v31 = vand.u32 4294901760, %v4747_v10 }
 0x4bc   :  { %v4770_v61 = vsub.f32 %v4747_v10, %v4769_v31  ;;  %4815 = vmatmul.f32.vlgmr.msra.gmra.mxu3 %v4769_v31 }
 0x4be   :  { %4845 = vmatmul.f32.vlgmr.msrb.gmra.mxu0 %v4770_v61  ;;  %v4771_v53 = vand.u32 4294901760, %v4770_v61 }
 0x4c0   :  { %4872 = vmatmul.f32.vlgmr.msrb.gmra.mxu1 %v4771_v53  ;;  %v4772_v32 = vsub.f32 %v4770_v61, %v4771_v53 }
 0x4c2   :  { %v4773_v22 = vand.u32 4294901760, %v4772_v32 }
 0x4c4   :  { %4774 = vmatmul.f32.vlgmr.msra.gmra.mxu2 %v4773_v22  ;;  %4930 = vmatmul.f32.vlgmr.msrb.gmra.mxu3 %v4769_v31 }
 0x4cc   :  { %4905 = vmatmul.f32.vlgmr.msrb.gmra.mxu2 %v4769_v31 }
 0x51d   :  { %v4952_v18 = vpop.permute.xlu1 %4951 }
 0x51e   :  { %v4967_v8 = vsel %vm4966_vm7, %v4965_v0, %v4952_v18 }
 0x53b   :  { %v4846_v41 = vpop.f32.mrf.mxu0 }
 0x53d   :  { %v4873_v42 = vpop.f32.mrf.mxu1 }
 0x53f   :  { %v4816_v57 = vpop.f32.mrf.mxu3 }
 0x547   :  { %v4775_v20 = vpop.f32.mrf.mxu2  ;;  %v4931_v43 = vpop.f32.mrf.mxu3 }
 0x548   :  { %v4817_v27 = vadd.f32 %v4816_v57, %v4775_v20 }
 0x54a   :  { %v4847_v39 = vadd.f32 %v4846_v41, %v4817_v27 }
 0x54c   :  { %v4874_v58 = vadd.f32 %v4873_v42, %v4847_v39 }
 0x54f   :  { %v4906_v54 = vpop.f32.mrf.mxu2 }
 0x550   :  { %v4907_v15 = vadd.f32 %v4906_v54, %v4874_v58 }
 0x552   :  { %v4932_v50 = vadd.f32 %v4931_v43, %v4907_v15 }
 0x554   :  { %4955 = vrot.lane.b32.xlu2 %v4932_v50, %s5032_s8 }
 0x5ae   :  { %v4956_v4 = vpop.permute.xlu2 %4955 }
 0x5af   :  { %v4969_v14 = vsel %vm4968_vm8, %v4967_v8, %v4956_v4 }
 0x5b0   :  { %4971 = vst.msk [vmem:[#allocation2] sm:$0x3] %vm4970_vm9, %v4969_v14 }
 0x5b1   :  { %4982 = dma.vmem_to_hbm [thread:$0]  %s4978_s10, 32, %s4980_s13, [#allocation3]  }
 0x5b2   :  { %5022 = dma.done.wait [#allocation3], 32  }
 0x5b3   :  { %5023 = vsyncadd [#allocation3], 4294967264 }
 0x5b4   :  { %4987 = vsyncpa [#allocation3], 1 }

</bundles_post_ra>
